<compile_context>
chip_gen: v7x
topology: tpu7x:2x2x1
jax: 0.10.0
libtpu: 0.0.40
codegen_flags: <defaults>
</compile_context>

<pallas_src>
import functools

import jax
import jax.numpy as jnp
from jax.experimental import pallas as pl
from jax.experimental.pallas import tpu as pltpu

_VMEM_LIMIT = 32 * 1024 * 1024  # safe on v5e/v6e (128 MiB) and v7x (64 MiB)


def _gelu(x):
    c = 0.7978845608028654  # sqrt(2/pi)
    return 0.5 * x * (1.0 + jnp.tanh(c * (x + 0.044715 * x * x * x)))


def _largest_divisor(n, cap, multiple=8):
    """Largest divisor of n that is <= cap, preferring multiples of `multiple`."""
    best = None
    for b in range(min(n, cap), 0, -1):
        if n % b == 0:
            if b % multiple == 0:
                return b
            if best is None:
                best = b
    return best if best is not None else n


# --------------------------------------------------------------------------
# Kernels
# --------------------------------------------------------------------------
def stem_kernel(p_ref, w_ref, b_ref, s_ref, t_ref, o_ref):
    # patch_embed: conv (matmul over bf16 im2col patches) -> GELU -> BN
    y = jnp.dot(p_ref[...], w_ref[...], preferred_element_type=jnp.float32)
    y = y + b_ref[...]
    o_ref[...] = _gelu(y) * s_ref[...] + t_ref[...]


def mixer_fused_kernel(x_ref, wdw_ref, bdw_ref, bns_ref, bnb_ref, wpw_ref,
                       bpw_ref, o_ref, xpad_ref, *, ksize, pad):
    # One ConvMixerLayer per (batch, depth) grid step. The activation stays in
    # the padded VMEM scratch `xpad_ref` across all depth steps of a batch
    # element; per-layer weights are streamed in along the depth axis.
    d = pl.program_id(1)
    nd = pl.num_programs(1)
    _, H, W, C = o_ref.shape

    @pl.when(d == 0)
    def _():
        # (Re)initialize the padded activation for this batch element:
        # zero halo + interior = stem output. The halo is never written again.
        xpad_ref[...] = jnp.zeros_like(xpad_ref)
        xpad_ref[0, pad:pad + H, pad:pad + W, :] = x_ref[0]

    xpad = xpad_ref[0]                       # (Hp, Wp, C) f32
    wdw = wdw_ref[0]                         # (k, k, C)   f32
    bn_s = bns_ref[0]                        # (1, C)      f32
    bn_b = bnb_ref[0]                        # (1, C)      f32

    # Depthwise conv (groups=C): k*k shifted multiply-accumulate on the VPU.
    # Accumulator initialized with the first tap (no zeros + add).
    acc = xpad[0:H, 0:W, :] * wdw[0, 0]
    for dy in range(ksize):
        for dx in range(ksize):
            if dy == 0 and dx == 0:
                continue
            acc = acc + xpad[dy:dy + H, dx:dx + W, :] * wdw[dy, dx]
    acc = acc + bdw_ref[0]                   # (1, C) broadcast, hoisted

    # Residual read straight from the VMEM-resident padded buffer.
    resid = xpad[pad:pad + H, pad:pad + W, :]
    t = _gelu(acc * bn_s + bn_b) + resid     # gelu(bn(dw(x))) + x

    # Pointwise 1x1 conv: channel matmul on the MXU (bf16 in, f32 accumulate).
    tm = t.reshape(H * W, C).astype(jnp.bfloat16)
    y = jnp.dot(tm, wpw_ref[0], preferred_element_type=jnp.float32)
    y = _gelu((y + bpw_ref[0]) * bn_s + bn_b)        # gelu(bn(pw(t)))
    y3 = y.reshape(H, W, C)

    # Keep the activation VMEM-resident for the next layer.
    xpad_ref[0, pad:pad + H, pad:pad + W, :] = y3

    @pl.when(d == nd - 1)
    def _():
        o_ref[0] = y3


def bev_kernel(x_ref, w_ref, b_ref, s_ref, t_ref, o_ref):
    # bev_transform: 1x1 conv -> BN -> ReLU
    xb = x_ref[...].astype(jnp.bfloat16)
    y = jnp.dot(xb, w_ref[...], preferred_element_type=jnp.float32)
    y = (y + b_ref[...]) * s_ref[...] + t_ref[...]
    o_ref[...] = jnp.maximum(y, 0.0)


def fc_kernel(x_ref, w_ref, b_ref, o_ref, acc_ref):
    # Linear, tiled over the K reduction axis; bf16 weight blocks streamed in.
    @pl.when(pl.program_id(0) == 0)
    def _():
        acc_ref[...] = jnp.zeros_like(acc_ref)

    xb = x_ref[...].astype(jnp.bfloat16)
    acc_ref[...] += jnp.dot(xb, w_ref[...], preferred_element_type=jnp.float32)

    @pl.when(pl.program_id(0) == pl.num_programs(0) - 1)
    def _():
        o_ref[...] = acc_ref[...] + b_ref[...]


# --------------------------------------------------------------------------
# Stage wrappers (pallas_call)
# --------------------------------------------------------------------------
def stem_forward(patches, w, b, s, t):
    M, K = patches.shape
    C = w.shape[1]
    bm = _largest_divisor(M, 256)
    return pl.pallas_call(
        stem_kernel,
        out_shape=jax.ShapeDtypeStruct((M, C), jnp.float32),
        grid=(M // bm,),
        in_specs=[
            pl.BlockSpec((bm, K), lambda i: (i, 0)),
            pl.BlockSpec((K, C), lambda i: (0, 0)),
            pl.BlockSpec((1, C), lambda i: (0, 0)),
            pl.BlockSpec((1, C), lambda i: (0, 0)),
            pl.BlockSpec((1, C), lambda i: (0, 0)),
        ],
        out_specs=pl.BlockSpec((bm, C), lambda i: (i, 0)),
        compiler_params=pltpu.CompilerParams(
            dimension_semantics=("parallel",), vmem_limit_bytes=_VMEM_LIMIT),
    )(patches, w, b, s, t)


def mixer_forward_fused(x, mp, *, ksize):
    N, H, W, C = x.shape
    depth = mp["wdw"].shape[0]
    p = ksize // 2
    Hp, Wp = H + 2 * p, W + 2 * p
    kernel = functools.partial(mixer_fused_kernel, ksize=ksize, pad=p)
    return pl.pallas_call(
        kernel,
        out_shape=jax.ShapeDtypeStruct((N, H, W, C), jnp.float32),
        grid=(N, depth),
        in_specs=[
            # activation: constant block index over depth -> fetched once per n
            pl.BlockSpec((1, H, W, C), lambda n, d: (n, 0, 0, 0)),
            # per-layer weights, streamed along the depth axis
            pl.BlockSpec((1, ksize, ksize, C), lambda n, d: (d, 0, 0, 0)),
            pl.BlockSpec((1, 1, C), lambda n, d: (d, 0, 0)),
            pl.BlockSpec((1, 1, C), lambda n, d: (d, 0, 0)),
            pl.BlockSpec((1, 1, C), lambda n, d: (d, 0, 0)),
            pl.BlockSpec((1, C, C), lambda n, d: (d, 0, 0)),
            pl.BlockSpec((1, 1, C), lambda n, d: (d, 0, 0)),
        ],
        # constant block index over depth -> output resident across the depth loop
        out_specs=pl.BlockSpec((1, H, W, C), lambda n, d: (n, 0, 0, 0)),
        scratch_shapes=[pltpu.VMEM((1, Hp, Wp, C), jnp.float32)],
        compiler_params=pltpu.CompilerParams(
            dimension_semantics=("parallel", "arbitrary"),
            vmem_limit_bytes=_VMEM_LIMIT),
    )(x, mp["wdw"], mp["bdw"], mp["bn_s"], mp["bn_b"], mp["wpw"], mp["bpw"])


def bev_forward(flat, w, b, s, t):
    M, K = flat.shape
    C = w.shape[1]
    bm = _largest_divisor(M, 256)
    return pl.pallas_call(
        bev_kernel,
        out_shape=jax.ShapeDtypeStruct((M, C), jnp.float32),
        grid=(M // bm,),
        in_specs=[
            pl.BlockSpec((bm, K), lambda i: (i, 0)),
            pl.BlockSpec((K, C), lambda i: (0, 0)),
            pl.BlockSpec((1, C), lambda i: (0, 0)),
            pl.BlockSpec((1, C), lambda i: (0, 0)),
            pl.BlockSpec((1, C), lambda i: (0, 0)),
        ],
        out_specs=pl.BlockSpec((bm, C), lambda i: (i, 0)),
        compiler_params=pltpu.CompilerParams(
            dimension_semantics=("parallel",), vmem_limit_bytes=_VMEM_LIMIT),
    )(flat, w, b, s, t)


def fc_forward(flat, w, b):
    M, K = flat.shape
    O = w.shape[1]
    tk = _largest_divisor(K, 512, multiple=128)
    return pl.pallas_call(
        fc_kernel,
        out_shape=jax.ShapeDtypeStruct((M, O), jnp.float32),
        grid=(K // tk,),
        in_specs=[
            pl.BlockSpec((M, tk), lambda k: (0, k)),
            pl.BlockSpec((tk, O), lambda k: (k, 0)),
            pl.BlockSpec((1, O), lambda k: (0, 0)),
        ],
        out_specs=pl.BlockSpec((M, O), lambda k: (0, 0)),
        scratch_shapes=[pltpu.VMEM((M, O), jnp.float32)],
        compiler_params=pltpu.CompilerParams(
            dimension_semantics=("arbitrary",), vmem_limit_bytes=_VMEM_LIMIT),
    )(flat, w, b)


# --------------------------------------------------------------------------
# Glue: im2col for the stride-2 stem conv (host-side data gather only; the
# matmul runs in-kernel). Kept on the host: Cin is tiny so the expanded patch
# array is negligible, and patches are materialized in bf16 (half the bytes).
# --------------------------------------------------------------------------
def _im2col(xpad, k, oh, ow, stride):
    cols = []
    for dy in range(k):
        for dx in range(k):
            cols.append(xpad[:, dy:dy + stride * oh:stride,
                             dx:dx + stride * ow:stride, :])
    return jnp.concatenate(cols, axis=-1)    # (N, OH, OW, k*k*Cin), (dy,dx,ci)


# --------------------------------------------------------------------------
# Full backbone forward
# --------------------------------------------------------------------------
def convmixer_backbone_forward(camera_images_nchw, params, *, ksize, stride=2):
    x = jnp.transpose(camera_images_nchw, (0, 2, 3, 1))          # NHWC, f32
    N, H, W, Cin = x.shape
    p = ksize // 2
    OH = (H + 2 * p - ksize) // stride + 1
    OW = (W + 2 * p - ksize) // stride + 1

    # patch_embed: strided conv (im2col + matmul) -> GELU -> BN
    xpad = jnp.pad(x.astype(jnp.bfloat16), ((0, 0), (p, p), (p, p), (0, 0)))
    patches = _im2col(xpad, ksize, OH, OW, stride)
    patches = patches.reshape(N * OH * OW, ksize * ksize * Cin)
    y = stem_forward(patches, params["stem_w"], params["stem_b"],
                     params["stem_bn_s"], params["stem_bn_b"])
    C = y.shape[-1]
    y = y.reshape(N, OH, OW, C)

    # ConvMixer layers: single fused pallas_call over (batch, depth)
    y = mixer_forward_fused(y, params["mixer"], ksize=ksize)

    # bev_transform: 1x1 conv + BN + ReLU
    flat = y.reshape(N * OH * OW, C)
    bev = bev_forward(flat, params["bev_w"], params["bev_b"],
                      params["bev_bn_s"], params["bev_bn_b"])

    # fc: fc_w rows are pre-permuted to NHWC order, so the NHWC-flattened bev
    # output is consumed directly (no runtime NCHW transpose).
    bev_flat = bev.reshape(N, OH * OW * C)
    return fc_forward(bev_flat, params["fc_w"], params["fc_b"])


# --------------------------------------------------------------------------
# Deterministic synthetic parameters
# --------------------------------------------------------------------------
def _bn_affine(key, c):
    k1, k2, k3, k4 = jax.random.split(key, 4)
    gamma = 1.0 + 0.1 * jax.random.normal(k1, (c,))
    beta = 0.1 * jax.random.normal(k2, (c,))
    mean = 0.1 * jax.random.normal(k3, (c,))
    var = jax.random.uniform(k4, (c,), minval=0.5, maxval=1.5)
    s = gamma / jnp.sqrt(var + 1e-5)
    b = beta - mean * s
    return (s.reshape(1, c).astype(jnp.float32),
            b.reshape(1, c).astype(jnp.float32))


def init_params(key, in_ch, hidden, depth, ksize, oh, ow):
    keys = jax.random.split(key, 8 + depth)
    params = {}
    # stem conv weight as (k*k*in_ch, hidden), matching im2col (dy,dx,ci) order
    params["stem_w"] = (0.1 * jax.random.normal(
        keys[0], (ksize, ksize, in_ch, hidden))).reshape(
            ksize * ksize * in_ch, hidden).astype(jnp.bfloat16)
    params["stem_b"] = (0.1 * jax.random.normal(keys[1], (1, hidden))).astype(jnp.float32)
    params["stem_bn_s"], params["stem_bn_b"] = _bn_affine(keys[2], hidden)

    # mixer layer weights stacked along depth for the fused kernel
    wdw, bdw, wpw, bpw, bns, bnb = [], [], [], [], [], []
    for i in range(depth):
        lk = jax.random.split(keys[8 + i], 5)
        s, b = _bn_affine(lk[4], hidden)   # ONE BN per layer, used twice (matches reference)
        wdw.append(0.1 * jax.random.normal(lk[0], (ksize, ksize, hidden)))
        bdw.append(0.1 * jax.random.normal(lk[1], (1, hidden)))
        wpw.append(0.1 * jax.random.normal(lk[2], (hidden, hidden)))
        bpw.append(0.1 * jax.random.normal(lk[3], (1, hidden)))
        bns.append(s)
        bnb.append(b)
    params["mixer"] = dict(
        wdw=jnp.stack(wdw).astype(jnp.float32),     # depthwise stays f32 (VPU)
        bdw=jnp.stack(bdw).astype(jnp.float32),
        wpw=jnp.stack(wpw).astype(jnp.bfloat16),    # pointwise weight bf16 (MXU)
        bpw=jnp.stack(bpw).astype(jnp.float32),
        bn_s=jnp.stack(bns), bn_b=jnp.stack(bnb))

    params["bev_w"] = (0.1 * jax.random.normal(keys[3], (hidden, hidden))).astype(jnp.bfloat16)
    params["bev_b"] = (0.1 * jax.random.normal(keys[4], (1, hidden))).astype(jnp.float32)
    params["bev_bn_s"], params["bev_bn_b"] = _bn_affine(keys[5], hidden)

    # fc weight is logically defined for the PyTorch NCHW flatten (c, h, w);
    # its rows are pre-permuted offline to NHWC (h, w, c) order so the kernel
    # consumes the channels-last bev output directly.
    # original module hardcodes Linear(hidden*28*50, 512); here sized to hidden*OH*OW
    fdim = hidden * oh * ow
    fc_w_nchw = 0.02 * jax.random.normal(keys[6], (fdim, 512))
    fc_w_nhwc = fc_w_nchw.reshape(hidden, oh, ow, 512).transpose(1, 2, 0, 3)
    params["fc_w"] = fc_w_nhwc.reshape(fdim, 512).astype(jnp.bfloat16)
    params["fc_b"] = (0.02 * jax.random.normal(keys[7], (1, 512))).astype(jnp.float32)
    return params


if __name__ == "__main__":
    # Small synthetic shapes; hidden chosen as a multiple of 128 (lane width)
    # and spatial size so W after the stride-2 stem is a multiple of 8.
    N, Cin, H, W = 2, 3, 16, 16
    hidden, depth, ksize = 128, 2, 3

    key = jax.random.PRNGKey(0)
    kx, kp = jax.random.split(key)
    camera_images = jax.random.normal(kx, (N, Cin, H, W), dtype=jnp.float32)
    params = init_params(kp, Cin, hidden, depth, ksize, H // 2, W // 2)

    fwd = jax.jit(functools.partial(convmixer_backbone_forward, ksize=ksize))
    out = fwd(camera_images, params)
    out = jax.block_until_ready(out)
    assert out.shape == (N, 512) and out.dtype == jnp.float32
    print("KERNEL_OK")
</pallas_src>

<mosaic_0001>
module attributes {stable_mosaic.version = 11 : i64} {
  func.func @stem_kernel(%arg0: i32, %arg1: memref<128x27xbf16, #tpu.memory_space<vmem>>, %arg2: memref<27x128xbf16, #tpu.memory_space<vmem>>, %arg3: memref<1x128xf32, #tpu.memory_space<vmem>>, %arg4: memref<1x128xf32, #tpu.memory_space<vmem>>, %arg5: memref<1x128xf32, #tpu.memory_space<vmem>>, %arg6: memref<128x128xf32, #tpu.memory_space<vmem>>) attributes {dimension_semantics = [#tpu.dimension_semantics<parallel>], iteration_bounds = array<i64: 1>, scalar_prefetch = 0 : i64, scratch_operands = 0 : i64, tpu.core_type = #tpu.core_type<tc>, window_params = [{transform_indices = @transform_0, window_bounds = array<i64: 128, 27>}, {pipeline_mode = #tpu.pipeline_mode<synchronous>, transform_indices = @transform_1, window_bounds = array<i64: 27, 128>}, {pipeline_mode = #tpu.pipeline_mode<synchronous>, transform_indices = @transform_2, window_bounds = array<i64: 1, 128>}, {pipeline_mode = #tpu.pipeline_mode<synchronous>, transform_indices = @transform_3, window_bounds = array<i64: 1, 128>}, {pipeline_mode = #tpu.pipeline_mode<synchronous>, transform_indices = @transform_4, window_bounds = array<i64: 1, 128>}, {transform_indices = @transform_5, window_bounds = array<i64: 128, 128>}]} {
    %c0 = arith.constant 0 : index
    %c0_0 = arith.constant 0 : index
    %0 = vector.load %arg1[%c0, %c0_0] : memref<128x27xbf16, #tpu.memory_space<vmem>>, vector<128x27xbf16>
    %c0_1 = arith.constant 0 : index
    %c0_2 = arith.constant 0 : index
    %1 = vector.load %arg2[%c0_1, %c0_2] : memref<27x128xbf16, #tpu.memory_space<vmem>>, vector<27x128xbf16>
    %cst = arith.constant dense<0.000000e+00> : vector<128x128xf32>
    %2 = tpu.matmul %0, %1, %cst {dimension_numbers = #tpu.dot_dimension_numbers<[1], [0], [0], [1], [0, 0, 1, 1], [], []>} : vector<128x27xbf16>, vector<27x128xbf16>, vector<128x128xf32> -> vector<128x128xf32>
    %c0_3 = arith.constant 0 : index
    %c0_4 = arith.constant 0 : index
    %3 = vector.load %arg3[%c0_3, %c0_4] : memref<1x128xf32, #tpu.memory_space<vmem>>, vector<1x128xf32>
    %4 = vector.broadcast %3 : vector<1x128xf32> to vector<128x128xf32>
    %5 = arith.addf %2, %4 : vector<128x128xf32>
    %cst_5 = arith.constant 5.000000e-01 : f32
    %6 = vector.broadcast %cst_5 : f32 to vector<128x128xf32>
    %7 = arith.mulf %6, %5 : vector<128x128xf32>
    %cst_6 = arith.constant 4.471500e-02 : f32
    %8 = vector.broadcast %cst_6 : f32 to vector<128x128xf32>
    %9 = arith.mulf %8, %5 : vector<128x128xf32>
    %10 = arith.mulf %9, %5 : vector<128x128xf32>
    %11 = arith.mulf %10, %5 : vector<128x128xf32>
    %12 = arith.addf %5, %11 : vector<128x128xf32>
    %cst_7 = arith.constant 0.797884583 : f32
    %13 = vector.broadcast %cst_7 : f32 to vector<128x128xf32>
    %14 = arith.mulf %13, %12 : vector<128x128xf32>
    %15 = math.tanh %14 : vector<128x128xf32>
    %cst_8 = arith.constant 1.000000e+00 : f32
    %16 = vector.broadcast %cst_8 : f32 to vector<128x128xf32>
    %17 = arith.addf %16, %15 : vector<128x128xf32>
    %18 = arith.mulf %7, %17 : vector<128x128xf32>
    %c0_9 = arith.constant 0 : index
    %c0_10 = arith.constant 0 : index
    %19 = vector.load %arg4[%c0_9, %c0_10] : memref<1x128xf32, #tpu.memory_space<vmem>>, vector<1x128xf32>
    %20 = vector.broadcast %19 : vector<1x128xf32> to vector<128x128xf32>
    %21 = arith.mulf %18, %20 : vector<128x128xf32>
    %c0_11 = arith.constant 0 : index
    %c0_12 = arith.constant 0 : index
    %22 = vector.load %arg5[%c0_11, %c0_12] : memref<1x128xf32, #tpu.memory_space<vmem>>, vector<1x128xf32>
    %23 = vector.broadcast %22 : vector<1x128xf32> to vector<128x128xf32>
    %24 = arith.addf %21, %23 : vector<128x128xf32>
    %c0_13 = arith.constant 0 : index
    %c0_14 = arith.constant 0 : index
    %25 = vector.load %arg6[%c0_13, %c0_14] : memref<128x128xf32, #tpu.memory_space<vmem>>, vector<128x128xf32>
    tpu.vector_store %arg6[%c0_13, %c0_14], %24 {strides = array<i32>} : memref<128x128xf32, #tpu.memory_space<vmem>>, vector<128x128xf32>,
    return
  }
  func.func @transform_0(%arg0: i32) -> (i32, i32) {
    %c0_i32 = arith.constant 0 : i32
    %c0_i32_0 = arith.constant 0 : i32
    return %arg0, %c0_i32 : i32, i32
  }
  func.func @transform_1(%arg0: i32) -> (i32, i32) {
    %c0_i32 = arith.constant 0 : i32
    %c0_i32_0 = arith.constant 0 : i32
    %c0_i32_1 = arith.constant 0 : i32
    return %c0_i32, %c0_i32_0 : i32, i32
  }
  func.func @transform_2(%arg0: i32) -> (i32, i32) {
    %c0_i32 = arith.constant 0 : i32
    %c0_i32_0 = arith.constant 0 : i32
    %c0_i32_1 = arith.constant 0 : i32
    return %c0_i32, %c0_i32_0 : i32, i32
  }
  func.func @transform_3(%arg0: i32) -> (i32, i32) {
    %c0_i32 = arith.constant 0 : i32
    %c0_i32_0 = arith.constant 0 : i32
    %c0_i32_1 = arith.constant 0 : i32
    return %c0_i32, %c0_i32_0 : i32, i32
  }
  func.func @transform_4(%arg0: i32) -> (i32, i32) {
    %c0_i32 = arith.constant 0 : i32
    %c0_i32_0 = arith.constant 0 : i32
    %c0_i32_1 = arith.constant 0 : i32
    return %c0_i32, %c0_i32_0 : i32, i32
  }
  func.func @transform_5(%arg0: i32) -> (i32, i32) {
    %c0_i32 = arith.constant 0 : i32
    %c0_i32_0 = arith.constant 0 : i32
    return %arg0, %c0_i32 : i32, i32
  }
}

module attributes {stable_mosaic.version = 11 : i64} {
  func.func @mixer_fused_kernel(%arg0: i32, %arg1: i32, %arg2: memref<1x8x8x128xf32, #tpu.memory_space<vmem>>, %arg3: memref<1x3x3x128xf32, #tpu.memory_space<vmem>>, %arg4: memref<1x1x128xf32, #tpu.memory_space<vmem>>, %arg5: memref<1x1x128xf32, #tpu.memory_space<vmem>>, %arg6: memref<1x1x128xf32, #tpu.memory_space<vmem>>, %arg7: memref<1x128x128xbf16, #tpu.memory_space<vmem>>, %arg8: memref<1x1x128xf32, #tpu.memory_space<vmem>>, %arg9: memref<1x8x8x128xf32, #tpu.memory_space<vmem>>, %arg10: memref<1x10x10x128xf32, #tpu.memory_space<vmem>>) attributes {dimension_semantics = [#tpu.dimension_semantics<parallel>, #tpu.dimension_semantics<arbitrary>], iteration_bounds = array<i64: 2, 2>, scalar_prefetch = 0 : i64, scratch_operands = 1 : i64, tpu.core_type = #tpu.core_type<tc>, window_params = [{transform_indices = @transform_0, window_bounds = array<i64: 1, 8, 8, 128>}, {transform_indices = @transform_1, window_bounds = array<i64: 1, 3, 3, 128>}, {transform_indices = @transform_2, window_bounds = array<i64: 1, 1, 128>}, {transform_indices = @transform_3, window_bounds = array<i64: 1, 1, 128>}, {transform_indices = @transform_4, window_bounds = array<i64: 1, 1, 128>}, {transform_indices = @transform_5, window_bounds = array<i64: 1, 128, 128>}, {transform_indices = @transform_6, window_bounds = array<i64: 1, 1, 128>}, {transform_indices = @transform_7, window_bounds = array<i64: 1, 8, 8, 128>}]} {
    %c0_i32 = arith.constant 0 : i32
    %0 = arith.cmpi eq, %arg1, %c0_i32 : i32
    %1 = arith.extui %0 : i1 to i32
    %c0_i32_0 = arith.constant 0 : i32
    %2 = arith.cmpi ne, %1, %c0_i32_0 : i32
    scf.if %2 {
      %cst_35 = arith.constant 0.000000e+00 : f32
      %132 = vector.broadcast %cst_35 : f32 to vector<1x10x10x128xf32>
      %c0_36 = arith.constant 0 : index
      %c0_37 = arith.constant 0 : index
      %c0_38 = arith.constant 0 : index
      %c0_39 = arith.constant 0 : index
      %133 = vector.load %arg10[%c0_36, %c0_37, %c0_38, %c0_39] : memref<1x10x10x128xf32, #tpu.memory_space<vmem>>, vector<1x10x10x128xf32>
      tpu.vector_store %arg10[%c0_36, %c0_37, %c0_38, %c0_39], %132 {strides = array<i32>} : memref<1x10x10x128xf32, #tpu.memory_space<vmem>>, vector<1x10x10x128xf32>,
      %c0_40 = arith.constant 0 : index
      %c0_41 = arith.constant 0 : index
      %c0_42 = arith.constant 0 : index
      %c0_43 = arith.constant 0 : index
      %134 = vector.load %arg2[%c0_40, %c0_41, %c0_42, %c0_43] : memref<1x8x8x128xf32, #tpu.memory_space<vmem>>, vector<1x8x8x128xf32>
      %135 = vector.shape_cast %134 : vector<1x8x8x128xf32> to vector<8x8x128xf32>
      %c0_44 = arith.constant 0 : index
      %c1_45 = arith.constant 1 : index
      %c1_46 = arith.constant 1 : index
      %c0_47 = arith.constant 0 : index
      %136 = vector.load %arg10[%c0_44, %c1_45, %c1_46, %c0_47] : memref<1x10x10x128xf32, #tpu.memory_space<vmem>>, vector<1x8x8x128xf32>
      %137 = vector.shape_cast %136 : vector<1x8x8x128xf32> to vector<8x8x128xf32>
      %138 = vector.shape_cast %135 : vector<8x8x128xf32> to vector<1x8x8x128xf32>
      tpu.vector_store %arg10[%c0_44, %c1_45, %c1_46, %c0_47], %138 {strides = array<i32>} : memref<1x10x10x128xf32, #tpu.memory_space<vmem>>, vector<1x8x8x128xf32>,
    } else {
    }
    %c0 = arith.constant 0 : index
    %c0_1 = arith.constant 0 : index
    %c0_2 = arith.constant 0 : index
    %c0_3 = arith.constant 0 : index
    %3 = vector.load %arg10[%c0, %c0_1, %c0_2, %c0_3] : memref<1x10x10x128xf32, #tpu.memory_space<vmem>>, vector<1x10x10x128xf32>
    %4 = vector.shape_cast %3 : vector<1x10x10x128xf32> to vector<10x10x128xf32>
    %c0_4 = arith.constant 0 : index
    %c0_5 = arith.constant 0 : index
    %c0_6 = arith.constant 0 : index
    %c0_7 = arith.constant 0 : index
    %5 = vector.load %arg3[%c0_4, %c0_5, %c0_6, %c0_7] : memref<1x3x3x128xf32, #tpu.memory_space<vmem>>, vector<1x3x3x128xf32>
    %6 = vector.shape_cast %5 : vector<1x3x3x128xf32> to vector<3x3x128xf32>
    %c0_8 = arith.constant 0 : index
    %c0_9 = arith.constant 0 : index
    %c0_10 = arith.constant 0 : index
    %7 = vector.load %arg5[%c0_8, %c0_9, %c0_10] : memref<1x1x128xf32, #tpu.memory_space<vmem>>, vector<1x1x128xf32>
    %8 = vector.shape_cast %7 : vector<1x1x128xf32> to vector<1x128xf32>
    %c0_11 = arith.constant 0 : index
    %c0_12 = arith.constant 0 : index
    %c0_13 = arith.constant 0 : index
    %9 = vector.load %arg6[%c0_11, %c0_12, %c0_13] : memref<1x1x128xf32, #tpu.memory_space<vmem>>, vector<1x1x128xf32>
    %10 = vector.shape_cast %9 : vector<1x1x128xf32> to vector<1x128xf32>
    %11 = vector.extract_strided_slice %4 {offsets = [0, 0, 0], sizes = [8, 8, 128], strides = [1, 1, 1]} : vector<10x10x128xf32> to vector<8x8x128xf32>
    %12 = vector.extract_strided_slice %6 {offsets = [0, 0, 0], sizes = [1, 1, 128], strides = [1, 1, 1]} : vector<3x3x128xf32> to vector<1x1x128xf32>
    %13 = vector.shape_cast %12 : vector<1x1x128xf32> to vector<128xf32>
    %14 = vector.shape_cast %13 : vector<128xf32> to vector<1x1x128xf32>
    %15 = vector.broadcast %14 : vector<1x1x128xf32> to vector<8x8x128xf32>
    %16 = arith.mulf %11, %15 : vector<8x8x128xf32>
    %17 = vector.extract_strided_slice %4 {offsets = [0, 1, 0], sizes = [8, 8, 128], strides = [1, 1, 1]} : vector<10x10x128xf32> to vector<8x8x128xf32>
    %18 = vector.extract_strided_slice %6 {offsets = [0, 1, 0], sizes = [1, 1, 128], strides = [1, 1, 1]} : vector<3x3x128xf32> to vector<1x1x128xf32>
    %19 = vector.shape_cast %18 : vector<1x1x128xf32> to vector<128xf32>
    %20 = vector.shape_cast %19 : vector<128xf32> to vector<1x1x128xf32>
    %21 = vector.broadcast %20 : vector<1x1x128xf32> to vector<8x8x128xf32>
    %22 = arith.mulf %17, %21 : vector<8x8x128xf32>
    %23 = arith.addf %16, %22 : vector<8x8x128xf32>
    %24 = vector.extract_strided_slice %4 {offsets = [0, 2, 0], sizes = [8, 8, 128], strides = [1, 1, 1]} : vector<10x10x128xf32> to vector<8x8x128xf32>
    %25 = vector.extract_strided_slice %6 {offsets = [0, 2, 0], sizes = [1, 1, 128], strides = [1, 1, 1]} : vector<3x3x128xf32> to vector<1x1x128xf32>
    %26 = vector.shape_cast %25 : vector<1x1x128xf32> to vector<128xf32>
    %27 = vector.shape_cast %26 : vector<128xf32> to vector<1x1x128xf32>
    %28 = vector.broadcast %27 : vector<1x1x128xf32> to vector<8x8x128xf32>
    %29 = arith.mulf %24, %28 : vector<8x8x128xf32>
    %30 = arith.addf %23, %29 : vector<8x8x128xf32>
    %31 = vector.extract_strided_slice %4 {offsets = [1, 0, 0], sizes = [8, 8, 128], strides = [1, 1, 1]} : vector<10x10x128xf32> to vector<8x8x128xf32>
    %32 = vector.extract_strided_slice %6 {offsets = [1, 0, 0], sizes = [1, 1, 128], strides = [1, 1, 1]} : vector<3x3x128xf32> to vector<1x1x128xf32>
    %33 = vector.shape_cast %32 : vector<1x1x128xf32> to vector<128xf32>
    %34 = vector.shape_cast %33 : vector<128xf32> to vector<1x1x128xf32>
    %35 = vector.broadcast %34 : vector<1x1x128xf32> to vector<8x8x128xf32>
    %36 = arith.mulf %31, %35 : vector<8x8x128xf32>
    %37 = arith.addf %30, %36 : vector<8x8x128xf32>
    %38 = vector.extract_strided_slice %4 {offsets = [1, 1, 0], sizes = [8, 8, 128], strides = [1, 1, 1]} : vector<10x10x128xf32> to vector<8x8x128xf32>
    %39 = vector.extract_strided_slice %6 {offsets = [1, 1, 0], sizes = [1, 1, 128], strides = [1, 1, 1]} : vector<3x3x128xf32> to vector<1x1x128xf32>
    %40 = vector.shape_cast %39 : vector<1x1x128xf32> to vector<128xf32>
    %41 = vector.shape_cast %40 : vector<128xf32> to vector<1x1x128xf32>
    %42 = vector.broadcast %41 : vector<1x1x128xf32> to vector<8x8x128xf32>
    %43 = arith.mulf %38, %42 : vector<8x8x128xf32>
    %44 = arith.addf %37, %43 : vector<8x8x128xf32>
    %45 = vector.extract_strided_slice %4 {offsets = [1, 2, 0], sizes = [8, 8, 128], strides = [1, 1, 1]} : vector<10x10x128xf32> to vector<8x8x128xf32>
    %46 = vector.extract_strided_slice %6 {offsets = [1, 2, 0], sizes = [1, 1, 128], strides = [1, 1, 1]} : vector<3x3x128xf32> to vector<1x1x128xf32>
    %47 = vector.shape_cast %46 : vector<1x1x128xf32> to vector<128xf32>
    %48 = vector.shape_cast %47 : vector<128xf32> to vector<1x1x128xf32>
    %49 = vector.broadcast %48 : vector<1x1x128xf32> to vector<8x8x128xf32>
    %50 = arith.mulf %45, %49 : vector<8x8x128xf32>
    %51 = arith.addf %44, %50 : vector<8x8x128xf32>
    %52 = vector.extract_strided_slice %4 {offsets = [2, 0, 0], sizes = [8, 8, 128], strides = [1, 1, 1]} : vector<10x10x128xf32> to vector<8x8x128xf32>
    %53 = vector.extract_strided_slice %6 {offsets = [2, 0, 0], sizes = [1, 1, 128], strides = [1, 1, 1]} : vector<3x3x128xf32> to vector<1x1x128xf32>
    %54 = vector.shape_cast %53 : vector<1x1x128xf32> to vector<128xf32>
    %55 = vector.shape_cast %54 : vector<128xf32> to vector<1x1x128xf32>
    %56 = vector.broadcast %55 : vector<1x1x128xf32> to vector<8x8x128xf32>
    %57 = arith.mulf %52, %56 : vector<8x8x128xf32>
    %58 = arith.addf %51, %57 : vector<8x8x128xf32>
    %59 = vector.extract_strided_slice %4 {offsets = [2, 1, 0], sizes = [8, 8, 128], strides = [1, 1, 1]} : vector<10x10x128xf32> to vector<8x8x128xf32>
    %60 = vector.extract_strided_slice %6 {offsets = [2, 1, 0], sizes = [1, 1, 128], strides = [1, 1, 1]} : vector<3x3x128xf32> to vector<1x1x128xf32>
    %61 = vector.shape_cast %60 : vector<1x1x128xf32> to vector<128xf32>
    %62 = vector.shape_cast %61 : vector<128xf32> to vector<1x1x128xf32>
    %63 = vector.broadcast %62 : vector<1x1x128xf32> to vector<8x8x128xf32>
    %64 = arith.mulf %59, %63 : vector<8x8x128xf32>
    %65 = arith.addf %58, %64 : vector<8x8x128xf32>
    %66 = vector.extract_strided_slice %4 {offsets = [2, 2, 0], sizes = [8, 8, 128], strides = [1, 1, 1]} : vector<10x10x128xf32> to vector<8x8x128xf32>
    %67 = vector.extract_strided_slice %6 {offsets = [2, 2, 0], sizes = [1, 1, 128], strides = [1, 1, 1]} : vector<3x3x128xf32> to vector<1x1x128xf32>
    %68 = vector.shape_cast %67 : vector<1x1x128xf32> to vector<128xf32>
    %69 = vector.shape_cast %68 : vector<128xf32> to vector<1x1x128xf32>
    %70 = vector.broadcast %69 : vector<1x1x128xf32> to vector<8x8x128xf32>
    %71 = arith.mulf %66, %70 : vector<8x8x128xf32>
    %72 = arith.addf %65, %71 : vector<8x8x128xf32>
    %c0_14 = arith.constant 0 : index
    %c0_15 = arith.constant 0 : index
    %c0_16 = arith.constant 0 : index
    %73 = vector.load %arg4[%c0_14, %c0_15, %c0_16] : memref<1x1x128xf32, #tpu.memory_space<vmem>>, vector<1x1x128xf32>
    %74 = vector.shape_cast %73 : vector<1x1x128xf32> to vector<1x128xf32>
    %75 = vector.shape_cast %74 : vector<1x128xf32> to vector<1x1x128xf32>
    %76 = vector.broadcast %75 : vector<1x1x128xf32> to vector<8x8x128xf32>
    %77 = arith.addf %72, %76 : vector<8x8x128xf32>
    %78 = vector.extract_strided_slice %4 {offsets = [1, 1, 0], sizes = [8, 8, 128], strides = [1, 1, 1]} : vector<10x10x128xf32> to vector<8x8x128xf32>
    %79 = vector.shape_cast %8 : vector<1x128xf32> to vector<1x1x128xf32>
    %80 = vector.broadcast %79 : vector<1x1x128xf32> to vector<8x8x128xf32>
    %81 = arith.mulf %77, %80 : vector<8x8x128xf32>
    %82 = vector.shape_cast %10 : vector<1x128xf32> to vector<1x1x128xf32>
    %83 = vector.broadcast %82 : vector<1x1x128xf32> to vector<8x8x128xf32>
    %84 = arith.addf %81, %83 : vector<8x8x128xf32>
    %cst = arith.constant 5.000000e-01 : f32
    %85 = vector.broadcast %cst : f32 to vector<8x8x128xf32>
    %86 = arith.mulf %85, %84 : vector<8x8x128xf32>
    %cst_17 = arith.constant 4.471500e-02 : f32
    %87 = vector.broadcast %cst_17 : f32 to vector<8x8x128xf32>
    %88 = arith.mulf %87, %84 : vector<8x8x128xf32>
    %89 = arith.mulf %88, %84 : vector<8x8x128xf32>
    %90 = arith.mulf %89, %84 : vector<8x8x128xf32>
    %91 = arith.addf %84, %90 : vector<8x8x128xf32>
    %cst_18 = arith.constant 0.797884583 : f32
    %92 = vector.broadcast %cst_18 : f32 to vector<8x8x128xf32>
    %93 = arith.mulf %92, %91 : vector<8x8x128xf32>
    %94 = math.tanh %93 : vector<8x8x128xf32>
    %cst_19 = arith.constant 1.000000e+00 : f32
    %95 = vector.broadcast %cst_19 : f32 to vector<8x8x128xf32>
    %96 = arith.addf %95, %94 : vector<8x8x128xf32>
    %97 = arith.mulf %86, %96 : vector<8x8x128xf32>
    %98 = arith.addf %97, %78 : vector<8x8x128xf32>
    %99 = vector.shape_cast %98 : vector<8x8x128xf32> to vector<64x128xf32>
    %100 = arith.truncf %99 : vector<64x128xf32> to vector<64x128xbf16>
    %c0_20 = arith.constant 0 : index
    %c0_21 = arith.constant 0 : index
    %c0_22 = arith.constant 0 : index
    %101 = vector.load %arg7[%c0_20, %c0_21, %c0_22] : memref<1x128x128xbf16, #tpu.memory_space<vmem>>, vector<1x128x128xbf16>
    %102 = vector.shape_cast %101 : vector<1x128x128xbf16> to vector<128x128xbf16>
    %cst_23 = arith.constant dense<0.000000e+00> : vector<64x128xf32>
    %103 = tpu.matmul %100, %102, %cst_23 {dimension_numbers = #tpu.dot_dimension_numbers<[1], [0], [0], [1], [0, 0, 1, 1], [], []>} : vector<64x128xbf16>, vector<128x128xbf16>, vector<64x128xf32> -> vector<64x128xf32>
    %c0_24 = arith.constant 0 : index
    %c0_25 = arith.constant 0 : index
    %c0_26 = arith.constant 0 : index
    %104 = vector.load %arg8[%c0_24, %c0_25, %c0_26] : memref<1x1x128xf32, #tpu.memory_space<vmem>>, vector<1x1x128xf32>
    %105 = vector.shape_cast %104 : vector<1x1x128xf32> to vector<1x128xf32>
    %106 = vector.broadcast %105 : vector<1x128xf32> to vector<64x128xf32>
    %107 = arith.addf %103, %106 : vector<64x128xf32>
    %108 = vector.broadcast %8 : vector<1x128xf32> to vector<64x128xf32>
    %109 = arith.mulf %107, %108 : vector<64x128xf32>
    %110 = vector.broadcast %10 : vector<1x128xf32> to vector<64x128xf32>
    %111 = arith.addf %109, %110 : vector<64x128xf32>
    %cst_27 = arith.constant 5.000000e-01 : f32
    %112 = vector.broadcast %cst_27 : f32 to vector<64x128xf32>
    %113 = arith.mulf %112, %111 : vector<64x128xf32>
    %cst_28 = arith.constant 4.471500e-02 : f32
    %114 = vector.broadcast %cst_28 : f32 to vector<64x128xf32>
    %115 = arith.mulf %114, %111 : vector<64x128xf32>
    %116 = arith.mulf %115, %111 : vector<64x128xf32>
    %117 = arith.mulf %116, %111 : vector<64x128xf32>
    %118 = arith.addf %111, %117 : vector<64x128xf32>
    %cst_29 = arith.constant 0.797884583 : f32
    %119 = vector.broadcast %cst_29 : f32 to vector<64x128xf32>
    %120 = arith.mulf %119, %118 : vector<64x128xf32>
    %121 = math.tanh %120 : vector<64x128xf32>
    %cst_30 = arith.constant 1.000000e+00 : f32
    %122 = vector.broadcast %cst_30 : f32 to vector<64x128xf32>
    %123 = arith.addf %122, %121 : vector<64x128xf32>
    %124 = arith.mulf %113, %123 : vector<64x128xf32>
    %125 = vector.shape_cast %124 : vector<64x128xf32> to vector<8x8x128xf32>
    %c0_31 = arith.constant 0 : index
    %c1 = arith.constant 1 : index
    %c1_32 = arith.constant 1 : index
    %c0_33 = arith.constant 0 : index
    %126 = vector.load %arg10[%c0_31, %c1, %c1_32, %c0_33] : memref<1x10x10x128xf32, #tpu.memory_space<vmem>>, vector<1x8x8x128xf32>
    %127 = vector.shape_cast %126 : vector<1x8x8x128xf32> to vector<8x8x128xf32>
    %128 = vector.shape_cast %125 : vector<8x8x128xf32> to vector<1x8x8x128xf32>
    tpu.vector_store %arg10[%c0_31, %c1, %c1_32, %c0_33], %128 {strides = array<i32>} : memref<1x10x10x128xf32, #tpu.memory_space<vmem>>, vector<1x8x8x128xf32>,
    %c1_i32 = arith.constant 1 : i32
    %129 = arith.cmpi eq, %arg1, %c1_i32 : i32
    %130 = arith.extui %129 : i1 to i32
    %c0_i32_34 = arith.constant 0 : i32
    %131 = arith.cmpi ne, %130, %c0_i32_34 : i32
    scf.if %131 {
      %c0_35 = arith.constant 0 : index
      %c0_36 = arith.constant 0 : index
      %c0_37 = arith.constant 0 : index
      %c0_38 = arith.constant 0 : index
      %132 = vector.load %arg9[%c0_35, %c0_36, %c0_37, %c0_38] : memref<1x8x8x128xf32, #tpu.memory_space<vmem>>, vector<1x8x8x128xf32>
      %133 = vector.shape_cast %132 : vector<1x8x8x128xf32> to vector<8x8x128xf32>
      %134 = vector.shape_cast %125 : vector<8x8x128xf32> to vector<1x8x8x128xf32>
      tpu.vector_store %arg9[%c0_35, %c0_36, %c0_37, %c0_38], %134 {strides = array<i32>} : memref<1x8x8x128xf32, #tpu.memory_space<vmem>>, vector<1x8x8x128xf32>,
    } else {
    }
    return
  }
  func.func @transform_0(%arg0: i32, %arg1: i32) -> (i32, i32, i32, i32) {
    %c0_i32 = arith.constant 0 : i32
    %c0_i32_0 = arith.constant 0 : i32
    %c0_i32_1 = arith.constant 0 : i32
    %c0_i32_2 = arith.constant 0 : i32
    return %arg0, %c0_i32, %c0_i32_0, %c0_i32_1 : i32, i32, i32, i32
  }
  func.func @transform_1(%arg0: i32, %arg1: i32) -> (i32, i32, i32, i32) {
    %c0_i32 = arith.constant 0 : i32
    %c0_i32_0 = arith.constant 0 : i32
    %c0_i32_1 = arith.constant 0 : i32
    %c0_i32_2 = arith.constant 0 : i32
    return %arg1, %c0_i32, %c0_i32_0, %c0_i32_1 : i32, i32, i32, i32
  }
  func.func @transform_2(%arg0: i32, %arg1: i32) -> (i32, i32, i32) {
    %c0_i32 = arith.constant 0 : i32
    %c0_i32_0 = arith.constant 0 : i32
    %c0_i32_1 = arith.constant 0 : i32
    return %arg1, %c0_i32, %c0_i32_0 : i32, i32, i32
  }
  func.func @transform_3(%arg0: i32, %arg1: i32) -> (i32, i32, i32) {
    %c0_i32 = arith.constant 0 : i32
    %c0_i32_0 = arith.constant 0 : i32
    %c0_i32_1 = arith.constant 0 : i32
    return %arg1, %c0_i32, %c0_i32_0 : i32, i32, i32
  }
  func.func @transform_4(%arg0: i32, %arg1: i32) -> (i32, i32, i32) {
    %c0_i32 = arith.constant 0 : i32
    %c0_i32_0 = arith.constant 0 : i32
    %c0_i32_1 = arith.constant 0 : i32
    return %arg1, %c0_i32, %c0_i32_0 : i32, i32, i32
  }
  func.func @transform_5(%arg0: i32, %arg1: i32) -> (i32, i32, i32) {
    %c0_i32 = arith.constant 0 : i32
    %c0_i32_0 = arith.constant 0 : i32
    %c0_i32_1 = arith.constant 0 : i32
    return %arg1, %c0_i32, %c0_i32_0 : i32, i32, i32
  }
  func.func @transform_6(%arg0: i32, %arg1: i32) -> (i32, i32, i32) {
    %c0_i32 = arith.constant 0 : i32
    %c0_i32_0 = arith.constant 0 : i32
    %c0_i32_1 = arith.constant 0 : i32
    return %arg1, %c0_i32, %c0_i32_0 : i32, i32, i32
  }
  func.func @transform_7(%arg0: i32, %arg1: i32) -> (i32, i32, i32, i32) {
    %c0_i32 = arith.constant 0 : i32
    %c0_i32_0 = arith.constant 0 : i32
    %c0_i32_1 = arith.constant 0 : i32
    %c0_i32_2 = arith.constant 0 : i32
    return %arg0, %c0_i32, %c0_i32_0, %c0_i32_1 : i32, i32, i32, i32
  }
}

module attributes {stable_mosaic.version = 11 : i64} {
  func.func @bev_kernel(%arg0: i32, %arg1: memref<128x128xf32, #tpu.memory_space<vmem>>, %arg2: memref<128x128xbf16, #tpu.memory_space<vmem>>, %arg3: memref<1x128xf32, #tpu.memory_space<vmem>>, %arg4: memref<1x128xf32, #tpu.memory_space<vmem>>, %arg5: memref<1x128xf32, #tpu.memory_space<vmem>>, %arg6: memref<128x128xf32, #tpu.memory_space<vmem>>) attributes {dimension_semantics = [#tpu.dimension_semantics<parallel>], iteration_bounds = array<i64: 1>, scalar_prefetch = 0 : i64, scratch_operands = 0 : i64, tpu.core_type = #tpu.core_type<tc>, window_params = [{transform_indices = @transform_0, window_bounds = array<i64: 128, 128>}, {pipeline_mode = #tpu.pipeline_mode<synchronous>, transform_indices = @transform_1, window_bounds = array<i64: 128, 128>}, {pipeline_mode = #tpu.pipeline_mode<synchronous>, transform_indices = @transform_2, window_bounds = array<i64: 1, 128>}, {pipeline_mode = #tpu.pipeline_mode<synchronous>, transform_indices = @transform_3, window_bounds = array<i64: 1, 128>}, {pipeline_mode = #tpu.pipeline_mode<synchronous>, transform_indices = @transform_4, window_bounds = array<i64: 1, 128>}, {transform_indices = @transform_5, window_bounds = array<i64: 128, 128>}]} {
    %c0 = arith.constant 0 : index
    %c0_0 = arith.constant 0 : index
    %0 = vector.load %arg1[%c0, %c0_0] : memref<128x128xf32, #tpu.memory_space<vmem>>, vector<128x128xf32>
    %1 = arith.truncf %0 : vector<128x128xf32> to vector<128x128xbf16>
    %c0_1 = arith.constant 0 : index
    %c0_2 = arith.constant 0 : index
    %2 = vector.load %arg2[%c0_1, %c0_2] : memref<128x128xbf16, #tpu.memory_space<vmem>>, vector<128x128xbf16>
    %cst = arith.constant dense<0.000000e+00> : vector<128x128xf32>
    %3 = tpu.matmul %1, %2, %cst {dimension_numbers = #tpu.dot_dimension_numbers<[1], [0], [0], [1], [0, 0, 1, 1], [], []>} : vector<128x128xbf16>, vector<128x128xbf16>, vector<128x128xf32> -> vector<128x128xf32>
    %c0_3 = arith.constant 0 : index
    %c0_4 = arith.constant 0 : index
    %4 = vector.load %arg3[%c0_3, %c0_4] : memref<1x128xf32, #tpu.memory_space<vmem>>, vector<1x128xf32>
    %5 = vector.broadcast %4 : vector<1x128xf32> to vector<128x128xf32>
    %6 = arith.addf %3, %5 : vector<128x128xf32>
    %c0_5 = arith.constant 0 : index
    %c0_6 = arith.constant 0 : index
    %7 = vector.load %arg4[%c0_5, %c0_6] : memref<1x128xf32, #tpu.memory_space<vmem>>, vector<1x128xf32>
    %8 = vector.broadcast %7 : vector<1x128xf32> to vector<128x128xf32>
    %9 = arith.mulf %6, %8 : vector<128x128xf32>
    %c0_7 = arith.constant 0 : index
    %c0_8 = arith.constant 0 : index
    %10 = vector.load %arg5[%c0_7, %c0_8] : memref<1x128xf32, #tpu.memory_space<vmem>>, vector<1x128xf32>
    %11 = vector.broadcast %10 : vector<1x128xf32> to vector<128x128xf32>
    %12 = arith.addf %9, %11 : vector<128x128xf32>
    %cst_9 = arith.constant 0.000000e+00 : f32
    %13 = vector.broadcast %cst_9 : f32 to vector<128x128xf32>
    %14 = arith.maximumf %12, %13 : vector<128x128xf32>
    %c0_10 = arith.constant 0 : index
    %c0_11 = arith.constant 0 : index
    %15 = vector.load %arg6[%c0_10, %c0_11] : memref<128x128xf32, #tpu.memory_space<vmem>>, vector<128x128xf32>
    tpu.vector_store %arg6[%c0_10, %c0_11], %14 {strides = array<i32>} : memref<128x128xf32, #tpu.memory_space<vmem>>, vector<128x128xf32>,
    return
  }
  func.func @transform_0(%arg0: i32) -> (i32, i32) {
    %c0_i32 = arith.constant 0 : i32
    %c0_i32_0 = arith.constant 0 : i32
    return %arg0, %c0_i32 : i32, i32
  }
  func.func @transform_1(%arg0: i32) -> (i32, i32) {
    %c0_i32 = arith.constant 0 : i32
    %c0_i32_0 = arith.constant 0 : i32
    %c0_i32_1 = arith.constant 0 : i32
    return %c0_i32, %c0_i32_0 : i32, i32
  }
  func.func @transform_2(%arg0: i32) -> (i32, i32) {
    %c0_i32 = arith.constant 0 : i32
    %c0_i32_0 = arith.constant 0 : i32
    %c0_i32_1 = arith.constant 0 : i32
    return %c0_i32, %c0_i32_0 : i32, i32
  }
  func.func @transform_3(%arg0: i32) -> (i32, i32) {
    %c0_i32 = arith.constant 0 : i32
    %c0_i32_0 = arith.constant 0 : i32
    %c0_i32_1 = arith.constant 0 : i32
    return %c0_i32, %c0_i32_0 : i32, i32
  }
  func.func @transform_4(%arg0: i32) -> (i32, i32) {
    %c0_i32 = arith.constant 0 : i32
    %c0_i32_0 = arith.constant 0 : i32
    %c0_i32_1 = arith.constant 0 : i32
    return %c0_i32, %c0_i32_0 : i32, i32
  }
  func.func @transform_5(%arg0: i32) -> (i32, i32) {
    %c0_i32 = arith.constant 0 : i32
    %c0_i32_0 = arith.constant 0 : i32
    return %arg0, %c0_i32 : i32, i32
  }
}

module attributes {stable_mosaic.version = 11 : i64} {
  func.func @fc_kernel(%arg0: i32, %arg1: memref<2x512xf32, #tpu.memory_space<vmem>>, %arg2: memref<512x512xbf16, #tpu.memory_space<vmem>>, %arg3: memref<1x512xf32, #tpu.memory_space<vmem>>, %arg4: memref<2x512xf32, #tpu.memory_space<vmem>>, %arg5: memref<2x512xf32, #tpu.memory_space<vmem>>) attributes {dimension_semantics = [#tpu.dimension_semantics<arbitrary>], iteration_bounds = array<i64: 16>, scalar_prefetch = 0 : i64, scratch_operands = 1 : i64, tpu.core_type = #tpu.core_type<tc>, window_params = [{transform_indices = @transform_0, window_bounds = array<i64: 2, 512>}, {transform_indices = @transform_1, window_bounds = array<i64: 512, 512>}, {pipeline_mode = #tpu.pipeline_mode<synchronous>, transform_indices = @transform_2, window_bounds = array<i64: 1, 512>}, {pipeline_mode = #tpu.pipeline_mode<synchronous>, transform_indices = @transform_3, window_bounds = array<i64: 2, 512>}]} {
    %c0_i32 = arith.constant 0 : i32
    %0 = arith.cmpi eq, %arg0, %c0_i32 : i32
    %1 = arith.extui %0 : i1 to i32
    %c0_i32_0 = arith.constant 0 : i32
    %2 = arith.cmpi ne, %1, %c0_i32_0 : i32
    scf.if %2 {
      %cst_9 = arith.constant 0.000000e+00 : f32
      %13 = vector.broadcast %cst_9 : f32 to vector<2x512xf32>
      %c0_10 = arith.constant 0 : index
      %c0_11 = arith.constant 0 : index
      %14 = vector.load %arg5[%c0_10, %c0_11] : memref<2x512xf32, #tpu.memory_space<vmem>>, vector<2x512xf32>
      tpu.vector_store %arg5[%c0_10, %c0_11], %13 {strides = array<i32>} : memref<2x512xf32, #tpu.memory_space<vmem>>, vector<2x512xf32>,
    } else {
    }
    %c0 = arith.constant 0 : index
    %c0_1 = arith.constant 0 : index
    %3 = vector.load %arg1[%c0, %c0_1] : memref<2x512xf32, #tpu.memory_space<vmem>>, vector<2x512xf32>
    %4 = arith.truncf %3 : vector<2x512xf32> to vector<2x512xbf16>
    %c0_2 = arith.constant 0 : index
    %c0_3 = arith.constant 0 : index
    %5 = vector.load %arg5[%c0_2, %c0_3] : memref<2x512xf32, #tpu.memory_space<vmem>>, vector<2x512xf32>
    %c0_4 = arith.constant 0 : index
    %c0_5 = arith.constant 0 : index
    %6 = vector.load %arg2[%c0_4, %c0_5] : memref<512x512xbf16, #tpu.memory_space<vmem>>, vector<512x512xbf16>
    %cst = arith.constant dense<0.000000e+00> : vector<2x512xf32>
    %7 = tpu.matmul %4, %6, %cst {dimension_numbers = #tpu.dot_dimension_numbers<[1], [0], [0], [1], [0, 0, 1, 1], [], []>} : vector<2x512xbf16>, vector<512x512xbf16>, vector<2x512xf32> -> vector<2x512xf32>
    %8 = arith.addf %5, %7 : vector<2x512xf32>
    %c0_6 = arith.constant 0 : index
    %c0_7 = arith.constant 0 : index
    %9 = vector.load %arg5[%c0_6, %c0_7] : memref<2x512xf32, #tpu.memory_space<vmem>>, vector<2x512xf32>
    tpu.vector_store %arg5[%c0_6, %c0_7], %8 {strides = array<i32>} : memref<2x512xf32, #tpu.memory_space<vmem>>, vector<2x512xf32>,
    %c15_i32 = arith.constant 15 : i32
    %10 = arith.cmpi eq, %arg0, %c15_i32 : i32
    %11 = arith.extui %10 : i1 to i32
    %c0_i32_8 = arith.constant 0 : i32
    %12 = arith.cmpi ne, %11, %c0_i32_8 : i32
    scf.if %12 {
      %c0_9 = arith.constant 0 : index
      %c0_10 = arith.constant 0 : index
      %13 = vector.load %arg5[%c0_9, %c0_10] : memref<2x512xf32, #tpu.memory_space<vmem>>, vector<2x512xf32>
      %c0_11 = arith.constant 0 : index
      %c0_12 = arith.constant 0 : index
      %14 = vector.load %arg3[%c0_11, %c0_12] : memref<1x512xf32, #tpu.memory_space<vmem>>, vector<1x512xf32>
      %15 = vector.broadcast %14 : vector<1x512xf32> to vector<2x512xf32>
      %16 = arith.addf %13, %15 : vector<2x512xf32>
      %c0_13 = arith.constant 0 : index
      %c0_14 = arith.constant 0 : index
      %17 = vector.load %arg4[%c0_13, %c0_14] : memref<2x512xf32, #tpu.memory_space<vmem>>, vector<2x512xf32>
      tpu.vector_store %arg4[%c0_13, %c0_14], %16 {strides = array<i32>} : memref<2x512xf32, #tpu.memory_space<vmem>>, vector<2x512xf32>,
    } else {
    }
    return
  }
  func.func @transform_0(%arg0: i32) -> (i32, i32) {
    %c0_i32 = arith.constant 0 : i32
    %c0_i32_0 = arith.constant 0 : i32
    return %c0_i32, %arg0 : i32, i32
  }
  func.func @transform_1(%arg0: i32) -> (i32, i32) {
    %c0_i32 = arith.constant 0 : i32
    %c0_i32_0 = arith.constant 0 : i32
    return %arg0, %c0_i32 : i32, i32
  }
  func.func @transform_2(%arg0: i32) -> (i32, i32) {
    %c0_i32 = arith.constant 0 : i32
    %c0_i32_0 = arith.constant 0 : i32
    %c0_i32_1 = arith.constant 0 : i32
    return %c0_i32, %c0_i32_0 : i32, i32
  }
  func.func @transform_3(%arg0: i32) -> (i32, i32) {
    %c0_i32 = arith.constant 0 : i32
    %c0_i32_0 = arith.constant 0 : i32
    %c0_i32_1 = arith.constant 0 : i32
    return %c0_i32, %c0_i32_0 : i32, i32
  }
}

</mosaic_0001>

<bundles_post_ra>
// kernel: convmixer_backbone_forward.6
= control target key start
LH: loop header
LB: loop body
LE: loop exit
PB: predicated region body
PF: predicated region fallthrough
CT: control target
= control target key end

     0   :  { %10 = vsyncpa [#allocation3], 0  ;;  %s771_s0 = inlined_call_operand.vmem [shape: f32[128,128], index: 0, kind: input, shape index: {}]   ;;  %s772_s1 = inlined_call_operand.hbm [shape: bf16[128,128], index: 1, kind: input, shape index: {}]   ;;  %s773_s2 = inlined_call_operand.hbm [shape: f32[1,128], index: 2, kind: input, shape index: {}]   ;;  %s774_s3 = inlined_call_operand.hbm [shape: f32[1,128], index: 3, kind: input, shape index: {}]   ;;  %s775_s4 = inlined_call_operand.hbm [shape: f32[1,128], index: 4, kind: input, shape index: {}]   ;;  %s776_s5 = inlined_call_operand.vmem [shape: f32[128,128], index: 5, kind: output, shape index: {}]  }
   0x1   :  { %11 = vsyncpa [#allocation5], 0 }
   0x2   :  { %12 = vsyncpa [#allocation8], 0  ;;  %s530_s18 = smov [#allocation4]   ;;  %s531_s20 = smov [#allocation2]  }
   0x3   :  { %s33_s19 = sshll.u32 %s530_s18, 4  ;;  %s20_s21 = sshll.u32 %s531_s20, 4  ;;  %s34_s19 = int_to_ptr.vmem [resolvable:$true] %s33_s19  ;;  %s566_s21 = int_to_ptr.vmem [resolvable:$true] %s20_s21 }
   0x4   :  { %s436_s24 = scalar_lea.hbm %s773_s2, 16 }
   0x5   :  { %p437_p0 = scmp.ne.s32.totalorder %s773_s2, %s436_s24  ;;  %p440_p1 = scmp.lt.u32.totalorder %s436_s24, %s773_s2 }
   0x7   :  { %p442_p2 = pnand %p440_p1, %p437_p0 }
   0x9   :  { %445 = shalt.err (!%p442_p2)
}
   0xa   :  { %s446_s29 = scalar_lea.vmem %s34_s19, 16  ;;  %s450_s30 = scalar_lea.vmem %s34_s19, 32 }
   0xb   :  { %p447_p3 = scmp.ne.s32.totalorder %s34_s19, %s446_s29  ;;  %p451_p4 = scmp.lt.s32.totalorder %s34_s19, %s34_s19 }
   0xc   :  { %p452_p5 = scmp.lt.s32.totalorder %s450_s30, %s446_s29 }
   0xe   :  { %p453_p6 = por %p452_p5, %p451_p4 }
  0x10   :  { %p454_p7 = pnand %p453_p6, %p447_p3 }
  0x12   :  { %457 = shalt.err (!%p454_p7)
}
  0x13   :  { %36 = dma.hbm_to_vmem [thread:$0]  %s773_s2, 16, %s34_s19, [#allocation5]  }
  0x14   :  { %s458_s10 = scalar_lea.hbm %s772_s1, 1024 }
  0x15   :  { %p459_p8 = scmp.ne.s32.totalorder %s772_s1, %s458_s10  ;;  %p462_p9 = scmp.lt.u32.totalorder %s458_s10, %s772_s1 }
  0x17   :  { %p464_p10 = pnand %p462_p9, %p459_p8 }
  0x19   :  { %467 = shalt.err (!%p464_p10)
}
  0x1a   :  { %s468_s15 = scalar_lea.vmem %s566_s21, 1024  ;;  %p473_p12 = scmp.lt.s32.totalorder %s566_s21, %s566_s21 }
  0x1b   :  { %p469_p11 = scmp.ne.s32.totalorder %s566_s21, %s468_s15  ;;  %p474_p13 = scmp.lt.s32.totalorder %s468_s15, %s468_s15 }
  0x1d   :  { %p475_p0 = por %p474_p13, %p473_p12 }
  0x1f   :  { %p476_p1 = pnand %p475_p0, %p469_p11 }
  0x21   :  { %479 = shalt.err (!%p476_p1)
}
  0x22   :  { %s532_s2 = smov 64   ;;  %s533_s16 = smov 4  }
  0x23   :  { %26 = dma.hbm_to_vmem [thread:$0]  %s772_s1, 1024, %s566_s21, [#allocation3], %s532_s2, %s532_s2, %s533_s16  }
  0x24   :  { %s534_s19 = smov [#allocation6]   ;;  %s535_s22 = smov [#allocation7]  }
  0x25   :  { %s43_s20 = sshll.u32 %s534_s19, 4  ;;  %s53_s23 = sshll.u32 %s535_s22, 4  ;;  %s44_s20 = int_to_ptr.vmem [resolvable:$true] %s43_s20  ;;  %s54_s23 = int_to_ptr.vmem [resolvable:$true] %s53_s23 }
  0x26   :  { %s480_s26 = scalar_lea.hbm %s774_s3, 16 }
  0x27   :  { %p481_p2 = scmp.ne.s32.totalorder %s774_s3, %s480_s26  ;;  %p484_p3 = scmp.lt.u32.totalorder %s480_s26, %s774_s3 }
  0x29   :  { %p486_p4 = pnand %p484_p3, %p481_p2 }
  0x2b   :  { %489 = shalt.err (!%p486_p4)
}
  0x2c   :  { %s490_s1 = scalar_lea.vmem %s44_s20, 16  ;;  %s494_s21 = scalar_lea.vmem %s44_s20, 32 }
  0x2d   :  { %p491_p5 = scmp.ne.s32.totalorder %s44_s20, %s490_s1  ;;  %p495_p6 = scmp.lt.s32.totalorder %s44_s20, %s44_s20 }
  0x2e   :  { %p496_p7 = scmp.lt.s32.totalorder %s494_s21, %s490_s1 }
  0x30   :  { %p497_p8 = por %p496_p7, %p495_p6 }
  0x32   :  { %p498_p9 = pnand %p497_p8, %p491_p5 }
  0x34   :  { %501 = shalt.err (!%p498_p9)
}
  0x35   :  { %46 = dma.hbm_to_vmem [thread:$0]  %s774_s3, 16, %s44_s20, [#allocation5]  }
  0x36   :  { %s502_s10 = scalar_lea.hbm %s775_s4, 16 }
  0x37   :  { %p503_p10 = scmp.ne.s32.totalorder %s775_s4, %s502_s10  ;;  %p506_p11 = scmp.lt.u32.totalorder %s502_s10, %s775_s4 }
  0x39   :  { %p508_p12 = pnand %p506_p11, %p503_p10 }
  0x3b   :  { %511 = shalt.err (!%p508_p12)
}
  0x3c   :  { %s512_s15 = scalar_lea.vmem %s54_s23, 16  ;;  %s516_s2 = scalar_lea.vmem %s54_s23, 32 }
  0x3d   :  { %p513_p13 = scmp.ne.s32.totalorder %s54_s23, %s512_s15  ;;  %p517_p0 = scmp.lt.s32.totalorder %s54_s23, %s54_s23 }
  0x3e   :  { %p518_p1 = scmp.lt.s32.totalorder %s516_s2, %s512_s15 }
  0x40   :  { %p519_p2 = por %p518_p1, %p517_p0 }
  0x42   :  { %p520_p3 = pnand %p519_p2, %p513_p13 }
  0x44   :  { %523 = shalt.err (!%p520_p3)
}
  0x45   :  { %56 = dma.hbm_to_vmem [thread:$0]  %s775_s4, 16, %s54_s23, [#allocation8]  }
  0x46   :  { %524 = dma.done.wait [#allocation3], 1024  }
  0x47   :  { %525 = vsyncadd [#allocation3], 4294966272 }
  0x48   :  { %526 = dma.done.wait [#allocation5], 32  }
  0x49   :  { %527 = vsyncadd [#allocation5], 4294967264 }
  0x4a   :  { %528 = dma.done.wait [#allocation8], 16  }
  0x4b   :  { %529 = vsyncadd [#allocation8], 4294967280  ;;  %v428_v0 = vld [vmem:[#allocation2] sm:$0xff]   ;;  %v429_v1 = vld [vmem:[#allocation2 + $0x8] sm:$0xff]  }
  0x4c   :  { %374 = vmatprep.subr.bf16.mxu0 %v428_v0  ;;  %406 = vmatprep.subr.bf16.mxu1 %v428_v0  ;;  %v430_v2 = vld [vmem:[#allocation2 + $0x10] sm:$0xff]   ;;  %v431_v3 = vld [vmem:[#allocation2 + $0x18] sm:$0xff]   ;;  %v70_v4 = vld [vmem:[%s771_s0] sm:$0xff] }
  0x4d   :  { %375 = vmatpush3.bf16.msra.mxu0 %v428_v0  ;;  %414 = vmatpush3.bf16.msra.mxu1 %v428_v0  ;;  %v71_v5 = vld [vmem:[%s771_s0 + $0x8] sm:$0xff]  ;;  %v78_v6 = vld [vmem:[%s771_s0 + $0x40] sm:$0xff]  ;;  %v434_v12 = vld [vmem:[#allocation2 + $0x30] sm:$0xff]  }
  0x4e   :  { %376 = vmatprep.subr.bf16.mxu0 %v429_v1  ;;  %407 = vmatprep.subr.bf16.mxu1 %v429_v1  ;;  %v86_v7 = vpack.c.bf16 %v71_v5, %v70_v4  ;;  %v79_v8 = vld [vmem:[%s771_s0 + $0x48] sm:$0xff]  ;;  %v432_v10 = vld [vmem:[#allocation2 + $0x20] sm:$0xff]   ;;  %v435_v13 = vld [vmem:[#allocation2 + $0x38] sm:$0xff]  }
  0x4f   :  { %v90_v9 = vpack.c.bf16 %v79_v8, %v78_v6  ;;  %v433_v11 = vld [vmem:[#allocation2 + $0x28] sm:$0xff]   ;;  %v72_v14 = vld [vmem:[%s771_s0 + $0x10] sm:$0xff]  ;;  %v73_v15 = vld [vmem:[%s771_s0 + $0x18] sm:$0xff] }
  0x50   :  { %390 = vmatprep.mubr.bf16.mxu0 %v86_v7  ;;  %v80_v16 = vld [vmem:[%s771_s0 + $0x50] sm:$0xff]  ;;  %v81_v17 = vld [vmem:[%s771_s0 + $0x58] sm:$0xff]  ;;  %v74_v18 = vld [vmem:[%s771_s0 + $0x20] sm:$0xff]  ;;  %v87_v22 = vpack.c.bf16 %v73_v15, %v72_v14 }
  0x51   :  { %377 = vmatpush3.bf16.msra.mxu0 %v429_v1  ;;  %415 = vmatpush3.bf16.msra.mxu1 %v429_v1  ;;  %v75_v19 = vld [vmem:[%s771_s0 + $0x28] sm:$0xff]  ;;  %v82_v20 = vld [vmem:[%s771_s0 + $0x60] sm:$0xff]  ;;  %v91_v23 = vpack.c.bf16 %v81_v17, %v80_v16  ;;  %v76_v26 = vld [vmem:[%s771_s0 + $0x30] sm:$0xff] }
  0x52   :  { %378 = vmatprep.subr.bf16.mxu0 %v430_v2  ;;  %408 = vmatprep.subr.bf16.mxu1 %v430_v2  ;;  %v83_v21 = vld [vmem:[%s771_s0 + $0x68] sm:$0xff]  ;;  %v88_v24 = vpack.c.bf16 %v75_v19, %v74_v18  ;;  %v77_v27 = vld [vmem:[%s771_s0 + $0x38] sm:$0xff]  ;;  %v84_v28 = vld [vmem:[%s771_s0 + $0x70] sm:$0xff] }
  0x53   :  { %398 = vmatprep.mubr.bf16.mxu1 %v90_v9  ;;  %v92_v25 = vpack.c.bf16 %v83_v21, %v82_v20  ;;  %v85_v29 = vld [vmem:[%s771_s0 + $0x78] sm:$0xff]  ;;  %v89_v30 = vpack.c.bf16 %v77_v27, %v76_v26  ;;  %v669_v32 = vld [vmem:[#allocation4] ss:$0 sm:$0xff]  ;;  %v671_v34 = vld [vmem:[#allocation6] ss:$0 sm:$0xff] }
  0x54   :  { %v93_v31 = vpack.c.bf16 %v85_v29, %v84_v28  ;;  %v675_v40 = vld [vmem:[#allocation7] ss:$0 sm:$0xff] }
  0x55   :  { %379 = vmatpush3.bf16.msra.mxu0 %v430_v2  ;;  %416 = vmatpush3.bf16.msra.mxu1 %v430_v2 }
  0x56   :  { %380 = vmatprep.subr.bf16.mxu0 %v431_v3  ;;  %409 = vmatprep.subr.bf16.mxu1 %v431_v3 }
  0x59   :  { %381 = vmatpush3.bf16.msra.mxu0 %v431_v3  ;;  %417 = vmatpush3.bf16.msra.mxu1 %v431_v3 }
  0x5a   :  { %382 = vmatprep.subr.bf16.mxu0 %v432_v10  ;;  %410 = vmatprep.subr.bf16.mxu1 %v432_v10 }
  0x5d   :  { %383 = vmatpush3.bf16.msra.mxu0 %v432_v10  ;;  %418 = vmatpush3.bf16.msra.mxu1 %v432_v10 }
  0x5e   :  { %384 = vmatprep.subr.bf16.mxu0 %v433_v11  ;;  %411 = vmatprep.subr.bf16.mxu1 %v433_v11 }
  0x61   :  { %385 = vmatpush3.bf16.msra.mxu0 %v433_v11  ;;  %419 = vmatpush3.bf16.msra.mxu1 %v433_v11 }
  0x62   :  { %386 = vmatprep.subr.bf16.mxu0 %v434_v12  ;;  %412 = vmatprep.subr.bf16.mxu1 %v434_v12 }
  0x65   :  { %387 = vmatpush3.bf16.msra.mxu0 %v434_v12  ;;  %420 = vmatpush3.bf16.msra.mxu1 %v434_v12 }
  0x66   :  { %388 = vmatprep.subr.bf16.mxu0 %v435_v13  ;;  %413 = vmatprep.subr.bf16.mxu1 %v435_v13 }
  0x69   :  { %389 = vmatpush3.bf16.msra.mxu0 %v435_v13  ;;  %421 = vmatpush3.bf16.msra.mxu1 %v435_v13 }
  0x6c   :  { %391 = vmatmul.mubr.bf16.vlgmr.msra.gmra.mrb[0].mxu0 %v87_v22  ;;  %399 = vmatmul.mubr.bf16.vlgmr.msra.gmra.mrb[0].mxu1 %v91_v23 }
  0x6d   :  { %394 = vmatprep.mubr.bf16.mxu0 %v88_v24  ;;  %402 = vmatprep.mubr.bf16.mxu1 %v92_v25 }
  0x74   :  { %395 = vmatmul.mubr.bf16.gmra.mrb[4].mxu0 %v89_v30  ;;  %403 = vmatmul.mubr.bf16.gmra.mrb[4].mxu1 %v93_v31 }
 0x13f   :  { %v392_v33 = vpop.f32.mrb[0].mxu0  ;;  %v400_v35 = vpop.f32.mrb[0].mxu1 }
 0x140   :  { %v208_v36 = vadd.f32 %v392_v33, %v669_v32  ;;  %v240_v37 = vadd.f32 %v400_v35, %v669_v32  ;;  %v199_v38 = vpop.f32.mrb[1].mxu0  ;;  %v231_v39 = vpop.f32.mrb[1].mxu1 }
 0x141   :  { %v200_v41 = vadd.f32 %v669_v32, %v199_v38  ;;  %v232_v42 = vadd.f32 %v669_v32, %v231_v39  ;;  %v393_v43 = vpop.f32.mrb[2].mxu0  ;;  %v401_v44 = vpop.f32.mrb[2].mxu1 }
 0x142   :  { %v271_v45 = vmul.f32 %v671_v34, %v208_v36  ;;  %v279_v46 = vmul.f32 %v671_v34, %v240_v37  ;;  %v211_v47 = vadd.f32 %v393_v43, %v669_v32  ;;  %v243_v48 = vadd.f32 %v401_v44, %v669_v32  ;;  %v202_v49 = vpop.f32.mrb[3].mxu0  ;;  %v234_v50 = vpop.f32.mrb[3].mxu1 }
 0x143   :  { %v269_v51 = vmul.f32 %v671_v34, %v200_v41  ;;  %v277_v52 = vmul.f32 %v671_v34, %v232_v42  ;;  %v203_v53 = vadd.f32 %v669_v32, %v202_v49  ;;  %v235_v54 = vadd.f32 %v669_v32, %v234_v50 }
 0x144   :  { %v294_v55 = vadd.f32 %v675_v40, %v271_v45  ;;  %v302_v56 = vadd.f32 %v675_v40, %v279_v46  ;;  %v272_v57 = vmul.f32 %v671_v34, %v211_v47  ;;  %v280_v58 = vmul.f32 %v671_v34, %v243_v48 }
 0x145   :  { %v292_v59 = vadd.f32 %v675_v40, %v269_v51  ;;  %v300_v60 = vadd.f32 %v675_v40, %v277_v52  ;;  %v270_v61 = vmul.f32 %v671_v34, %v203_v53  ;;  %v278_v62 = vmul.f32 %v671_v34, %v235_v54 }
 0x146   :  { %v310_v63 = vmax.f32 %v294_v55, 0.0  ;;  %v318_v0 = vmax.f32 %v302_v56, 0.0  ;;  %v295_v1 = vadd.f32 %v675_v40, %v272_v57  ;;  %v303_v2 = vadd.f32 %v675_v40, %v280_v58 }
 0x147   :  { %v308_v3 = vmax.f32 %v292_v59, 0.0  ;;  %v316_v4 = vmax.f32 %v300_v60, 0.0  ;;  %v293_v5 = vadd.f32 %v675_v40, %v270_v61  ;;  %v301_v6 = vadd.f32 %v675_v40, %v278_v62  ;;  %v396_v7 = vpop.f32.mrb[4].mxu0  ;;  %v404_v8 = vpop.f32.mrb[4].mxu1 }
 0x148   :  { %326 = vst [vmem:[%s776_s5 + $0x10] sm:$0xff] %v310_v63  ;;  %334 = vst [vmem:[%s776_s5 + $0x50] sm:$0xff] %v318_v0  ;;  %v311_v9 = vmax.f32 %v295_v1, 0.0  ;;  %v319_v10 = vmax.f32 %v303_v2, 0.0  ;;  %v224_v11 = vadd.f32 %v396_v7, %v669_v32  ;;  %v256_v12 = vadd.f32 %v404_v8, %v669_v32  ;;  %v215_v13 = vpop.f32.mrb[5].mxu0  ;;  %v247_v14 = vpop.f32.mrb[5].mxu1 }
 0x149   :  { %324 = vst [vmem:[%s776_s5] sm:$0xff] %v308_v3  ;;  %332 = vst [vmem:[%s776_s5 + $0x40] sm:$0xff] %v316_v4  ;;  %v309_v15 = vmax.f32 %v293_v5, 0.0  ;;  %v317_v16 = vmax.f32 %v301_v6, 0.0  ;;  %v216_v17 = vadd.f32 %v669_v32, %v215_v13  ;;  %v248_v18 = vadd.f32 %v669_v32, %v247_v14  ;;  %v397_v19 = vpop.f32.mrb[6].mxu0  ;;  %v405_v20 = vpop.f32.mrb[6].mxu1 }
 0x14a   :  { %327 = vst [vmem:[%s776_s5 + $0x18] sm:$0xff] %v311_v9  ;;  %335 = vst [vmem:[%s776_s5 + $0x58] sm:$0xff] %v319_v10  ;;  %v275_v21 = vmul.f32 %v671_v34, %v224_v11  ;;  %v283_v22 = vmul.f32 %v671_v34, %v256_v12  ;;  %v227_v23 = vadd.f32 %v397_v19, %v669_v32  ;;  %v218_v25 = vpop.f32.mrb[7].mxu0  ;;  %v250_v26 = vpop.f32.mrb[7].mxu1 }
 0x14b   :  { %v259_v24 = vadd.f32 %v405_v20, %v669_v32  ;;  %325 = vst [vmem:[%s776_s5 + $0x8] sm:$0xff] %v309_v15  ;;  %333 = vst [vmem:[%s776_s5 + $0x48] sm:$0xff] %v317_v16  ;;  %v273_v27 = vmul.f32 %v671_v34, %v216_v17  ;;  %v281_v28 = vmul.f32 %v671_v34, %v248_v18 }
 0x14c   :  { %v219_v29 = vadd.f32 %v669_v32, %v218_v25  ;;  %v251_v30 = vadd.f32 %v669_v32, %v250_v26  ;;  %v298_v31 = vadd.f32 %v675_v40, %v275_v21  ;;  %v306_v33 = vadd.f32 %v675_v40, %v283_v22 }
 0x14d   :  { %v276_v35 = vmul.f32 %v671_v34, %v227_v23  ;;  %v284_v36 = vmul.f32 %v671_v34, %v259_v24  ;;  %v296_v37 = vadd.f32 %v675_v40, %v273_v27  ;;  %v304_v38 = vadd.f32 %v675_v40, %v281_v28 }
 0x14e   :  { %v274_v39 = vmul.f32 %v671_v34, %v219_v29  ;;  %v282_v41 = vmul.f32 %v671_v34, %v251_v30  ;;  %v314_v42 = vmax.f32 %v298_v31, 0.0  ;;  %v322_v43 = vmax.f32 %v306_v33, 0.0 }
 0x14f   :  { %v299_v32 = vadd.f32 %v675_v40, %v276_v35  ;;  %v307_v44 = vadd.f32 %v675_v40, %v284_v36  ;;  %v312_v45 = vmax.f32 %v296_v37, 0.0  ;;  %v320_v46 = vmax.f32 %v304_v38, 0.0 }
 0x150   :  { %v297_v47 = vadd.f32 %v675_v40, %v274_v39  ;;  %v305_v48 = vadd.f32 %v675_v40, %v282_v41  ;;  %330 = vst [vmem:[%s776_s5 + $0x30] sm:$0xff] %v314_v42  ;;  %338 = vst [vmem:[%s776_s5 + $0x70] sm:$0xff] %v322_v43 }
 0x151   :  { %v315_v34 = vmax.f32 %v299_v32, 0.0  ;;  %v323_v49 = vmax.f32 %v307_v44, 0.0  ;;  %328 = vst [vmem:[%s776_s5 + $0x20] sm:$0xff] %v312_v45  ;;  %336 = vst [vmem:[%s776_s5 + $0x60] sm:$0xff] %v320_v46 }
 0x152   :  { %v313_v50 = vmax.f32 %v297_v47, 0.0  ;;  %v321_v40 = vmax.f32 %v305_v48, 0.0 }
 0x153   :  { %331 = vst [vmem:[%s776_s5 + $0x38] sm:$0xff] %v315_v34  ;;  %339 = vst [vmem:[%s776_s5 + $0x78] sm:$0xff] %v323_v49 }
 0x154   :  { %329 = vst [vmem:[%s776_s5 + $0x28] sm:$0xff] %v313_v50  ;;  %337 = vst [vmem:[%s776_s5 + $0x68] sm:$0xff] %v321_v40 }
 0x155   :  { %344 = vsyncpa [#allocation3], 1 }
 0x156   :  { %345 = vsyncpa [#allocation5], 1 }
 0x157   :  { %346 = vsyncpa [#allocation8], 1 }

// kernel: convmixer_backbone_forward.4
= control target key start
LH: loop header
LB: loop body
LE: loop exit
PB: predicated region body
PF: predicated region fallthrough
CT: control target
= control target key end

     0   :  { %10 = vsyncpa [#allocation3], 0  ;;  %s1006_s0 = inlined_call_operand.vmem [shape: bf16[128,27], index: 0, kind: input, shape index: {}]   ;;  %s1007_s1 = inlined_call_operand.hbm [shape: bf16[27,128], index: 1, kind: input, shape index: {}]   ;;  %s1008_s2 = inlined_call_operand.hbm [shape: f32[1,128], index: 2, kind: input, shape index: {}]   ;;  %s1009_s3 = inlined_call_operand.hbm [shape: f32[1,128], index: 3, kind: input, shape index: {}]   ;;  %s1010_s4 = inlined_call_operand.hbm [shape: f32[1,128], index: 4, kind: input, shape index: {}]   ;;  %s1011_s5 = inlined_call_operand.vmem [shape: f32[128,128], index: 5, kind: output, shape index: {}]  }
   0x1   :  { %11 = vsyncpa [#allocation5], 0 }
   0x2   :  { %12 = vsyncpa [#allocation8], 0  ;;  %s688_s18 = smov [#allocation4]   ;;  %s689_s20 = smov [#allocation2]  }
   0x3   :  { %s33_s19 = sshll.u32 %s688_s18, 4  ;;  %s20_s21 = sshll.u32 %s689_s20, 4  ;;  %s34_s19 = int_to_ptr.vmem [resolvable:$true] %s33_s19  ;;  %s725_s21 = int_to_ptr.vmem [resolvable:$true] %s20_s21 }
   0x4   :  { %s594_s24 = scalar_lea.hbm %s1008_s2, 16 }
   0x5   :  { %p595_p0 = scmp.ne.s32.totalorder %s1008_s2, %s594_s24  ;;  %p598_p1 = scmp.lt.u32.totalorder %s594_s24, %s1008_s2 }
   0x7   :  { %p600_p2 = pnand %p598_p1, %p595_p0 }
   0x9   :  { %603 = shalt.err (!%p600_p2)
}
   0xa   :  { %s604_s29 = scalar_lea.vmem %s34_s19, 16  ;;  %s608_s30 = scalar_lea.vmem %s34_s19, 32 }
   0xb   :  { %p605_p3 = scmp.ne.s32.totalorder %s34_s19, %s604_s29  ;;  %p609_p4 = scmp.lt.s32.totalorder %s34_s19, %s34_s19 }
   0xc   :  { %p610_p5 = scmp.lt.s32.totalorder %s608_s30, %s604_s29 }
   0xe   :  { %p611_p6 = por %p610_p5, %p609_p4 }
  0x10   :  { %p612_p7 = pnand %p611_p6, %p605_p3 }
  0x12   :  { %615 = shalt.err (!%p612_p7)
}
  0x13   :  { %36 = dma.hbm_to_vmem [thread:$0]  %s1008_s2, 16, %s34_s19, [#allocation5]  }
  0x14   :  { %s616_s10 = scalar_lea.hbm %s1007_s1, 256 }
  0x15   :  { %p617_p8 = scmp.ne.s32.totalorder %s1007_s1, %s616_s10  ;;  %p620_p9 = scmp.lt.u32.totalorder %s616_s10, %s1007_s1 }
  0x17   :  { %p622_p10 = pnand %p620_p9, %p617_p8 }
  0x19   :  { %625 = shalt.err (!%p622_p10)
}
  0x1a   :  { %s626_s15 = scalar_lea.vmem %s725_s21, 256  ;;  %p631_p12 = scmp.lt.s32.totalorder %s725_s21, %s725_s21 }
  0x1b   :  { %p627_p11 = scmp.ne.s32.totalorder %s725_s21, %s626_s15  ;;  %p632_p13 = scmp.lt.s32.totalorder %s626_s15, %s626_s15 }
  0x1d   :  { %p633_p0 = por %p632_p13, %p631_p12 }
  0x1f   :  { %p634_p1 = pnand %p633_p0, %p627_p11 }
  0x21   :  { %637 = shalt.err (!%p634_p1)
}
  0x22   :  { %s690_s2 = smov 64   ;;  %s691_s16 = smov 4  }
  0x23   :  { %26 = dma.hbm_to_vmem [thread:$0]  %s1007_s1, 256, %s725_s21, [#allocation3], %s690_s2, %s690_s2, %s691_s16  }
  0x24   :  { %s692_s19 = smov [#allocation6]   ;;  %s693_s22 = smov [#allocation7]  }
  0x25   :  { %s43_s20 = sshll.u32 %s692_s19, 4  ;;  %s53_s23 = sshll.u32 %s693_s22, 4  ;;  %s44_s20 = int_to_ptr.vmem [resolvable:$true] %s43_s20  ;;  %s54_s23 = int_to_ptr.vmem [resolvable:$true] %s53_s23 }
  0x26   :  { %s638_s26 = scalar_lea.hbm %s1009_s3, 16 }
  0x27   :  { %p639_p2 = scmp.ne.s32.totalorder %s1009_s3, %s638_s26  ;;  %p642_p3 = scmp.lt.u32.totalorder %s638_s26, %s1009_s3 }
  0x29   :  { %p644_p4 = pnand %p642_p3, %p639_p2 }
  0x2b   :  { %647 = shalt.err (!%p644_p4)
}
  0x2c   :  { %s648_s1 = scalar_lea.vmem %s44_s20, 16  ;;  %s652_s21 = scalar_lea.vmem %s44_s20, 32 }
  0x2d   :  { %p649_p5 = scmp.ne.s32.totalorder %s44_s20, %s648_s1  ;;  %p653_p6 = scmp.lt.s32.totalorder %s44_s20, %s44_s20 }
  0x2e   :  { %p654_p7 = scmp.lt.s32.totalorder %s652_s21, %s648_s1 }
  0x30   :  { %p655_p8 = por %p654_p7, %p653_p6 }
  0x32   :  { %p656_p9 = pnand %p655_p8, %p649_p5 }
  0x34   :  { %659 = shalt.err (!%p656_p9)
}
  0x35   :  { %46 = dma.hbm_to_vmem [thread:$0]  %s1009_s3, 16, %s44_s20, [#allocation5]  }
  0x36   :  { %s660_s10 = scalar_lea.hbm %s1010_s4, 16 }
  0x37   :  { %p661_p10 = scmp.ne.s32.totalorder %s1010_s4, %s660_s10  ;;  %p664_p11 = scmp.lt.u32.totalorder %s660_s10, %s1010_s4 }
  0x39   :  { %p666_p12 = pnand %p664_p11, %p661_p10 }
  0x3b   :  { %669 = shalt.err (!%p666_p12)
}
  0x3c   :  { %s670_s15 = scalar_lea.vmem %s54_s23, 16  ;;  %s674_s2 = scalar_lea.vmem %s54_s23, 32 }
  0x3d   :  { %p671_p13 = scmp.ne.s32.totalorder %s54_s23, %s670_s15  ;;  %p675_p0 = scmp.lt.s32.totalorder %s54_s23, %s54_s23 }
  0x3e   :  { %p676_p1 = scmp.lt.s32.totalorder %s674_s2, %s670_s15 }
  0x40   :  { %p677_p2 = por %p676_p1, %p675_p0 }
  0x42   :  { %p678_p3 = pnand %p677_p2, %p671_p13 }
  0x44   :  { %681 = shalt.err (!%p678_p3)
}
  0x45   :  { %56 = dma.hbm_to_vmem [thread:$0]  %s1010_s4, 16, %s54_s23, [#allocation8]  }
  0x46   :  { %682 = dma.done.wait [#allocation3], 256  }
  0x47   :  { %683 = vsyncadd [#allocation3], 4294967040 }
  0x48   :  { %684 = dma.done.wait [#allocation5], 32  }
  0x49   :  { %685 = vsyncadd [#allocation5], 4294967264 }
  0x4a   :  { %686 = dma.done.wait [#allocation8], 16  }
  0x4b   :  { %687 = vsyncadd [#allocation8], 4294967280  ;;  %vm173_vm0 = vcmask 1044480   ;;  %vm174_vm1 = vcmask 1045504   ;;  %v694_v0 = vmov 65535   ;;  %vm148_vm2 = vcmask 220160  }
  0x4c   :  { %v175_v1 = vsel %vm173_vm0, 4294967295, %v694_v0  ;;  %v552_v2 = vld [vmem:[#allocation2] sm:$0xff]   ;;  %v553_v4 = vld [vmem:[#allocation2 + $0x8] sm:$0x3f]   ;;  %v558_v10 = vld [vmem:[%s1006_s0 + $0x10] sm:$0xff]  }
  0x4d   :  { %v176_v3 = vsel %vm174_vm1, %v175_v1, 0  ;;  %521 = vmatprep.subr.bf16.mxu0 %v552_v2  ;;  %541 = vmatprep.subr.bf16.mxu1 %v552_v2  ;;  %v554_v5 = vld [vmem:[%s1006_s0] sm:$0xff]   ;;  %v556_v8 = vld [vmem:[%s1006_s0 + $0x8] sm:$0xff]   ;;  %v559_v11 = vld [vmem:[%s1006_s0 + $0x30] sm:$0xff]  }
  0x4e   :  { %522 = vmatpush3.bf16.msra.mxu0 %v552_v2  ;;  %543 = vmatpush3.bf16.msra.mxu1 %v552_v2  ;;  %v178_v6 = vand.u32 %v553_v4, %v176_v3  ;;  %v555_v7 = vld [vmem:[%s1006_s0 + $0x20] sm:$0xff]   ;;  %v557_v9 = vld [vmem:[%s1006_s0 + $0x28] sm:$0xff]   ;;  %v560_v12 = vld [vmem:[%s1006_s0 + $0x18] sm:$0xff]  }
  0x4f   :  { %525 = vmatprep.mubr.msk.bf16.mxu0 %vm148_vm2, %v554_v5  ;;  %533 = vmatprep.mubr.msk.bf16.mxu1 %vm148_vm2, %v555_v7  ;;  %v561_v13 = vld [vmem:[%s1006_s0 + $0x38] sm:$0xff]   ;;  %v812_v14 = vld [vmem:[#allocation4] ss:$0 sm:$0xff] }
  0x50   :  { %523 = vmatprep.subr.bf16.mxu0 %v178_v6  ;;  %542 = vmatprep.subr.bf16.mxu1 %v178_v6 }
  0x52   :  { %524 = vmatpush3.bf16.msra.mxu0 %v178_v6  ;;  %544 = vmatpush3.bf16.msra.mxu1 %v178_v6 }
  0x55   :  { %526 = vmatmul.mubr.msk.bf16.vlgmr.msra.gmra.mrb[0].mxu0 %vm148_vm2, %v556_v8  ;;  %534 = vmatmul.mubr.msk.bf16.vlgmr.msra.gmra.mrb[0].mxu1 %vm148_vm2, %v557_v9 }
  0x56   :  { %529 = vmatprep.mubr.msk.bf16.mxu0 %vm148_vm2, %v558_v10  ;;  %537 = vmatprep.mubr.msk.bf16.mxu1 %vm148_vm2, %v559_v11 }
  0x5d   :  { %530 = vmatmul.mubr.msk.bf16.gmra.mrb[4].mxu0 %vm148_vm2, %v560_v12  ;;  %538 = vmatmul.mubr.msk.bf16.gmra.mrb[4].mxu1 %vm148_vm2, %v561_v13 }
 0x128   :  { %v527_v15 = vpop.f32.mrb[0].mxu0  ;;  %v535_v16 = vpop.f32.mrb[0].mxu1 }
 0x129   :  { %v223_v17 = vadd.f32 %v527_v15, %v812_v14  ;;  %v255_v18 = vadd.f32 %v535_v16, %v812_v14  ;;  %v214_v19 = vpop.f32.mrb[1].mxu0  ;;  %v246_v20 = vpop.f32.mrb[1].mxu1 }
 0x12a   :  { %v215_v21 = vadd.f32 %v812_v14, %v214_v19  ;;  %v247_v22 = vadd.f32 %v812_v14, %v246_v20  ;;  %v528_v23 = vpop.f32.mrb[2].mxu0  ;;  %v536_v24 = vpop.f32.mrb[2].mxu1 }
 0x12b   :  { %v295_v25 = vmul.f32 0.044715, %v223_v17  ;;  %v303_v26 = vmul.f32 0.044715, %v255_v18  ;;  %v819_v31 = vadd.f32 %v528_v23, %v812_v14  ;;  %v822_v32 = vadd.f32 %v536_v24, %v812_v14  ;;  %v217_v33 = vpop.f32.mrb[3].mxu0  ;;  %v249_v34 = vpop.f32.mrb[3].mxu1 }
 0x12c   :  { %v293_v27 = vmul.f32 0.044715, %v215_v21  ;;  %v301_v28 = vmul.f32 0.044715, %v247_v22  ;;  %v825_v37 = vadd.f32 %v812_v14, %v217_v33  ;;  %v828_v41 = vmul.f32 0.5, %v223_v17 }
 0x12d   :  { %v311_v29 = vmul.f32 %v295_v25, %v223_v17  ;;  %v319_v30 = vmul.f32 %v303_v26, %v255_v18  ;;  %v296_v40 = vmul.f32 0.044715, %v819_v31  ;;  %v304_v44 = vmul.f32 0.044715, %v822_v32 }
 0x12e   :  { %v309_v35 = vmul.f32 %v293_v27, %v215_v21  ;;  %v317_v36 = vmul.f32 %v301_v28, %v247_v22  ;;  %v250_v50 = vadd.f32 %v812_v14, %v249_v34  ;;  %v294_v56 = vmul.f32 0.044715, %v825_v37 }
 0x12f   :  { %v327_v38 = vmul.f32 %v311_v29, %v223_v17  ;;  %v335_v39 = vmul.f32 %v319_v30, %v255_v18  ;;  %v312_v49 = vmul.f32 %v296_v40, %v819_v31  ;;  %v320_v55 = vmul.f32 %v304_v44, %v822_v32 }
 0x130   :  { %v325_v42 = vmul.f32 %v309_v35, %v215_v21  ;;  %v333_v43 = vmul.f32 %v317_v36, %v247_v22  ;;  %v531_v45 = vpop.f32.mrb[4].mxu0  ;;  %v539_v46 = vpop.f32.mrb[4].mxu1  ;;  %v835_v60 = vmul.f32 0.5, %v255_v18  ;;  %v310_v3 = vmul.f32 %v294_v56, %v825_v37 }
 0x131   :  { %v343_v47 = vadd.f32 %v327_v38, %v223_v17  ;;  %v351_v48 = vadd.f32 %v335_v39, %v255_v18  ;;  %v230_v51 = vpop.f32.mrb[5].mxu0  ;;  %v262_v52 = vpop.f32.mrb[5].mxu1  ;;  %v328_v62 = vmul.f32 %v312_v49, %v819_v31  ;;  %v336_v2 = vmul.f32 %v320_v55, %v822_v32 }
 0x132   :  { %v341_v53 = vadd.f32 %v325_v42, %v215_v21  ;;  %v349_v54 = vadd.f32 %v333_v43, %v247_v22  ;;  %v532_v57 = vpop.f32.mrb[6].mxu0  ;;  %v540_v58 = vpop.f32.mrb[6].mxu1  ;;  %v302_v6 = vmul.f32 0.044715, %v250_v50  ;;  %v846_v7 = vadd.f32 %v531_v45, %v812_v14 }
 0x133   :  { %v359_v59 = vmul.f32 0.7978846, %v343_v47  ;;  %v367_v61 = vmul.f32 0.7978846, %v351_v48  ;;  %v838_v63 = vpop.f32.mrb[7].mxu0  ;;  %v842_v4 = vpop.f32.mrb[7].mxu1  ;;  %v344_v5 = vadd.f32 %v328_v62, %v819_v31  ;;  %v352_v8 = vadd.f32 %v336_v2, %v822_v32 }
 0x134   :  { %v357_v0 = vmul.f32 0.7978846, %v341_v53  ;;  %v365_v1 = vmul.f32 0.7978846, %v349_v54  ;;  %v326_v9 = vmul.f32 %v310_v3, %v825_v37  ;;  %v851_v10 = vadd.f32 %v539_v46, %v812_v14  ;;  %v891_v62 = vld [vmem:[#allocation7] ss:$0 sm:$0xff] }
 0x135   :  { %562 = vtanh.f32 %v359_v59  ;;  %v277_v11 = vmul.f32 0.5, %v215_v21  ;;  %v360_v12 = vmul.f32 0.7978846, %v344_v5  ;;  %v318_v13 = vmul.f32 %v302_v6, %v250_v50 }
 0x136   :  { %564 = vtanh.f32 %v367_v61  ;;  %v368_v15 = vmul.f32 0.7978846, %v352_v8  ;;  %v342_v16 = vadd.f32 %v326_v9, %v825_v37  ;;  %v299_v17 = vmul.f32 0.044715, %v846_v7 }
 0x137   :  { %566 = vtanh.f32 %v357_v0  ;;  %v285_v18 = vmul.f32 0.5, %v247_v22  ;;  %v334_v19 = vmul.f32 %v318_v13, %v250_v50  ;;  %v307_v20 = vmul.f32 0.044715, %v851_v10 }
 0x138   :  { %568 = vtanh.f32 %v365_v1  ;;  %v358_v23 = vmul.f32 0.7978846, %v342_v16  ;;  %v315_v24 = vmul.f32 %v299_v17, %v846_v7  ;;  %v858_v21 = vadd.f32 %v812_v14, %v230_v51  ;;  %v885_v51 = vld [vmem:[#allocation6] ss:$0 sm:$0xff] }
 0x139   :  { %570 = vtanh.f32 %v360_v12  ;;  %v350_v25 = vadd.f32 %v334_v19, %v250_v50  ;;  %v323_v26 = vmul.f32 %v307_v20, %v851_v10  ;;  %v862_v27 = vadd.f32 %v812_v14, %v262_v52 }
 0x13a   :  { %572 = vtanh.f32 %v368_v15  ;;  %v865_v28 = vadd.f32 %v532_v57, %v812_v14  ;;  %v280_v22 = vmul.f32 0.5, %v819_v31  ;;  %v331_v29 = vmul.f32 %v315_v24, %v846_v7 }
 0x13b   :  { %574 = vtanh.f32 %v358_v23  ;;  %v297_v30 = vmul.f32 0.044715, %v858_v21  ;;  %v288_v33 = vmul.f32 0.5, %v822_v32  ;;  %v366_v34 = vmul.f32 0.7978846, %v350_v25 }
 0x13c   :  { %v339_v35 = vmul.f32 %v323_v26, %v851_v10  ;;  %v305_v36 = vmul.f32 0.044715, %v862_v27  ;;  %v278_v38 = vmul.f32 0.5, %v825_v37  ;;  %v347_v39 = vadd.f32 %v331_v29, %v846_v7 }
 0x13d   :  { %v313_v40 = vmul.f32 %v297_v30, %v858_v21  ;;  %v300_v31 = vmul.f32 0.044715, %v865_v28  ;;  %v877_v43 = vmul.f32 0.5, %v250_v50  ;;  %576 = vtanh.f32 %v366_v34 }
 0x13e   :  { %v355_v44 = vadd.f32 %v339_v35, %v851_v10  ;;  %v321_v32 = vmul.f32 %v305_v36, %v862_v27  ;;  %v363_v47 = vmul.f32 0.7978846, %v347_v39  ;;  %v883_v37 = vadd.f32 %v540_v58, %v812_v14 }
 0x13f   :  { %v563_v42 = vpop.eup %562  ;;  %v329_v48 = vmul.f32 %v313_v40, %v858_v21  ;;  %v316_v54 = vmul.f32 %v300_v31, %v865_v28  ;;  %v920_v39 = vadd.f32 %v812_v14, %v838_v63 }
 0x140   :  { %v565_v45 = vpop.eup %564  ;;  %v391_v46 = vadd.f32 1.0, %v563_v42  ;;  %v371_v53 = vmul.f32 0.7978846, %v355_v44  ;;  %v337_v50 = vmul.f32 %v321_v32, %v862_v27  ;;  %578 = vtanh.f32 %v363_v47 }
 0x141   :  { %v567_v49 = vpop.eup %566  ;;  %v399_v52 = vadd.f32 1.0, %v565_v45  ;;  %v345_v59 = vadd.f32 %v329_v48, %v858_v21  ;;  %v332_v25 = vmul.f32 %v316_v54, %v865_v28  ;;  %v930_v42 = vadd.f32 %v812_v14, %v842_v4 }
 0x142   :  { %v569_v55 = vpop.eup %568  ;;  %v407_v56 = vmul.f32 %v391_v46, %v828_v41  ;;  %v389_v57 = vadd.f32 1.0, %v567_v49  ;;  %580 = vtanh.f32 %v371_v53  ;;  %v353_v1 = vadd.f32 %v337_v50, %v862_v27 }
 0x143   :  { %v571_v61 = vpop.eup %570  ;;  %v415_v58 = vmul.f32 %v399_v52, %v835_v60  ;;  %v397_v0 = vadd.f32 1.0, %v569_v55  ;;  %v361_v8 = vmul.f32 0.7978846, %v345_v59  ;;  %v348_v36 = vadd.f32 %v332_v25, %v865_v28 }
 0x144   :  { %v573_v2 = vpop.eup %572  ;;  %v430_v3 = vmul.f32 %v885_v51, %v407_v56  ;;  %v405_v5 = vmul.f32 %v389_v57, %v277_v11  ;;  %v392_v6 = vadd.f32 1.0, %v571_v61  ;;  %v369_v13 = vmul.f32 0.7978846, %v353_v1 }
 0x145   :  { %v438_v41 = vmul.f32 %v885_v51, %v415_v58  ;;  %v413_v9 = vmul.f32 %v397_v0, %v285_v18  ;;  %v400_v12 = vadd.f32 1.0, %v573_v2  ;;  %v575_v15 = vpop.eup %574  ;;  %582 = vtanh.f32 %v361_v8 }
 0x146   :  { %v453_v16 = vadd.f32 %v891_v62, %v430_v3  ;;  %v428_v60 = vmul.f32 %v885_v51, %v405_v5  ;;  %v408_v17 = vmul.f32 %v392_v6, %v280_v22  ;;  %v390_v11 = vadd.f32 1.0, %v575_v15 }
 0x147   :  { %v461_v19 = vadd.f32 %v891_v62, %v438_v41  ;;  %v436_v20 = vmul.f32 %v885_v51, %v413_v9  ;;  %v416_v23 = vmul.f32 %v400_v12, %v288_v33  ;;  %584 = vtanh.f32 %v369_v13  ;;  %v577_v26 = vpop.eup %576 }
 0x148   :  { %469 = vst [vmem:[%s1011_s5 + $0x10] sm:$0xff] %v453_v16  ;;  %v451_v18 = vadd.f32 %v891_v62, %v428_v60  ;;  %v431_v24 = vmul.f32 %v885_v51, %v408_v17  ;;  %v406_v30 = vmul.f32 %v390_v11, %v278_v38  ;;  %v308_v33 = vmul.f32 0.044715, %v883_v37 }
 0x149   :  { %477 = vst [vmem:[%s1011_s5 + $0x50] sm:$0xff] %v461_v19  ;;  %v459_v22 = vadd.f32 %v891_v62, %v436_v20  ;;  %v439_v29 = vmul.f32 %v885_v51, %v416_v23  ;;  %v398_v35 = vadd.f32 1.0, %v577_v26  ;;  %v283_v32 = vmul.f32 0.5, %v846_v7 }
 0x14a   :  { %467 = vst [vmem:[%s1011_s5] sm:$0xff] %v451_v18  ;;  %v454_v34 = vadd.f32 %v891_v62, %v431_v24  ;;  %v429_v40 = vmul.f32 %v885_v51, %v406_v30  ;;  %v324_v31 = vmul.f32 %v308_v33, %v883_v37  ;;  %v579_v44 = vpop.eup %578  ;;  %v364_v45 = vmul.f32 0.7978846, %v348_v36 }
 0x14b   :  { %475 = vst [vmem:[%s1011_s5 + $0x40] sm:$0xff] %v459_v22  ;;  %v462_v38 = vadd.f32 %v891_v62, %v439_v29  ;;  %v414_v63 = vmul.f32 %v398_v35, %v877_v43  ;;  %v298_v46 = vmul.f32 0.044715, %v920_v39  ;;  %v395_v4 = vadd.f32 1.0, %v579_v44 }
 0x14c   :  { %470 = vst [vmem:[%s1011_s5 + $0x18] sm:$0xff] %v454_v34  ;;  %v581_v47 = vpop.eup %580  ;;  %v452_v14 = vadd.f32 %v891_v62, %v429_v40  ;;  %v291_v48 = vmul.f32 0.5, %v851_v10  ;;  %v340_v49 = vmul.f32 %v324_v31, %v883_v37  ;;  %586 = vtanh.f32 %v364_v45 }
 0x14d   :  { %478 = vst [vmem:[%s1011_s5 + $0x58] sm:$0xff] %v462_v38  ;;  %v437_v52 = vmul.f32 %v885_v51, %v414_v63  ;;  %v403_v43 = vadd.f32 1.0, %v581_v47  ;;  %v314_v7 = vmul.f32 %v298_v46, %v920_v39  ;;  %v411_v53 = vmul.f32 %v395_v4, %v283_v32 }
 0x14e   :  { %468 = vst [vmem:[%s1011_s5 + $0x8] sm:$0xff] %v452_v14  ;;  %v356_v50 = vadd.f32 %v340_v49, %v883_v37  ;;  %v306_v54 = vmul.f32 0.044715, %v930_v42  ;;  %v281_v57 = vmul.f32 0.5, %v858_v21  ;;  %v289_v5 = vmul.f32 0.5, %v862_v27 }
 0x14f   :  { %v583_v55 = vpop.eup %582  ;;  %v460_v10 = vadd.f32 %v891_v62, %v437_v52  ;;  %v419_v56 = vmul.f32 %v403_v43, %v291_v48  ;;  %v330_v59 = vmul.f32 %v314_v7, %v920_v39  ;;  %v434_v61 = vmul.f32 %v885_v51, %v411_v53 }
 0x150   :  { %v393_v58 = vadd.f32 1.0, %v583_v55  ;;  %v372_v0 = vmul.f32 0.7978846, %v356_v50  ;;  %v322_v1 = vmul.f32 %v306_v54, %v930_v42  ;;  %v284_v11 = vmul.f32 0.5, %v865_v28 }
 0x151   :  { %v585_v2 = vpop.eup %584  ;;  %476 = vst [vmem:[%s1011_s5 + $0x48] sm:$0xff] %v460_v10  ;;  %v442_v3 = vmul.f32 %v885_v51, %v419_v56  ;;  %v346_v6 = vadd.f32 %v330_v59, %v920_v39  ;;  %v457_v21 = vadd.f32 %v891_v62, %v434_v61  ;;  %v292_v22 = vmul.f32 0.5, %v883_v37 }
 0x152   :  { %v409_v8 = vmul.f32 %v393_v58, %v281_v57  ;;  %v401_v41 = vadd.f32 1.0, %v585_v2  ;;  %588 = vtanh.f32 %v372_v0  ;;  %v338_v13 = vmul.f32 %v322_v1, %v930_v42 }
 0x153   :  { %v465_v9 = vadd.f32 %v891_v62, %v442_v3  ;;  %v362_v12 = vmul.f32 0.7978846, %v346_v6  ;;  %473 = vst [vmem:[%s1011_s5 + $0x30] sm:$0xff] %v457_v21  ;;  %v282_v28 = vmul.f32 0.5, %v920_v39  ;;  %v290_v44 = vmul.f32 0.5, %v930_v42 }
 0x154   :  { %v432_v15 = vmul.f32 %v885_v51, %v409_v8  ;;  %v417_v16 = vmul.f32 %v401_v41, %v289_v5  ;;  %v354_v27 = vadd.f32 %v338_v13, %v930_v42 }
 0x155   :  { %481 = vst [vmem:[%s1011_s5 + $0x70] sm:$0xff] %v465_v9  ;;  %590 = vtanh.f32 %v362_v12 }
 0x156   :  { %v455_v60 = vadd.f32 %v891_v62, %v432_v15  ;;  %v440_v17 = vmul.f32 %v885_v51, %v417_v16  ;;  %v587_v19 = vpop.eup %586  ;;  %v370_v20 = vmul.f32 0.7978846, %v354_v27 }
 0x157   :  { %v396_v18 = vadd.f32 1.0, %v587_v19 }
 0x158   :  { %471 = vst [vmem:[%s1011_s5 + $0x20] sm:$0xff] %v455_v60  ;;  %v463_v23 = vadd.f32 %v891_v62, %v440_v17  ;;  %592 = vtanh.f32 %v370_v20 }
 0x159   :  { %v412_v24 = vmul.f32 %v396_v18, %v284_v11 }
 0x15a   :  { %479 = vst [vmem:[%s1011_s5 + $0x60] sm:$0xff] %v463_v23 }
 0x15b   :  { %v435_v26 = vmul.f32 %v885_v51, %v412_v24 }
 0x15c   :  { %v589_v25 = vpop.eup %588 }
 0x15d   :  { %v404_v29 = vadd.f32 1.0, %v589_v25  ;;  %v458_v30 = vadd.f32 %v891_v62, %v435_v26 }
 0x15f   :  { %v591_v33 = vpop.eup %590  ;;  %v420_v34 = vmul.f32 %v404_v29, %v292_v22  ;;  %474 = vst [vmem:[%s1011_s5 + $0x38] sm:$0xff] %v458_v30 }
 0x160   :  { %v394_v35 = vadd.f32 1.0, %v591_v33 }
 0x161   :  { %v443_v36 = vmul.f32 %v885_v51, %v420_v34 }
 0x162   :  { %v410_v38 = vmul.f32 %v394_v35, %v282_v28  ;;  %v593_v40 = vpop.eup %592 }
 0x163   :  { %v466_v31 = vadd.f32 %v891_v62, %v443_v36  ;;  %v402_v63 = vadd.f32 1.0, %v593_v40 }
 0x164   :  { %v433_v37 = vmul.f32 %v885_v51, %v410_v38 }
 0x165   :  { %482 = vst [vmem:[%s1011_s5 + $0x78] sm:$0xff] %v466_v31  ;;  %v418_v45 = vmul.f32 %v402_v63, %v290_v44 }
 0x166   :  { %v456_v32 = vadd.f32 %v891_v62, %v433_v37 }
 0x167   :  { %v441_v39 = vmul.f32 %v885_v51, %v418_v45 }
 0x168   :  { %472 = vst [vmem:[%s1011_s5 + $0x28] sm:$0xff] %v456_v32 }
 0x169   :  { %v464_v46 = vadd.f32 %v891_v62, %v441_v39 }
 0x16b   :  { %480 = vst [vmem:[%s1011_s5 + $0x68] sm:$0xff] %v464_v46 }
 0x16c   :  { %487 = vsyncpa [#allocation3], 1 }
 0x16d   :  { %488 = vsyncpa [#allocation5], 1 }
 0x16e   :  { %489 = vsyncpa [#allocation8], 1 }

// kernel: convmixer_backbone_forward.5
= control target key start
LH: loop header
LB: loop body
LE: loop exit
PB: predicated region body
PF: predicated region fallthrough
CT: control target
= control target key end

     0   :  { %s2997_s0 = inlined_call_operand.vmem [shape: f32[2,8,8,128], index: 0, kind: input, shape index: {}]   ;;  %s2998_s1 = inlined_call_operand.vmem [shape: f32[2,3,3,128], index: 1, kind: input, shape index: {}]   ;;  %s2999_s2 = inlined_call_operand.hbm [shape: f32[2,1,128], index: 2, kind: input, shape index: {}]   ;;  %s3000_s3 = inlined_call_operand.hbm [shape: f32[2,1,128], index: 3, kind: input, shape index: {}]   ;;  %s3001_s4 = inlined_call_operand.hbm [shape: f32[2,1,128], index: 4, kind: input, shape index: {}]   ;;  %s3002_s5 = inlined_call_operand.hbm [shape: bf16[2,128,128], index: 5, kind: input, shape index: {}]   ;;  %s3003_s6 = inlined_call_operand.hbm [shape: f32[2,1,128], index: 6, kind: input, shape index: {}]   ;;  %s3004_s7 = inlined_call_operand.vmem [shape: f32[2,8,8,128], index: 7, kind: output, shape index: {}]  }
   0x1   :  { %3013 = sst [smem:[#allocation19_spill]] %s3000_s3 }
   0x2   :  { %3014 = sst [smem:[#allocation20_spill]] %s3002_s5 }
   0x3   :  { %12 = vsyncpa [#allocation4], 0 }
   0x4   :  { %14 = vsyncpa [#allocation4 + $0x1], 0 }
   0x5   :  { %15 = vsyncpa [#allocation6], 0 }
   0x6   :  { %17 = vsyncpa [#allocation6 + $0x1], 0 }
   0x7   :  { %18 = vsyncpa [#allocation9], 0 }
   0x8   :  { %20 = vsyncpa [#allocation9 + $0x1], 0  ;;  %s2152_s24 = smov 0   ;;  %s2154_s25 = smov 0  }
   0x9   :  { %s2156_s26 = smov 0   ;;  %s2158_s27 = smov 0  }
   0xa   :  { %s2160_s28 = smov 0   ;;  %s2162_s29 = smov 0  }
   0xb   :  { %s2164_s30 = smov 0   ;;  %s2166_s8 = smov 0  }
   0xc LB: > { %3015 = sst [smem:[#allocation14_spill]] %s2094_s29  ;;  %s3005_s9 = sadd.s32 4294967295, %s2102_s8   ;;  %s2102_s8 = sphi %s2166_s8, %s26_s8   ;;  %s2098_s30 = sphi %s2164_s30, %s3038_s30   ;;  %s2094_s29 = sphi %s2162_s29, %s3037_s29   ;;  %s2090_s28 = sphi %s2160_s28, %s3043_s28   ;;  %s2086_s27 = sphi %s2158_s27, %s3042_s27   ;;  %s2082_s26 = sphi %s2156_s26, %s3041_s26   ;;  %s2078_s25 = sphi %s2154_s25, %s3040_s25   ;;  %s2074_s24 = sphi %s2152_s24, %s3039_s24  }
   0xd   : > { %3016 = sst [smem:[#allocation15_spill]] %s2098_s30  ;;  %s35_s10 = sadd.s32 1, %s2094_s29 }
   0xe   : > { %p36_p0 = scmp.ge.s32.totalorder %s35_s10, 2  ;;  %s38_s11 = sadd.s32 1, %s2098_s30 }
   0xf   : > { %s97_s12 = sadd.s32 1, %s2082_s26  ;;  %p104_p1 = scmp.ne.s32.totalorder %s2082_s26, %s2078_s25 }
  0x10   : > { %s3045_s10 = smov (%p36_p0, %s35_s10), 0  ;;  %s3047_s11 = smov (!%p36_p0, %s38_s11), %s2098_s30 }
  0x11   : > { %3017 = sst [smem:[#allocation16_spill]] %s3045_s10  ;;  %s94_s13 = ssub.s32 %s2094_s29, %s3045_s10 }
  0x12   : > { %p105_p2 = scmp.eq.s32.totalorder %s2102_s8, 0  ;;  %p40_p3 = scmp.ge.s32.totalorder %s3047_s11, 2 }
  0x13   : > { %p95_p4 = scmp.eq.s32.totalorder %s94_s13, 0  ;;  %p110_p6 = scmp.ne.s32.totalorder %s2078_s25, %s2074_s24 }
  0x14   : > { %p106_p5 = por %p105_p2, %p104_p1  ;;  %s3049_s11 = smov (%p40_p3, %s3047_s11), 0 }
  0x15   : > { %3018 = sst [smem:[#allocation17_spill]] %s3049_s11  ;;  %p111_p7 = scmp.eq.s32.totalorder %s3005_s9, 0 }
  0x16   : > { %s2206_s14 = scalar_select %p95_p4, %s2082_s26, %s97_s12  }
  0x17   : > { %p1770_p8 = scmp.lt.s32.totalorder %s2102_s8, 4  ;;  %s2212_s15 = sand.u32 1, %s2082_s26  }
  0x18   : > { %3019 = sst [smem:[#allocation18_spill]] %s2206_s14  ;;  %p2214_p9 = por %p111_p7, %p110_p6 }
  0x19   : > { %s2219_s17 = sshll.u32 %s2094_s29, 4  ;;  %p2221_p10 = pnand %p1770_p8, %p106_p5 }
  0x1a   : > { %s3020_s16 = scalar_select %p2214_p9, 1, 0 }
  0x1b   : > { %s3021_s18 = scalar_select %p2221_p10, 1, 0 }
  0x1c   : > { %s3007_s19 = sand.u32 1, %s2102_s8   ;;  %s3022_s3 = sld [smem:[#allocation19_spill]] }
  0x1d   : > { %s300_s23 = scalar_lea.vmem [#allocation5], %s2212_s15  ;;  %s2238_s12 = scalar_lea.sflag [#allocation6], %s3007_s19 }
  0x1e   : > { %s307_s24 = sshll.u32 %s300_s23, 4  ;;  %p2244_p13 = pneg %p2221_p10  ;;  %s2233_s24 = int_to_ptr.vmem [resolvable:$true] %s307_s24 }
  0x22   : > { %s2230_s22 = scalar_lea.hbm %s3022_s3, %s2219_s17  ;;  %s1883_s23 = scalar_lea.hbm %s3022_s3, 32 }
  0x23   : > { %s1878_s13 = scalar_lea.hbm %s2230_s22, 16  ;;  %p1884_p2 = scmp.lt.u32.totalorder %s2230_s22, %s3022_s3 }
  0x24   : > { %p1879_p12 = scmp.ne.s32.totalorder %s2230_s22, %s1878_s13  ;;  %p1885_p3 = scmp.lt.u32.totalorder %s1883_s23, %s1878_s13 }
  0x25   : > { %p1887_p5 = scmp.lt.u32.totalorder %s1878_s13, %s2230_s22 }
  0x26   : > { %p1881_p0 = pnand %p2244_p13, %p1879_p12  ;;  %p1886_p4 = por %p1885_p3, %p1884_p2 }
  0x28   : > { %p1882_p1 = pneg %p1881_p0  ;;  %p1888_p6 = por %p1887_p5, %p1886_p4 }
  0x2a   : > { %p1889_p7 = pnand %p1888_p6, %p1882_p1 }
  0x2c   : > { %1892 = shalt.err (!%p1889_p7)
}
  0x2d   : > { %s1893_s19 = scalar_lea.vmem %s2233_s24, 16  ;;  %s2104_s20 = smov [#allocation5]  }
  0x2e   : > { %p1894_p8 = scmp.ne.s32.totalorder %s2233_s24, %s1893_s19  ;;  %s1898_s21 = sshll.u32 %s2104_s20, 4  ;;  %s1899_s21 = int_to_ptr.vmem [resolvable:$false] %s1898_s21 }
  0x2f   : > { %s1900_s10 = scalar_lea.vmem %s1899_s21, 32  ;;  %p1901_p11 = scmp.lt.s32.totalorder %s2233_s24, %s1899_s21 }
  0x30   : > { %p1896_p12 = pnand %p1894_p8, %p2244_p13  ;;  %p1902_p9 = scmp.lt.s32.totalorder %s1900_s10, %s1893_s19 }
  0x32   : > { %p1897_p0 = pneg %p1896_p12  ;;  %p1903_p2 = por %p1902_p9, %p1901_p11 }
  0x34   : > { %p1904_p3 = pnand %p1903_p2, %p1897_p0 }
  0x36   : > { %1907 = shalt.err (!%p1904_p3)
}
  0x37   : > { %1760 = dma.hbm_to_vmem [thread:$0]  (!%p2221_p10), %s2230_s22, 16, %s2233_s24, %s2238_s12  }
  0x38   : > { %p367_p1 = scmp.lt.s32.totalorder %s2102_s8, 5  ;;  %s1661_s11 = sshll.u32 %s2212_s15, 6 }
  0x39   : > { %s1688_s13 = sshll.u32 %s2094_s29, 10  ;;  %p3024_p4 = scmp.ge.s32.totalorder %s2102_s8, 1 }
  0x3a   : > { %s3026_s5 = sld [smem:[#allocation20_spill]]  ;;  %s335_s10 = scalar_lea.vmem [#allocation8], %s1661_s11 }
  0x3b   : > { %p2273_p5 = pnand %p3024_p4, %p367_p1  ;;  %s342_s3 = sshll.u32 %s335_s10, 4  ;;  %s2282_s3 = int_to_ptr.vmem [resolvable:$true] %s342_s3 }
  0x3c   : > { %s3027_s22 = sand.u32 1, %s2102_s8  }
  0x3d   : > { %s3025_s19 = scalar_select %p2273_p5, 1, 0 }
  0x3e   : > { %s2286_s24 = scalar_lea.sflag [#allocation9], %s3027_s22 }
  0x40   : > { %s2280_s21 = scalar_lea.hbm %s3026_s5, %s1688_s13  ;;  %s1913_s13 = scalar_lea.hbm %s3026_s5, 2048 }
  0x41   : > { %s1908_s30 = scalar_lea.hbm %s2280_s21, 1024  ;;  %p1914_p7 = scmp.lt.u32.totalorder %s2280_s21, %s3026_s5 }
  0x42   : > { %p1909_p9 = scmp.ne.s32.totalorder %s2280_s21, %s1908_s30  ;;  %p1915_p8 = scmp.lt.u32.totalorder %s1913_s13, %s1908_s30 }
  0x43   : > { %p1917_p0 = scmp.lt.u32.totalorder %s1908_s30, %s2280_s21 }
  0x44   : > { %p1911_p11 = pnand %p1909_p9, %p2244_p13  ;;  %p1916_p12 = por %p1915_p8, %p1914_p7 }
  0x46   : > { %p1912_p6 = pneg %p1911_p11  ;;  %p1918_p2 = por %p1917_p0, %p1916_p12 }
  0x48   : > { %p1919_p3 = pnand %p1918_p2, %p1912_p6 }
  0x4a   : > { %1922 = shalt.err (!%p1919_p3)
}
  0x4b   : > { %s1923_s11 = scalar_lea.vmem %s2282_s3, 1024  ;;  %s2105_s29 = smov [#allocation8]  }
  0x4c   : > { %p1924_p1 = scmp.ne.s32.totalorder %s2282_s3, %s1923_s11  ;;  %s1928_s10 = sshll.u32 %s2105_s29, 4  ;;  %s1929_s10 = int_to_ptr.vmem [resolvable:$false] %s1928_s10 }
  0x4d   : > { %s1930_s14 = scalar_lea.vmem %s1929_s10, 2048  ;;  %p1931_p11 = scmp.lt.s32.totalorder %s2282_s3, %s1929_s10 }
  0x4e   : > { %p1926_p4 = pnand %p1924_p1, %p2244_p13  ;;  %p1932_p5 = scmp.lt.s32.totalorder %s1930_s14, %s1923_s11 }
  0x50   : > { %p1927_p9 = pneg %p1926_p4  ;;  %p1933_p7 = por %p1932_p5, %p1931_p11 }
  0x52   : > { %p1934_p8 = pnand %p1933_p7, %p1927_p9 }
  0x54   : > { %1937 = shalt.err (!%p1934_p8)
}
  0x55   : > { %s2106_s30 = smov 64   ;;  %s2107_s22 = smov 4  }
  0x56   : > { %1766 = dma.hbm_to_vmem [thread:$0]  (!%p2221_p10), %s2280_s21, 1024, %s2282_s3, %s2286_s24, %s2106_s30, %s2106_s30, %s2107_s22  }
  0x57   : > { %s2314_s20 = scalar_lea.hbm %s2999_s2, %s2219_s17  ;;  %s283_s11 = scalar_lea.vmem [#allocation3], %s2212_s15 }
  0x58   : > { %s290_s29 = sshll.u32 %s283_s11, 4  ;;  %s281_s10 = scalar_lea.sflag [#allocation4], %s2212_s15  ;;  %s291_s29 = int_to_ptr.vmem [resolvable:$true] %s290_s29 }
  0x59   : > { %s1938_s14 = scalar_lea.hbm %s2314_s20, 16  ;;  %s1943_s21 = scalar_lea.hbm %s2999_s2, 32 }
  0x5a   : > { %p1939_p5 = scmp.ne.s32.totalorder %s2314_s20, %s1938_s14  ;;  %p1944_p0 = scmp.lt.u32.totalorder %s2314_s20, %s2999_s2 }
  0x5b   : > { %p1945_p2 = scmp.lt.u32.totalorder %s1943_s21, %s1938_s14  ;;  %p1947_p1 = scmp.lt.u32.totalorder %s1938_s14, %s2314_s20 }
  0x5c   : > { %p1941_p6 = pnand %p1939_p5, %p2244_p13 }
  0x5d   : > { %p1946_p3 = por %p1945_p2, %p1944_p0 }
  0x5e   : > { %p1942_p12 = pneg %p1941_p6 }
  0x5f   : > { %p1948_p4 = por %p1947_p1, %p1946_p3 }
  0x61   : > { %p1949_p9 = pnand %p1948_p4, %p1942_p12 }
  0x63   : > { %1952 = shalt.err (!%p1949_p9)
}
  0x64   : > { %s1953_s23 = scalar_lea.vmem %s291_s29, 16  ;;  %s2108_s13 = smov [#allocation3]  }
  0x65   : > { %p1954_p11 = scmp.ne.s32.totalorder %s291_s29, %s1953_s23  ;;  %s1958_s11 = sshll.u32 %s2108_s13, 4  ;;  %s1959_s11 = int_to_ptr.vmem [resolvable:$false] %s1958_s11 }
  0x66   : > { %s1960_s5 = scalar_lea.vmem %s1959_s11, 32  ;;  %p1961_p5 = scmp.lt.s32.totalorder %s291_s29, %s1959_s11 }
  0x67   : > { %p1956_p7 = pnand %p1954_p11, %p2244_p13  ;;  %p1962_p6 = scmp.lt.s32.totalorder %s1960_s5, %s1953_s23 }
  0x69   : > { %p1957_p8 = pneg %p1956_p7  ;;  %p1963_p10 = por %p1962_p6, %p1961_p5 }
  0x6b   : > { %p1964_p0 = pnand %p1963_p10, %p1957_p8 }
  0x6d   : > { %1967 = shalt.err (!%p1964_p0)
}
  0x6e   : > { %p3028_p2 = scmp.ne.s32.totalorder %s3021_s18, 0  ;;  %s2339_s21 = scalar_lea.hbm %s3001_s4, %s2219_s17 }
  0x6f   : > { %s317_s30 = scalar_lea.vmem [#allocation7], %s2212_s15  ;;  %s1968_s23 = scalar_lea.hbm %s2339_s21, 16 }
  0x70   : > { %1757 = dma.hbm_to_vmem [thread:$0]  (!%p3028_p2), %s2314_s20, 16, %s291_s29, %s281_s10  }
  0x71   : > { %s324_s22 = sshll.u32 %s317_s30, 4  ;;  %p1969_p10 = scmp.ne.s32.totalorder %s2339_s21, %s1968_s23  ;;  %s325_s22 = int_to_ptr.vmem [resolvable:$true] %s324_s22 }
  0x72   : > { %s1973_s20 = scalar_lea.hbm %s3001_s4, 32  ;;  %p1974_p1 = scmp.lt.u32.totalorder %s2339_s21, %s3001_s4 }
  0x73   : > { %p1971_p12 = pnand %p1969_p10, %p2244_p13  ;;  %p1975_p4 = scmp.lt.u32.totalorder %s1973_s20, %s1968_s23 }
  0x74   : > { %p1977_p11 = scmp.lt.u32.totalorder %s1968_s23, %s2339_s21 }
  0x75   : > { %p1972_p3 = pneg %p1971_p12  ;;  %p1976_p9 = por %p1975_p4, %p1974_p1 }
  0x77   : > { %p1978_p7 = por %p1977_p11, %p1976_p9 }
  0x79   : > { %p1979_p8 = pnand %p1978_p7, %p1972_p3 }
  0x7b   : > { %1982 = shalt.err (!%p1979_p8)
}
  0x7c   : > { %s1983_s5 = scalar_lea.vmem %s325_s22, 16  ;;  %s2109_s14 = smov [#allocation7]  }
  0x7d   : > { %p1984_p5 = scmp.ne.s32.totalorder %s325_s22, %s1983_s5  ;;  %s1988_s3 = sshll.u32 %s2109_s14, 4  ;;  %s1989_s3 = int_to_ptr.vmem [resolvable:$false] %s1988_s3 }
  0x7e   : > { %s1990_s30 = scalar_lea.vmem %s1989_s3, 32  ;;  %p1991_p10 = scmp.lt.s32.totalorder %s325_s22, %s1989_s3 }
  0x7f   : > { %p1986_p6 = pnand %p1984_p5, %p2244_p13  ;;  %p1992_p12 = scmp.lt.s32.totalorder %s1990_s30, %s1983_s5 }
  0x81   : > { %p1987_p0 = pneg %p1986_p6  ;;  %p1993_p2 = por %p1992_p12, %p1991_p10 }
  0x83   : > { %p1994_p1 = pnand %p1993_p2, %p1987_p0 }
  0x85   : > { %1997 = shalt.err (!%p1994_p1)
}
  0x86   : > { %p3029_p4 = scmp.ne.s32.totalorder %s3021_s18, 0  ;;  %s2364_s11 = scalar_lea.hbm %s3003_s6, %s2219_s17 }
  0x87   : > { %s355_s20 = scalar_lea.vmem [#allocation10], %s2212_s15  ;;  %s1998_s10 = scalar_lea.hbm %s2364_s11, 16 }
  0x88   : > { %1763 = dma.hbm_to_vmem [thread:$0]  (!%p3029_p4), %s2339_s21, 16, %s325_s22, %s2238_s12  }
  0x89   : > { %s362_s29 = sshll.u32 %s355_s20, 4  ;;  %p1999_p2 = scmp.ne.s32.totalorder %s2364_s11, %s1998_s10  ;;  %s363_s29 = int_to_ptr.vmem [resolvable:$true] %s362_s29 }
  0x8a   : > { %s2003_s12 = scalar_lea.hbm %s3003_s6, 32  ;;  %p2004_p11 = scmp.lt.u32.totalorder %s2364_s11, %s3003_s6 }
  0x8b   : > { %p2001_p3 = pnand %p1999_p2, %p2244_p13  ;;  %p2005_p7 = scmp.lt.u32.totalorder %s2003_s12, %s1998_s10 }
  0x8c   : > { %p2007_p5 = scmp.lt.u32.totalorder %s1998_s10, %s2364_s11 }
  0x8d   : > { %p2002_p9 = pneg %p2001_p3  ;;  %p2006_p8 = por %p2005_p7, %p2004_p11 }
  0x8f   : > { %p2008_p6 = por %p2007_p5, %p2006_p8 }
  0x91   : > { %p2009_p0 = pnand %p2008_p6, %p2002_p9 }
  0x93   : > { %2012 = shalt.err (!%p2009_p0)
}
  0x94   : > { %s2013_s15 = scalar_lea.vmem %s363_s29, 16  ;;  %s2110_s17 = smov [#allocation10]  }
  0x95   : > { %p2014_p10 = scmp.ne.s32.totalorder %s363_s29, %s2013_s15  ;;  %s2018_s3 = sshll.u32 %s2110_s17, 4  ;;  %s2019_s3 = int_to_ptr.vmem [resolvable:$false] %s2018_s3 }
  0x96   : > { %s2020_s30 = scalar_lea.vmem %s2019_s3, 32  ;;  %p2021_p2 = scmp.lt.s32.totalorder %s363_s29, %s2019_s3 }
  0x97   : > { %p2016_p12 = pnand %p2014_p10, %p2244_p13  ;;  %p2022_p3 = scmp.lt.s32.totalorder %s2020_s30, %s2013_s15 }
  0x99   : > { %p2017_p1 = pneg %p2016_p12  ;;  %p2023_p4 = por %p2022_p3, %p2021_p2 }
  0x9b   : > { %p2024_p7 = pnand %p2023_p4, %p2017_p1 }
  0x9d   : > { %2027 = shalt.err (!%p2024_p7)
}
  0x9e   : > { %p3030_p11 = scmp.ne.s32.totalorder %s3021_s18, 0  ;;  %p3031_p9 = scmp.ne.s32.totalorder %s3025_s19, 0 }
  0x9f   : > { %s2388_s9 = sand.u32 (!%p3031_p9), 1, %s2078_s25   ;;  %p3032_p13 = scmp.ne.s32.totalorder (!%p3031_p9), %s3020_s16, 0 }
  0xa0   : > { %1769 = dma.hbm_to_vmem [thread:$0]  (!%p3030_p11), %s2364_s11, 16, %s363_s29, %s2286_s24  }
  0xa1   : > { %371 = sbr.rel (%p3031_p9) target bundleno = 592 (0x250), region = 48  ;;  %s374_s23 = scalar_lea.sflag (!%p3031_p9), [#allocation4], %s2388_s9 }
  0xa2   : > { %s376_s13 = scalar_lea.vmem (!%p3031_p9), [#allocation3], %s2388_s9 }
  0xa8   : > { %2061 = dma.done.wait (%p3032_p13), %s374_s23, 16  }
  0xa9   : > { %2063 = vsyncadd (%p3032_p13), %s374_s23, 4294967280  ;;  %s3033_s18 = sadd.s32 4294967295, %s2102_s8   ;;  %s384_s11 = scalar_lea.vmem [#allocation5], %s2388_s9 }
  0xaa   : > { %s381_s24 = sand.u32 1, %s3033_s18  }
  0xab   : > { %s382_s19 = scalar_lea.sflag [#allocation6], %s381_s24 }
  0xac   : > { %2065 = dma.done.wait (%p3032_p13), %s382_s19, 32  }
  0xad   : > { %2067 = vsyncadd (%p3032_p13), %s382_s19, 4294967264  ;;  %s1666_s20 = sshll.u32 %s2388_s9, 6  ;;  %s392_s29 = scalar_lea.vmem [#allocation7], %s2388_s9 }
  0xae   : > { %s398_s10 = scalar_lea.sflag [#allocation9], %s381_s24  ;;  %s2405_s5 = scalar_lea.vmem [#allocation8], %s1666_s20 }
  0xaf   : > { %2069 = dma.done.wait (%p3032_p13), %s398_s10, 1040  }
  0xb0   : > { %2071 = vsyncadd (%p3032_p13), %s398_s10, 4294966256  ;;  %p466_p4 = scmp.lt.s32.totalorder %s2090_s28, 1  ;;  %p471_p8 = scmp.lt.s32.totalorder %s2086_s27, 1 }
  0xb1   : > { %s409_s19 = scalar_lea.vmem [#allocation10], %s2388_s9  ;;  %p1672_p5 = scmp.ne.s32.totalorder %s2086_s27, 0 }
  0xb2   : > { %s3051_s28 = smov (!%p466_p4, %s2090_s28), 1  ;;  %v2111_v3 = vmov (!%p1672_p5), 0.0  }
  0xb3   : > { %s472_s14 = scalar_select %p471_p8, %s2086_s27, 1 }
  0xb4   : > { %s1689_s12 = sshll.u32 %s3051_s28, 6  ;;  %485 = sbr.rel (%p1672_p5) target bundleno = 195 (0xc3), region = 72  ;;  %488 = vst [vmem:[#allocation2 + $0x10] sm:$0xff] (!%p1672_p5), %v2111_v3  ;;  %486 = vst [vmem:[#allocation2] sm:$0xff] (!%p1672_p5), %v2111_v3 }
  0xb5   : > { %s2418_s15 = scalar_lea.vmem %s2997_s0, %s1689_s12  ;;  %s1743_s17 = smul.u32 12, %s472_s14  ;;  %487 = vst [vmem:[#allocation2 + $0x8] sm:$0x3] (!%p1672_p5), %v2111_v3  ;;  %489 = vst [vmem:[#allocation2 + $0x18] sm:$0x3] (!%p1672_p5), %v2111_v3 }
  0xb6   : > { %s2423_s16 = scalar_lea.vmem %s3004_s7, %s1689_s12  ;;  %v506_v0 = vld [vmem:[%s2418_s15] sm:$0xff] (!%p1672_p5)  ;;  %v507_v1 = vld [vmem:[%s2418_s15 + $0x8] sm:$0xff] (!%p1672_p5)  ;;  %v508_v2 = vld [vmem:[%s2418_s15 + $0x10] sm:$0xff] (!%p1672_p5)  ;;  %490 = vst [vmem:[#allocation2 + $0x20] sm:$0xff] (!%p1672_p5), %v2111_v3 }
  0xb7   : > { %s2428_s24 = scalar_lea.vmem %s2998_s1, %s1743_s17  ;;  %491 = vst [vmem:[#allocation2 + $0x28] sm:$0x3] (!%p1672_p5), %v2111_v3  ;;  %492 = vst [vmem:[#allocation2 + $0x30] sm:$0xff] (!%p1672_p5), %v2111_v3  ;;  %v509_v4 = vld [vmem:[%s2418_s15 + $0x18] sm:$0xff] (!%p1672_p5)  ;;  %v510_v5 = vld [vmem:[%s2418_s15 + $0x20] sm:$0xff] (!%p1672_p5) }
  0xb8   : > { %493 = vst [vmem:[#allocation2 + $0x38] sm:$0x3] (!%p1672_p5), %v2111_v3  ;;  %494 = vst [vmem:[#allocation2 + $0x40] sm:$0xff] (!%p1672_p5), %v2111_v3  ;;  %v511_v6 = vld [vmem:[%s2418_s15 + $0x28] sm:$0xff] (!%p1672_p5)  ;;  %v512_v7 = vld [vmem:[%s2418_s15 + $0x30] sm:$0xff] (!%p1672_p5) }
  0xb9   : > { %495 = vst [vmem:[#allocation2 + $0x48] sm:$0x3] (!%p1672_p5), %v2111_v3  ;;  %496 = vst [vmem:[#allocation2 + $0x50] sm:$0xff] (!%p1672_p5), %v2111_v3  ;;  %v513_v8 = vld [vmem:[%s2418_s15 + $0x38] sm:$0xff] (!%p1672_p5) }
  0xba   : > { %497 = vst [vmem:[#allocation2 + $0x58] sm:$0x3] (!%p1672_p5), %v2111_v3  ;;  %498 = vst [vmem:[#allocation2 + $0x60] sm:$0xff] (!%p1672_p5), %v2111_v3 }
  0xbb   : > { %499 = vst [vmem:[#allocation2 + $0x68] sm:$0x3] %v2111_v3  ;;  %500 = vst [vmem:[#allocation2 + $0x70] sm:$0xff] %v2111_v3 }
  0xbc   : > { %501 = vst [vmem:[#allocation2 + $0x78] sm:$0x3] %v2111_v3  ;;  %502 = vst [vmem:[#allocation2 + $0x80] sm:$0xff] %v2111_v3 }
  0xbd   : > { %503 = vst [vmem:[#allocation2 + $0x88] sm:$0x3] %v2111_v3  ;;  %504 = vst [vmem:[#allocation2 + $0x90] sm:$0xff] %v2111_v3 }
  0xbe   : > { %505 = vst [vmem:[#allocation2 + $0x98] sm:$0x3] %v2111_v3  ;;  %515 = vst [vmem:[#allocation2 + $0x11] sm:$0xff] %v506_v0 }
  0xbf   : > { %516 = vst [vmem:[#allocation2 + $0x21] sm:$0xff] %v507_v1  ;;  %517 = vst [vmem:[#allocation2 + $0x31] sm:$0xff] %v508_v2 }
  0xc0   : > { %518 = vst [vmem:[#allocation2 + $0x41] sm:$0xff] %v509_v4  ;;  %519 = vst [vmem:[#allocation2 + $0x51] sm:$0xff] %v510_v5 }
  0xc1   : > { %520 = vst [vmem:[#allocation2 + $0x61] sm:$0xff] %v511_v6  ;;  %521 = vst [vmem:[#allocation2 + $0x71] sm:$0xff] %v512_v7 }
  0xc2   : > { %522 = vst [vmem:[#allocation2 + $0x81] sm:$0xff] %v513_v8 }
  0xc3 PF: > { %v1838_v9 = vld [vmem:[%s2405_s5] sm:$0xff]   ;;  %v548_v10 = vlaneseq  ;;  %v1839_v11 = vld [vmem:[%s2405_s5 + $0x8] sm:$0xff]   ;;  %v1840_v13 = vld [vmem:[%s2405_s5 + $0x10] sm:$0xff]   ;;  %vm596_vm0 = vcmask 1046528   ;;  %vm673_vm1 = vcmask 1045504   ;;  %p1685_p6 = scmp.ne.s32.totalorder %s2086_s27, 1 }
  0xc4   : > { %1703 = vmatprep.subr.bf16.mxu0 %v1838_v9  ;;  %1727 = vmatprep.subr.bf16.mxu1 %v1838_v9  ;;  %v1841_v17 = vld [vmem:[%s2405_s5 + $0x18] sm:$0xff]   ;;  %v524_v19 = vld [vmem:[#allocation2 + $0x8] sm:$0x3]  ;;  %v1843_v43 = vld [vmem:[%s2405_s5 + $0x28] sm:$0xff]  }
  0xc5   : > { %1704 = vmatpush3.bf16.msra.mxu0 %v1838_v9  ;;  %1735 = vmatpush3.bf16.msra.mxu1 %v1838_v9  ;;  %v549_v12 = vshrl.u32 %v548_v10, 7  ;;  %v523_v18 = vld [vmem:[#allocation2] sm:$0xff]  ;;  %v2451_v21 = vld [vmem:[#allocation2 + $0x10] sm:$0xff]  ;;  %v2453_v22 = vld [vmem:[#allocation2 + $0x18] sm:$0x3] }
  0xc6   : > { %1705 = vmatprep.subr.bf16.mxu0 %v1839_v11  ;;  %1728 = vmatprep.subr.bf16.mxu1 %v1839_v11  ;;  %v543_v20 = vld [vmem:[%s2428_s24] sm:$0x7]  ;;  %v544_v23 = vld [vmem:[%s2428_s24 + $0x4] sm:$0x7]  ;;  %v2472_v30 = vld [vmem:[#allocation2 + $0x28] sm:$0x3] }
  0xc7   : > { %v2443_v14 = vsub.s32 0, %v549_v12  ;;  %v2445_v15 = vsub.s32 1, %v549_v12  ;;  %v2447_v16 = vsub.s32 2, %v549_v12  ;;  %v1842_v27 = vld [vmem:[%s2405_s5 + $0x20] sm:$0xff]   ;;  %v1844_v60 = vld [vmem:[%s2405_s5 + $0x30] sm:$0xff]  }
  0xc8   : > { %v2503_v56 = vld [vmem:[#allocation2 + $0x20] sm:$0xff]  ;;  %v545_v4 = vld [vmem:[%s2428_s24 + $0x8] sm:$0x7] }
  0xc9   : > { %1706 = vmatpush3.bf16.msra.mxu0 %v1839_v11  ;;  %1736 = vmatpush3.bf16.msra.mxu1 %v1839_v11  ;;  %v2457_v24 = vrot.slane %v543_v20, %v2443_v14  ;;  %v2460_v25 = vrot.slane %v543_v20, %v2445_v15  ;;  %v2463_v26 = vrot.slane %v543_v20, %v2447_v16 }
  0xca   : > { %1707 = vmatprep.subr.bf16.mxu0 %v1840_v13  ;;  %1729 = vmatprep.subr.bf16.mxu1 %v1840_v13  ;;  %v2467_v28 = vrot.slane %v544_v23, %v2443_v14  ;;  %v2470_v29 = vrot.slane %v544_v23, %v2445_v15  ;;  %v2478_v34 = vrot.slane %v544_v23, %v2447_v16 }
  0xcb   : > { %v552_v31 = vmul.f32 %v2457_v24, %v523_v18  ;;  %v564_v32 = vmul.f32 %v2460_v25, %v523_v18  ;;  %v565_v33 = vmul.f32 %v2460_v25, %v524_v19  ;;  %v553_v35 = vmul.f32 %v2457_v24, %v2451_v21 }
  0xcc   : > { %v566_v36 = vmul.f32 %v2460_v25, %v2451_v21  ;;  %v567_v37 = vmul.f32 %v2460_v25, %v2453_v22  ;;  %v641_v38 = vmul.f32 %v2463_v26, %v523_v18  ;;  %v642_v41 = vmul.f32 %v2463_v26, %v524_v19 }
  0xcd   : > { %1708 = vmatpush3.bf16.msra.mxu0 %v1840_v13  ;;  %1737 = vmatpush3.bf16.msra.mxu1 %v1840_v13  ;;  %v597_v39 = vrot.slane %v564_v32, 1  ;;  %v598_v40 = vrot.slane %v565_v33, 1  ;;  %v643_v42 = vmul.f32 %v2463_v26, %v2451_v21  ;;  %v2493_v44 = vmul.f32 %v2460_v25, %v2472_v30  ;;  %v1845_v13 = vld [vmem:[%s2405_s5 + $0x38] sm:$0xff]  }
  0xce   : > { %1709 = vmatprep.subr.bf16.mxu0 %v1841_v17  ;;  %1730 = vmatprep.subr.bf16.mxu1 %v1841_v17  ;;  %v600_v45 = vrot.slane %v566_v36, 1  ;;  %v601_v46 = vrot.slane %v567_v37, 1  ;;  %v644_v47 = vmul.f32 %v2463_v26, %v2453_v22  ;;  %v2500_v49 = vmul.f32 %v2463_v26, %v2472_v30 }
  0xcf   : > { %v599_v48 = vsel %vm596_vm0, %v597_v39, %v598_v40  ;;  %v674_v50 = vrot.slane %v641_v38, 2  ;;  %v675_v51 = vrot.slane %v642_v41, 2  ;;  %v677_v54 = vrot.slane %v643_v42, 2  ;;  %v2538_v38 = vld [vmem:[#allocation2 + $0x30] sm:$0xff] }
  0xd0   : > { %v602_v52 = vsel %vm596_vm0, %v600_v45, %v601_v46  ;;  %v629_v53 = vadd.f32 %v599_v48, %v552_v31  ;;  %v678_v55 = vrot.slane %v644_v47, 2  ;;  %v718_v59 = vmul.f32 %v2467_v28, %v2451_v21  ;;  %v2548_v46 = vld [vmem:[#allocation2 + $0x38] sm:$0x3] }
  0xd1   : > { %1710 = vmatpush3.bf16.msra.mxu0 %v1841_v17  ;;  %1738 = vmatpush3.bf16.msra.mxu1 %v1841_v17  ;;  %v630_v57 = vadd.f32 %v602_v52, %v553_v35  ;;  %v676_v58 = vsel %vm673_vm1, %v674_v50, %v675_v51  ;;  %v719_v63 = vmul.f32 %v2467_v28, %v2503_v56  ;;  %v1190_v45 = vrot.slane %v2453_v22, 1 }
  0xd2   : > { %1711 = vmatprep.subr.bf16.mxu0 %v1842_v27  ;;  %1731 = vmatprep.subr.bf16.mxu1 %v1842_v27  ;;  %v679_v61 = vsel %vm673_vm1, %v677_v54, %v678_v55  ;;  %v706_v62 = vadd.f32 %v676_v58, %v629_v53  ;;  %v738_v1 = vmul.f32 %v2470_v29, %v2451_v21  ;;  %v1192_v55 = vrot.slane %v2503_v56, 1 }
  0xd3   : > { %v707_v0 = vadd.f32 %v679_v61, %v630_v57  ;;  %v739_v2 = vmul.f32 %v2470_v29, %v2453_v22  ;;  %v740_v3 = vmul.f32 %v2470_v29, %v2503_v56  ;;  %v741_v6 = vmul.f32 %v2470_v29, %v2472_v30 }
  0xd4   : > { %v726_v5 = vadd.f32 %v718_v59, %v706_v62  ;;  %v814_v7 = vmul.f32 %v2478_v34, %v2451_v21  ;;  %v815_v8 = vmul.f32 %v2478_v34, %v2453_v22  ;;  %v770_v10 = vrot.slane %v738_v1, 1 }
  0xd5   : > { %1712 = vmatpush3.bf16.msra.mxu0 %v1842_v27  ;;  %1739 = vmatpush3.bf16.msra.mxu1 %v1842_v27  ;;  %v727_v9 = vadd.f32 %v719_v63, %v707_v0  ;;  %v771_v11 = vrot.slane %v739_v2, 1  ;;  %v773_v12 = vrot.slane %v740_v3, 1  ;;  %v774_v17 = vrot.slane %v741_v6, 1  ;;  %v2577_v6 = vld [vmem:[#allocation2 + $0x50] sm:$0xff] }
  0xd6   : > { %1713 = vmatprep.subr.bf16.mxu0 %v1843_v43  ;;  %1732 = vmatprep.subr.bf16.mxu1 %v1843_v43  ;;  %v816_v18 = vmul.f32 %v2478_v34, %v2503_v56  ;;  %v817_v19 = vmul.f32 %v2478_v34, %v2472_v30  ;;  %v846_v20 = vrot.slane %v814_v7, 2  ;;  %v847_v27 = vrot.slane %v815_v8, 2 }
  0xd7   : > { %v772_v23 = vsel %vm596_vm0, %v770_v10, %v771_v11  ;;  %v2532_v31 = vrot.slane %v545_v4, %v2443_v14  ;;  %v2535_v32 = vrot.slane %v545_v4, %v2445_v15  ;;  %v775_v33 = vsel %vm596_vm0, %v773_v12, %v774_v17  ;;  %v2580_v11 = vld [vmem:[#allocation2 + $0x58] sm:$0x3] }
  0xd8   : > { %v802_v35 = vadd.f32 %v772_v23, %v726_v5  ;;  %v849_v36 = vrot.slane %v816_v18, 2  ;;  %v850_v37 = vrot.slane %v817_v19, 2  ;;  %v803_v39 = vadd.f32 %v775_v33, %v727_v9  ;;  %v2575_v5 = vld [vmem:[#allocation2 + $0x48] sm:$0x3] }
  0xd9   : > { %1714 = vmatpush3.bf16.msra.mxu0 %v1843_v43  ;;  %1740 = vmatpush3.bf16.msra.mxu1 %v1843_v43  ;;  %v848_v40 = vsel %vm673_vm1, %v846_v20, %v847_v27  ;;  %v890_v41 = vmul.f32 %v2532_v31, %v2503_v56  ;;  %v1189_v14 = vrot.slane %v2451_v21, 1  ;;  %v891_v43 = vmul.f32 %v2532_v31, %v2538_v38  ;;  %v2587_v20 = vld [vmem:[%s376_s13] ss:$0 sm:$0xff] }
  0xda   : > { %1715 = vmatprep.subr.bf16.mxu0 %v1844_v60  ;;  %1733 = vmatprep.subr.bf16.mxu1 %v1844_v60  ;;  %v851_v15 = vsel %vm673_vm1, %v849_v36, %v850_v37  ;;  %v878_v42 = vadd.f32 %v848_v40, %v802_v35  ;;  %v910_v48 = vmul.f32 %v2535_v32, %v2503_v56  ;;  %v681_v1 = vrot.slane %v2500_v49, 2  ;;  %v2602_v40 = vld [vmem:[%s384_s11] ss:$0 sm:$0xff] }
  0xdb   : > { %v879_v47 = vadd.f32 %v851_v15, %v803_v39  ;;  %v911_v50 = vmul.f32 %v2535_v32, %v2472_v30  ;;  %v912_v51 = vmul.f32 %v2535_v32, %v2538_v38  ;;  %v913_v53 = vmul.f32 %v2535_v32, %v2548_v46 }
  0xdc   : > { %v898_v52 = vadd.f32 %v890_v41, %v878_v42  ;;  %v2559_v54 = vrot.slane %v545_v4, %v2447_v16  ;;  %v942_v58 = vrot.slane %v910_v48, 1  ;;  %v604_v16 = vrot.slane %v2493_v44, 1  ;;  %v2573_v4 = vld [vmem:[#allocation2 + $0x40] sm:$0xff] }
  0xdd   : > { %1716 = vmatpush3.bf16.msra.mxu0 %v1844_v60  ;;  %1741 = vmatpush3.bf16.msra.mxu1 %v1844_v60  ;;  %v899_v57 = vadd.f32 %v891_v43, %v879_v47  ;;  %v943_v59 = vrot.slane %v911_v50, 1  ;;  %v945_v60 = vrot.slane %v912_v51, 1  ;;  %v946_v61 = vrot.slane %v913_v53, 1 }
  0xde   : > { %1717 = vmatprep.subr.bf16.mxu0 %v1845_v13  ;;  %1734 = vmatprep.subr.bf16.mxu1 %v1845_v13  ;;  %v986_v62 = vmul.f32 %v2559_v54, %v2503_v56  ;;  %v987_v63 = vmul.f32 %v2559_v54, %v2472_v30  ;;  %v988_v0 = vmul.f32 %v2559_v54, %v2538_v38  ;;  %v1193_v48 = vrot.slane %v2472_v30, 1 }
  0xdf   : > { %v944_v2 = vsel %vm596_vm0, %v942_v58, %v943_v59  ;;  %v989_v3 = vmul.f32 %v2559_v54, %v2548_v46  ;;  %v947_v7 = vsel %vm596_vm0, %v945_v60, %v946_v61  ;;  %v556_v18 = vmul.f32 %v2457_v24, %v2573_v4 }
  0xe0   : > { %v974_v8 = vadd.f32 %v944_v2, %v898_v52  ;;  %v1018_v9 = vrot.slane %v986_v62, 2  ;;  %v1019_v10 = vrot.slane %v987_v63, 2  ;;  %v975_v12 = vadd.f32 %v947_v7, %v899_v57  ;;  %v2610_v52 = vld [vmem:[%s392_s29] ss:$0 sm:$0xff] }
  0xe1   : > { %1718 = vmatpush3.bf16.msra.mxu0 %v1845_v13  ;;  %1742 = vmatpush3.bf16.msra.mxu1 %v1845_v13  ;;  %v1021_v13 = vrot.slane %v988_v0, 2  ;;  %v1022_v17 = vrot.slane %v989_v3, 2  ;;  %v572_v23 = vmul.f32 %v2460_v25, %v2573_v4  ;;  %v573_v27 = vmul.f32 %v2460_v25, %v2575_v5 }
  0xe2   : > { %v1020_v19 = vsel %vm673_vm1, %v1018_v9, %v1019_v10  ;;  %v574_v33 = vmul.f32 %v2460_v25, %v2577_v6  ;;  %v557_v37 = vmul.f32 %v2457_v24, %v2577_v6  ;;  %v575_v39 = vmul.f32 %v2460_v25, %v2580_v11 }
  0xe3   : > { %v1023_v35 = vsel %vm673_vm1, %v1021_v13, %v1022_v17  ;;  %v1050_v36 = vadd.f32 %v1020_v19, %v974_v8  ;;  %v609_v15 = vrot.slane %v572_v23, 1  ;;  %v610_v42 = vrot.slane %v573_v27, 1  ;;  %v2627_v8 = vld [vmem:[#allocation2 + $0x60] sm:$0xff] }
  0xe4   : > { %v1051_v41 = vadd.f32 %v1023_v35, %v975_v12  ;;  %v612_v43 = vrot.slane %v574_v33, 1  ;;  %v613_v50 = vrot.slane %v575_v39, 1  ;;  %v649_v51 = vmul.f32 %v2463_v26, %v2573_v4 }
  0xe5   : > { %v1065_v47 = vadd.f32 %v2587_v20, %v1050_v36  ;;  %v611_v57 = vsel %vm596_vm0, %v609_v15, %v610_v42  ;;  %v650_v58 = vmul.f32 %v2463_v26, %v2575_v5  ;;  %v651_v59 = vmul.f32 %v2463_v26, %v2577_v6  ;;  %v2654_v15 = vld [vmem:[#allocation2 + $0x68] sm:$0x3] }
  0xe6   : > { %v1066_v53 = vadd.f32 %v2587_v20, %v1051_v41  ;;  %v614_v30 = vsel %vm596_vm0, %v612_v43, %v613_v50  ;;  %v652_v61 = vmul.f32 %v2463_v26, %v2580_v11  ;;  %v1201_v62 = vrot.slane %v2577_v6, 1 }
  0xe7   : > { %v1079_v60 = vmul.f32 %v2602_v40, %v1065_v47  ;;  %v633_v0 = vadd.f32 %v611_v57, %v556_v18  ;;  %v634_v2 = vadd.f32 %v614_v30, %v557_v37  ;;  %v686_v3 = vrot.slane %v649_v51, 2 }
  0xe8   : > { %v1080_v63 = vmul.f32 %v2602_v40, %v1066_v53  ;;  %v687_v9 = vrot.slane %v650_v58, 2  ;;  %v689_v10 = vrot.slane %v651_v59, 2  ;;  %v690_v12 = vrot.slane %v652_v61, 2 }
  0xe9   : > { %v2625_v7 = vadd.f32 %v2610_v52, %v1079_v60  ;;  %v722_v17 = vmul.f32 %v2467_v28, %v2577_v6  ;;  %v723_v19 = vmul.f32 %v2467_v28, %v2627_v8  ;;  %v1202_v18 = vrot.slane %v2580_v11, 1 }
  0xea   : > { %v2630_v13 = vadd.f32 %v2610_v52, %v1080_v63  ;;  %v2643_v27 = vsel %vm596_vm0, %v1189_v14, %v1190_v45  ;;  %v688_v33 = vsel %vm673_vm1, %v686_v3, %v687_v9  ;;  %v691_v35 = vsel %vm673_vm1, %v689_v10, %v690_v12 }
  0xeb   : > { %v1109_v23 = vmul.f32 0.044715, %v2625_v7  ;;  %v2651_v37 = vsel %vm596_vm0, %v1192_v55, %v1193_v48  ;;  %v710_v39 = vadd.f32 %v688_v33, %v633_v0  ;;  %v711_v41 = vadd.f32 %v691_v35, %v634_v2 }
  0xec   : > { %v1110_v36 = vmul.f32 0.044715, %v2630_v13  ;;  %v746_v21 = vmul.f32 %v2470_v29, %v2577_v6  ;;  %v747_v14 = vmul.f32 %v2470_v29, %v2580_v11  ;;  %v748_v45 = vmul.f32 %v2470_v29, %v2627_v8 }
  0xed   : > { %v1117_v22 = vmul.f32 %v1109_v23, %v2625_v7  ;;  %v730_v43 = vadd.f32 %v722_v17, %v710_v39  ;;  %v731_v55 = vadd.f32 %v723_v19, %v711_v41  ;;  %v749_v47 = vmul.f32 %v2470_v29, %v2654_v15  ;;  %v2679_v17 = vld [vmem:[#allocation2 + $0x70] sm:$0xff] }
  0xee   : > { %v1118_v42 = vmul.f32 %v1110_v36, %v2630_v13  ;;  %v782_v50 = vrot.slane %v746_v21, 1  ;;  %v783_v51 = vrot.slane %v747_v14, 1  ;;  %v785_v53 = vrot.slane %v748_v45, 1  ;;  %v2690_v45 = vld [vmem:[#allocation2 + $0x78] sm:$0x3] }
  0xef   : > { %v1125_v48 = vmul.f32 %v1117_v22, %v2625_v7  ;;  %v786_v58 = vrot.slane %v749_v47, 1  ;;  %v822_v59 = vmul.f32 %v2478_v34, %v2577_v6  ;;  %v823_v60 = vmul.f32 %v2478_v34, %v2580_v11 }
  0xf0   : > { %v1126_v57 = vmul.f32 %v1118_v42, %v2630_v13  ;;  %v784_v61 = vsel %vm596_vm0, %v782_v50, %v783_v51  ;;  %v824_v63 = vmul.f32 %v2478_v34, %v2627_v8  ;;  %v825_v0 = vmul.f32 %v2478_v34, %v2654_v15 }
  0xf1   : > { %v1133_v30 = vadd.f32 %v1125_v48, %v2625_v7  ;;  %v787_v3 = vsel %vm596_vm0, %v785_v53, %v786_v58  ;;  %v806_v9 = vadd.f32 %v784_v61, %v730_v43  ;;  %v858_v10 = vrot.slane %v822_v59, 2 }
  0xf2   : > { %v1134_v2 = vadd.f32 %v1126_v57, %v2630_v13  ;;  %v807_v19 = vadd.f32 %v787_v3, %v731_v55  ;;  %v859_v23 = vrot.slane %v823_v60, 2  ;;  %v861_v33 = vrot.slane %v824_v63, 2 }
  0xf3   : > { %v1141_v12 = vmul.f32 0.7978846, %v1133_v30  ;;  %v862_v36 = vrot.slane %v825_v0, 2  ;;  %v894_v39 = vmul.f32 %v2532_v31, %v2627_v8  ;;  %v895_v41 = vmul.f32 %v2532_v31, %v2679_v17 }
  0xf4   : > { %v1142_v35 = vmul.f32 0.7978846, %v1134_v2  ;;  %v860_v22 = vsel %vm673_vm1, %v858_v10, %v859_v23  ;;  %v918_v21 = vmul.f32 %v2535_v32, %v2627_v8  ;;  %v919_v14 = vmul.f32 %v2535_v32, %v2654_v15 }
  0xf5   : > { %1846 = vtanh.f32 %v1141_v12  ;;  %v863_v42 = vsel %vm673_vm1, %v861_v33, %v862_v36  ;;  %v882_v43 = vadd.f32 %v860_v22, %v806_v9  ;;  %v920_v55 = vmul.f32 %v2535_v32, %v2679_v17 }
  0xf6   : > { %1848 = vtanh.f32 %v1142_v35  ;;  %v883_v47 = vadd.f32 %v863_v42, %v807_v19  ;;  %v921_v48 = vmul.f32 %v2535_v32, %v2690_v45  ;;  %v954_v50 = vrot.slane %v918_v21, 1 }
  0xf7   : > { %v955_v51 = vrot.slane %v919_v14, 1  ;;  %v902_v53 = vadd.f32 %v894_v39, %v882_v43  ;;  %v957_v57 = vrot.slane %v920_v55, 1  ;;  %v994_v58 = vmul.f32 %v2559_v54, %v2627_v8 }
  0xf8   : > { %v995_v59 = vmul.f32 %v2559_v54, %v2654_v15  ;;  %v903_v60 = vadd.f32 %v895_v41, %v883_v47  ;;  %v958_v61 = vrot.slane %v921_v48, 1  ;;  %v996_v63 = vmul.f32 %v2559_v54, %v2679_v17 }
  0xf9   : > { %v956_v30 = vsel %vm596_vm0, %v954_v50, %v955_v51  ;;  %v997_v2 = vmul.f32 %v2559_v54, %v2690_v45  ;;  %v1030_v3 = vrot.slane %v994_v58, 2  ;;  %v2708_v10 = vmul.f32 %v2460_v25, %v2654_v15 }
  0xfa   : > { %v978_v0 = vadd.f32 %v956_v30, %v902_v53  ;;  %v1031_v9 = vrot.slane %v995_v59, 2  ;;  %v2712_v12 = vmul.f32 %v2463_v26, %v2654_v15  ;;  %v959_v19 = vsel %vm596_vm0, %v957_v57, %v958_v61 }
  0xfb   : > { %v1033_v23 = vrot.slane %v996_v63, 2  ;;  %v1101_v33 = vmul.f32 0.5, %v2625_v7  ;;  %v979_v35 = vadd.f32 %v959_v19, %v903_v60  ;;  %v1034_v39 = vrot.slane %v997_v2, 2 }
  0xfc   : > { %v1032_v36 = vsel %vm673_vm1, %v1030_v3, %v1031_v9  ;;  %v1102_v41 = vmul.f32 0.5, %v2630_v13  ;;  %v554_v21 = vmul.f32 %v2457_v24, %v2503_v56  ;;  %v568_v14 = vmul.f32 %v2460_v25, %v2503_v56 }
  0xfd   : > { %v1054_v22 = vadd.f32 %v1032_v36, %v978_v0  ;;  %v1035_v42 = vsel %vm673_vm1, %v1033_v23, %v1034_v39  ;;  %v555_v43 = vmul.f32 %v2457_v24, %v2538_v38  ;;  %v570_v7 = vmul.f32 %v2460_v25, %v2538_v38 }
  0xfe   : > { %v571_v55 = vmul.f32 %v2460_v25, %v2548_v46  ;;  %v1055_v13 = vadd.f32 %v1035_v42, %v979_v35  ;;  %v603_v50 = vrot.slane %v568_v14, 1  ;;  %v645_v51 = vmul.f32 %v2463_v26, %v2503_v56 }
  0xff   : > { %v1847_v47 = vpop.eup %1846  ;;  %v1069_v48 = vadd.f32 %v2587_v20, %v1054_v22  ;;  %v606_v58 = vrot.slane %v570_v7, 1  ;;  %v647_v60 = vmul.f32 %v2463_v26, %v2538_v38  ;;  %v648_v9 = vmul.f32 %v2463_v26, %v2548_v46 }
 0x100   : > { %v1849_v53 = vpop.eup %1848  ;;  %v1157_v57 = vadd.f32 1.0, %v1847_v47  ;;  %v607_v59 = vrot.slane %v571_v55, 1  ;;  %v1070_v61 = vadd.f32 %v2587_v20, %v1055_v13  ;;  %v605_v0 = vsel %vm596_vm0, %v603_v50, %v604_v16 }
 0x101   : > { %v1158_v30 = vadd.f32 1.0, %v1849_v53  ;;  %v1083_v63 = vmul.f32 %v2602_v40, %v1069_v48  ;;  %v631_v56 = vadd.f32 %v605_v0, %v554_v21  ;;  %v680_v22 = vrot.slane %v645_v51, 2 }
 0x102   : > { %v1165_v2 = vmul.f32 %v1157_v57, %v1101_v33  ;;  %v608_v3 = vsel %vm596_vm0, %v606_v58, %v607_v59  ;;  %v1084_v23 = vmul.f32 %v2602_v40, %v1070_v61  ;;  %v683_v44 = vrot.slane %v647_v60, 2 }
 0x103   : > { %v1166_v19 = vmul.f32 %v1158_v30, %v1102_v41  ;;  %v2744_v35 = vadd.f32 %v2610_v52, %v1083_v63  ;;  %v632_v36 = vadd.f32 %v608_v3, %v555_v43  ;;  %v684_v14 = vrot.slane %v648_v9, 2 }
 0x104   : > { %v1221_v39 = vadd.f32 %v2643_v27, %v1165_v2  ;;  %v2749_v33 = vadd.f32 %v2610_v52, %v1084_v23  ;;  %v1204_v41 = vrot.slane %v2627_v8, 1  ;;  %v682_v42 = vsel %vm673_vm1, %v680_v22, %v681_v1 }
 0x105   : > { %v1222_v16 = vadd.f32 %v2651_v37, %v1166_v19  ;;  %v1113_v21 = vmul.f32 0.044715, %v2744_v35  ;;  %v685_v43 = vsel %vm673_vm1, %v683_v44, %v684_v14  ;;  %v720_v27 = vmul.f32 %v2467_v28, %v2538_v38 }
 0x106   : > { %v721_v7 = vmul.f32 %v2467_v28, %v2573_v4  ;;  %v1114_v55 = vmul.f32 0.044715, %v2749_v33  ;;  %v1205_v13 = vrot.slane %v2654_v15, 1  ;;  %v708_v48 = vadd.f32 %v682_v42, %v631_v56 }
 0x107   : > { %v1229_v37 = vpack.c.bf16 %v1222_v16, %v1221_v39  ;;  %v1121_v47 = vmul.f32 %v1113_v21, %v2744_v35  ;;  %v709_v50 = vadd.f32 %v685_v43, %v632_v36  ;;  %v742_v49 = vmul.f32 %v2470_v29, %v2538_v38 }
 0x108   : > { %v743_v1 = vmul.f32 %v2470_v29, %v2548_v46  ;;  %v1122_v51 = vmul.f32 %v1114_v55, %v2749_v33  ;;  %v744_v57 = vmul.f32 %v2470_v29, %v2573_v4  ;;  %v745_v58 = vmul.f32 %v2470_v29, %v2575_v5 }
 0x109   : > { %1719 = vmatprep.mubr.bf16.mxu0 %v1229_v37  ;;  %v1129_v53 = vmul.f32 %v1121_v47, %v2744_v35  ;;  %v728_v59 = vadd.f32 %v720_v27, %v708_v48  ;;  %v729_v60 = vadd.f32 %v721_v7, %v709_v50  ;;  %v776_v30 = vrot.slane %v742_v49, 1 }
 0x10a   : > { %v777_v61 = vrot.slane %v743_v1, 1  ;;  %v1130_v63 = vmul.f32 %v1122_v51, %v2749_v33  ;;  %v779_v2 = vrot.slane %v744_v57, 1  ;;  %v780_v3 = vrot.slane %v745_v58, 1 }
 0x10b   : > { %v1137_v0 = vadd.f32 %v1129_v53, %v2744_v35  ;;  %v818_v9 = vmul.f32 %v2478_v34, %v2538_v38  ;;  %v819_v19 = vmul.f32 %v2478_v34, %v2548_v46  ;;  %v820_v23 = vmul.f32 %v2478_v34, %v2573_v4 }
 0x10c   : > { %v778_v56 = vsel %vm596_vm0, %v776_v30, %v777_v61  ;;  %v1138_v36 = vadd.f32 %v1130_v63, %v2749_v33  ;;  %v781_v22 = vsel %vm596_vm0, %v779_v2, %v780_v3  ;;  %v821_v16 = vmul.f32 %v2478_v34, %v2575_v5 }
 0x10d   : > { %v1145_v39 = vmul.f32 0.7978846, %v1137_v0  ;;  %v804_v44 = vadd.f32 %v778_v56, %v728_v59  ;;  %v805_v14 = vadd.f32 %v781_v22, %v729_v60  ;;  %v852_v21 = vrot.slane %v818_v9, 2 }
 0x10e   : > { %v853_v42 = vrot.slane %v819_v19, 2  ;;  %v1146_v43 = vmul.f32 0.7978846, %v1138_v36  ;;  %v855_v27 = vrot.slane %v820_v23, 2  ;;  %v892_v7 = vmul.f32 %v2532_v31, %v2573_v4 }
 0x10f   : > { %1850 = vtanh.f32 %v1145_v39  ;;  %v856_v55 = vrot.slane %v821_v16, 2  ;;  %v893_v47 = vmul.f32 %v2532_v31, %v2577_v6  ;;  %v914_v48 = vmul.f32 %v2535_v32, %v2573_v4 }
 0x110   : > { %v854_v37 = vsel %vm673_vm1, %v852_v21, %v853_v42  ;;  %1852 = vtanh.f32 %v1146_v43  ;;  %v915_v49 = vmul.f32 %v2535_v32, %v2575_v5  ;;  %v916_v1 = vmul.f32 %v2535_v32, %v2577_v6 }
 0x111   : > { %v880_v50 = vadd.f32 %v854_v37, %v804_v44  ;;  %v857_v51 = vsel %vm673_vm1, %v855_v27, %v856_v55  ;;  %v917_v53 = vmul.f32 %v2535_v32, %v2580_v11  ;;  %v948_v57 = vrot.slane %v914_v48, 1 }
 0x112   : > { %v990_v58 = vmul.f32 %v2559_v54, %v2573_v4  ;;  %v881_v59 = vadd.f32 %v857_v51, %v805_v14  ;;  %v949_v30 = vrot.slane %v915_v49, 1  ;;  %v951_v61 = vrot.slane %v916_v1, 1 }
 0x113   : > { %v900_v60 = vadd.f32 %v892_v7, %v880_v50  ;;  %v952_v63 = vrot.slane %v917_v53, 1  ;;  %v991_v0 = vmul.f32 %v2559_v54, %v2575_v5  ;;  %v992_v2 = vmul.f32 %v2559_v54, %v2577_v6 }
 0x114   : > { %v993_v3 = vmul.f32 %v2559_v54, %v2580_v11  ;;  %v616_v56 = vrot.slane %v2708_v10, 1  ;;  %v901_v9 = vadd.f32 %v893_v47, %v881_v59  ;;  %v950_v19 = vsel %vm596_vm0, %v948_v57, %v949_v30 }
 0x115   : > { %v1024_v23 = vrot.slane %v990_v58, 2  ;;  %v953_v36 = vsel %vm596_vm0, %v951_v61, %v952_v63  ;;  %v976_v39 = vadd.f32 %v950_v19, %v900_v60  ;;  %v1025_v22 = vrot.slane %v991_v0, 2 }
 0x116   : > { %v1027_v44 = vrot.slane %v992_v2, 2  ;;  %v693_v14 = vrot.slane %v2712_v12, 2  ;;  %v1203_v16 = vsel %vm596_vm0, %v1201_v62, %v1202_v18  ;;  %v977_v21 = vadd.f32 %v953_v36, %v901_v9 }
 0x117   : > { %v1028_v42 = vrot.slane %v993_v3, 2  ;;  %v1105_v10 = vmul.f32 0.5, %v2744_v35  ;;  %v1106_v43 = vmul.f32 0.5, %v2749_v33  ;;  %v1206_v27 = vsel %vm596_vm0, %v1204_v41, %v1205_v13 }
 0x118   : > { %v1026_v12 = vsel %vm673_vm1, %v1024_v23, %v1025_v22  ;;  %v558_v62 = vmul.f32 %v2457_v24, %v2627_v8  ;;  %v576_v18 = vmul.f32 %v2460_v25, %v2627_v8  ;;  %v559_v15 = vmul.f32 %v2457_v24, %v2679_v17 }
 0x119   : > { %v1851_v7 = vpop.eup %1850  ;;  %v1029_v11 = vsel %vm673_vm1, %v1027_v44, %v1028_v42  ;;  %v1052_v6 = vadd.f32 %v1026_v12, %v976_v39  ;;  %v578_v41 = vmul.f32 %v2460_v25, %v2679_v17  ;;  %v579_v55 = vmul.f32 %v2460_v25, %v2690_v45 }
 0x11a   : > { %v1161_v35 = vadd.f32 1.0, %v1851_v7  ;;  %v1053_v33 = vadd.f32 %v1029_v11, %v977_v21  ;;  %v1853_v13 = vpop.eup %1852  ;;  %v615_v47 = vrot.slane %v576_v18, 1  ;;  %v653_v48 = vmul.f32 %v2463_v26, %v2627_v8 }
 0x11b   : > { %v1067_v37 = vadd.f32 %v2587_v20, %v1052_v6  ;;  %v1162_v50 = vadd.f32 1.0, %v1853_v13  ;;  %v618_v51 = vrot.slane %v578_v41, 1  ;;  %v619_v57 = vrot.slane %v579_v55, 1 }
 0x11c   : > { %v1169_v49 = vmul.f32 %v1161_v35, %v1105_v10  ;;  %v1068_v1 = vadd.f32 %v2587_v20, %v1053_v33  ;;  %v617_v53 = vsel %vm596_vm0, %v615_v47, %v616_v56  ;;  %v655_v58 = vmul.f32 %v2463_v26, %v2679_v17  ;;  %v2855_v56 = vld [vmem:[#allocation2 + $0x80] sm:$0xff] }
 0x11d   : > { %v1081_v24 = vmul.f32 %v2602_v40, %v1067_v37  ;;  %v1170_v59 = vmul.f32 %v1162_v50, %v1106_v43  ;;  %v635_v30 = vadd.f32 %v617_v53, %v558_v62  ;;  %v620_v61 = vsel %vm596_vm0, %v618_v51, %v619_v57 }
 0x11e   : > { %v1225_v60 = vadd.f32 %v1203_v16, %v1169_v49  ;;  %v1082_v25 = vmul.f32 %v2602_v40, %v1068_v1  ;;  %v656_v63 = vmul.f32 %v2463_v26, %v2690_v45  ;;  %v692_v0 = vrot.slane %v653_v48, 2  ;;  %v2860_v16 = vld [vmem:[#allocation2 + $0x88] sm:$0x3]  ;;  %v541_v1 = vld [vmem:[#allocation2 + $0x90] sm:$0xff] }
 0x11f   : > { %v2847_v8 = vadd.f32 %v2610_v52, %v1081_v24  ;;  %v1226_v2 = vadd.f32 %v1206_v27, %v1170_v59  ;;  %v636_v9 = vadd.f32 %v620_v61, %v559_v15  ;;  %v695_v19 = vrot.slane %v655_v58, 2 }
 0x120   : > { %v2853_v3 = vadd.f32 %v2610_v52, %v1082_v25  ;;  %v694_v36 = vsel %vm673_vm1, %v692_v0, %v693_v14  ;;  %v696_v39 = vrot.slane %v656_v63, 2  ;;  %v724_v10 = vmul.f32 %v2467_v28, %v2679_v17  ;;  %v542_v25 = vld [vmem:[#allocation2 + $0x98] sm:$0x3] }
 0x121   : > { %v1111_v23 = vmul.f32 0.044715, %v2847_v8  ;;  %v1231_v22 = vpack.c.bf16 %v1226_v2, %v1225_v60  ;;  %v712_v26 = vadd.f32 %v694_v36, %v635_v30  ;;  %v725_v43 = vmul.f32 %v2467_v28, %v2855_v56 }
 0x122   : > { %v1112_v44 = vmul.f32 0.044715, %v2853_v3  ;;  %v697_v42 = vsel %vm673_vm1, %v695_v19, %v696_v39  ;;  %v750_v12 = vmul.f32 %v2470_v29, %v2679_v17  ;;  %v751_v7 = vmul.f32 %v2470_v29, %v2690_v45 }
 0x123   : > { %v1119_v21 = vmul.f32 %v1111_v23, %v2847_v8  ;;  %1723 = vmatprep.mubr.bf16.mxu1 %v1231_v22  ;;  %v713_v27 = vadd.f32 %v697_v42, %v636_v9  ;;  %v732_v6 = vadd.f32 %v724_v10, %v712_v26  ;;  %v752_v62 = vmul.f32 %v2470_v29, %v2855_v56 }
 0x124   : > { %v1120_v14 = vmul.f32 %v1112_v44, %v2853_v3  ;;  %v753_v18 = vmul.f32 %v2470_v29, %v2860_v16  ;;  %v788_v33 = vrot.slane %v750_v12, 1  ;;  %v789_v15 = vrot.slane %v751_v7, 1 }
 0x125   : > { %v1127_v11 = vmul.f32 %v1119_v21, %v2847_v8  ;;  %v733_v35 = vadd.f32 %v725_v43, %v713_v27  ;;  %v791_v13 = vrot.slane %v752_v62, 1  ;;  %v826_v55 = vmul.f32 %v2478_v34, %v2679_v17 }
 0x126   : > { %v1128_v28 = vmul.f32 %v1120_v14, %v2853_v3  ;;  %v792_v37 = vrot.slane %v753_v18, 1  ;;  %v790_v48 = vsel %vm596_vm0, %v788_v33, %v789_v15  ;;  %v827_v50 = vmul.f32 %v2478_v34, %v2690_v45 }
 0x127   : > { %v1135_v41 = vadd.f32 %v1127_v11, %v2847_v8  ;;  %v828_v29 = vmul.f32 %v2478_v34, %v2855_v56  ;;  %v808_v24 = vadd.f32 %v790_v48, %v732_v6  ;;  %v829_v53 = vmul.f32 %v2478_v34, %v2860_v16 }
 0x128   : > { %v1136_v47 = vadd.f32 %v1128_v28, %v2853_v3  ;;  %v793_v51 = vsel %vm596_vm0, %v791_v13, %v792_v37  ;;  %v864_v59 = vrot.slane %v826_v55, 2  ;;  %v865_v60 = vrot.slane %v827_v50, 2 }
 0x129   : > { %v1143_v49 = vmul.f32 0.7978846, %v1135_v41  ;;  %v809_v58 = vadd.f32 %v793_v51, %v733_v35  ;;  %v867_v30 = vrot.slane %v828_v29, 2  ;;  %v868_v61 = vrot.slane %v829_v53, 2 }
 0x12a   : > { %v1144_v57 = vmul.f32 0.7978846, %v1136_v47  ;;  %v896_v63 = vmul.f32 %v2532_v31, %v2855_v56  ;;  %v866_v0 = vsel %vm673_vm1, %v864_v59, %v865_v60  ;;  %v897_v2 = vmul.f32 %v2532_v31, %v541_v1 }
 0x12b   : > { %1854 = vtanh.f32 %v1143_v49  ;;  %v922_v9 = vmul.f32 %v2535_v32, %v2855_v56  ;;  %v869_v34 = vsel %vm673_vm1, %v867_v30, %v868_v61  ;;  %v884_v19 = vadd.f32 %v866_v0, %v808_v24 }
 0x12c   : > { %1856 = vtanh.f32 %v1144_v57  ;;  %v923_v23 = vmul.f32 %v2535_v32, %v2860_v16  ;;  %v924_v36 = vmul.f32 %v2535_v32, %v541_v1  ;;  %v885_v39 = vadd.f32 %v869_v34, %v809_v58 }
 0x12d   : > { %v925_v22 = vmul.f32 %v2535_v32, %v542_v25  ;;  %v960_v44 = vrot.slane %v922_v9, 1  ;;  %v998_v26 = vmul.f32 %v2559_v54, %v2855_v56  ;;  %v904_v21 = vadd.f32 %v896_v63, %v884_v19 }
 0x12e   : > { %v961_v31 = vrot.slane %v923_v23, 1  ;;  %v963_v42 = vrot.slane %v924_v36, 1  ;;  %v999_v10 = vmul.f32 %v2559_v54, %v2860_v16  ;;  %v905_v43 = vadd.f32 %v897_v2, %v885_v39 }
 0x12f   : > { %v964_v14 = vrot.slane %v925_v22, 1  ;;  %v1000_v27 = vmul.f32 %v2559_v54, %v541_v1  ;;  %v1001_v12 = vmul.f32 %v2559_v54, %v542_v25  ;;  %v1195_v7 = vrot.slane %v2538_v38, 1 }
 0x130   : > { %v962_v32 = vsel %vm596_vm0, %v960_v44, %v961_v31  ;;  %v1036_v11 = vrot.slane %v998_v26, 2  ;;  %v1037_v6 = vrot.slane %v999_v10, 2  ;;  %v1196_v33 = vrot.slane %v2548_v46, 1 }
 0x131   : > { %v965_v62 = vsel %vm596_vm0, %v963_v42, %v964_v14  ;;  %v980_v18 = vadd.f32 %v962_v32, %v904_v21  ;;  %v1039_v28 = vrot.slane %v1000_v27, 2  ;;  %v1040_v35 = vrot.slane %v1001_v12, 2 }
 0x132   : > { %v1198_v15 = vrot.slane %v2573_v4, 1  ;;  %v981_v41 = vadd.f32 %v965_v62, %v905_v43  ;;  %v1038_v13 = vsel %vm673_vm1, %v1036_v11, %v1037_v6  ;;  %v1103_v54 = vmul.f32 0.5, %v2847_v8  ;;  %v2934_v11 = vld [vmem:[%s409_s19] ss:$0 sm:$0xff] }
 0x133   : > { %v1199_v38 = vrot.slane %v2575_v5, 1  ;;  %v1041_v37 = vsel %vm673_vm1, %v1039_v28, %v1040_v35  ;;  %v1056_v55 = vadd.f32 %v1038_v13, %v980_v18  ;;  %v1104_v48 = vmul.f32 0.5, %v2853_v3 }
 0x134   : > { %v1057_v50 = vadd.f32 %v1041_v37, %v981_v41  ;;  %v1197_v4 = vsel %vm596_vm0, %v1195_v7, %v1196_v33  ;;  %v1207_v36 = vrot.slane %v2679_v17, 1  ;;  %v1208_v39 = vrot.slane %v2690_v45, 1 }
 0x135   : > { %v1855_v47 = vpop.eup %1854  ;;  %v1071_v46 = vadd.f32 %v2587_v20, %v1056_v55  ;;  %v1200_v8 = vsel %vm596_vm0, %v1198_v15, %v1199_v38  ;;  %v1210_v44 = vrot.slane %v2855_v56, 1  ;;  %v1211_v26 = vrot.slane %v2860_v16, 1 }
 0x136   : > { %v1857_v29 = vpop.eup %1856  ;;  %v1159_v49 = vadd.f32 1.0, %v1855_v47  ;;  %v1072_v51 = vadd.f32 %v2587_v20, %v1057_v50  ;;  %v1209_v14 = vsel %vm596_vm0, %v1207_v36, %v1208_v39 }
 0x137   : > { %v1160_v1 = vadd.f32 1.0, %v1857_v29  ;;  %v1085_v5 = vmul.f32 %v2602_v40, %v1071_v46  ;;  %v1212_v12 = vsel %vm596_vm0, %v1210_v44, %v1211_v26 }
 0x138   : > { %v1167_v24 = vmul.f32 %v1159_v49, %v1103_v54  ;;  %v1086_v57 = vmul.f32 %v2602_v40, %v1072_v51 }
 0x139   : > { %v1168_v53 = vmul.f32 %v1160_v1, %v1104_v48  ;;  %v1099_v3 = vadd.f32 %v2610_v52, %v1085_v5 }
 0x13a   : > { %v1223_v58 = vadd.f32 %v1197_v4, %v1167_v24  ;;  %v1100_v60 = vadd.f32 %v2610_v52, %v1086_v57 }
 0x13b   : > { %v1224_v59 = vadd.f32 %v1200_v8, %v1168_v53  ;;  %v1115_v25 = vmul.f32 0.044715, %v1099_v3  ;;  %v1107_v22 = vmul.f32 0.5, %v1099_v3 }
 0x13c   : > { %v1116_v61 = vmul.f32 0.044715, %v1100_v60  ;;  %v1108_v31 = vmul.f32 0.5, %v1100_v60 }
 0x13d   : > { %v1230_v30 = vpack.c.bf16 %v1224_v59, %v1223_v58  ;;  %v1123_v63 = vmul.f32 %v1115_v25, %v1099_v3 }
 0x13e   : > { %v1124_v20 = vmul.f32 %v1116_v61, %v1100_v60 }
 0x13f   : > { %1720 = vmatmul.mubr.bf16.vlgmr.msra.gmra.mrb[0].mxu0 %v1230_v30  ;;  %v1131_v0 = vmul.f32 %v1123_v63, %v1099_v3 }
 0x140   : > { %v1132_v2 = vmul.f32 %v1124_v20, %v1100_v60 }
 0x141   : > { %v1139_v9 = vadd.f32 %v1131_v0, %v1099_v3 }
 0x142   : > { %v1140_v34 = vadd.f32 %v1132_v2, %v1100_v60 }
 0x143   : > { %v1147_v19 = vmul.f32 0.7978846, %v1139_v9 }
 0x144   : > { %v1148_v23 = vmul.f32 0.7978846, %v1140_v34 }
 0x145   : > { %1858 = vtanh.f32 %v1147_v19 }
 0x146   : > { %1860 = vtanh.f32 %v1148_v23 }
 0x14f   : > { %v1859_v21 = vpop.eup %1858 }
 0x150   : > { %v1861_v42 = vpop.eup %1860  ;;  %v1163_v10 = vadd.f32 1.0, %v1859_v21 }
 0x151   : > { %v1164_v43 = vadd.f32 1.0, %v1861_v42 }
 0x152   : > { %v1171_v27 = vmul.f32 %v1163_v10, %v1107_v22 }
 0x153   : > { %v1172_v7 = vmul.f32 %v1164_v43, %v1108_v31 }
 0x154   : > { %v1227_v17 = vadd.f32 %v1209_v14, %v1171_v27 }
 0x155   : > { %v1228_v32 = vadd.f32 %v1212_v12, %v1172_v7 }
 0x157   : > { %v1232_v45 = vpack.c.bf16 %v1228_v32, %v1227_v17 }
 0x159   : > { %1724 = vmatmul.mubr.bf16.vlgmr.msra.gmra.mrb[0].mxu1 %v1232_v45 }
 0x212   : > { %v1721_v56 = vpop.f32.mrb[0].mxu0 }
 0x213   : > { %v1347_v16 = vadd.f32 %v1721_v56, %v2934_v11  ;;  %v1338_v6 = vpop.f32.mrb[1].mxu0 }
 0x214   : > { %v1339_v62 = vadd.f32 %v2934_v11, %v1338_v6  ;;  %v1722_v18 = vpop.f32.mrb[2].mxu0 }
 0x215   : > { %v1371_v28 = vmul.f32 %v2602_v40, %v1347_v16  ;;  %v1350_v35 = vadd.f32 %v1722_v18, %v2934_v11  ;;  %v1341_v33 = vpop.f32.mrb[3].mxu0 }
 0x216   : > { %v1369_v15 = vmul.f32 %v2602_v40, %v1339_v62  ;;  %v1342_v41 = vadd.f32 %v2934_v11, %v1341_v33 }
 0x217   : > { %v1379_v13 = vadd.f32 %v2610_v52, %v1371_v28  ;;  %v1372_v54 = vmul.f32 %v2602_v40, %v1350_v35 }
 0x218   : > { %v1377_v38 = vadd.f32 %v2610_v52, %v1369_v15  ;;  %v1370_v37 = vmul.f32 %v2602_v40, %v1342_v41 }
 0x219   : > { %v1395_v55 = vmul.f32 0.044715, %v1379_v13  ;;  %v1380_v47 = vadd.f32 %v2610_v52, %v1372_v54  ;;  %v1387_v2 = vmul.f32 0.5, %v1379_v13 }
 0x21a   : > { %v1393_v48 = vmul.f32 0.044715, %v1377_v38  ;;  %v1378_v50 = vadd.f32 %v2610_v52, %v1370_v37  ;;  %v1385_v19 = vmul.f32 0.5, %v1377_v38 }
 0x21b   : > { %v1403_v29 = vmul.f32 %v1395_v55, %v1379_v13  ;;  %v1396_v49 = vmul.f32 0.044715, %v1380_v47  ;;  %v1388_v44 = vmul.f32 0.5, %v1380_v47 }
 0x21c   : > { %v1401_v46 = vmul.f32 %v1393_v48, %v1377_v38  ;;  %v1394_v1 = vmul.f32 0.044715, %v1378_v50  ;;  %v1386_v21 = vmul.f32 0.5, %v1378_v50 }
 0x21d   : > { %v1411_v4 = vmul.f32 %v1403_v29, %v1379_v13  ;;  %v1404_v51 = vmul.f32 %v1396_v49, %v1380_v47 }
 0x21e   : > { %v1409_v24 = vmul.f32 %v1401_v46, %v1377_v38  ;;  %v1402_v8 = vmul.f32 %v1394_v1, %v1378_v50 }
 0x21f   : > { %v1419_v5 = vadd.f32 %v1411_v4, %v1379_v13  ;;  %v1412_v53 = vmul.f32 %v1404_v51, %v1380_v47 }
 0x220   : > { %v1417_v57 = vadd.f32 %v1409_v24, %v1377_v38  ;;  %v1410_v58 = vmul.f32 %v1402_v8, %v1378_v50 }
 0x221   : > { %v1427_v3 = vmul.f32 0.7978846, %v1419_v5  ;;  %v1420_v59 = vadd.f32 %v1412_v53, %v1380_v47 }
 0x222   : > { %v1425_v60 = vmul.f32 0.7978846, %v1417_v57  ;;  %v1418_v25 = vadd.f32 %v1410_v58, %v1378_v50 }
 0x223   : > { %1862 = vtanh.f32 %v1427_v3  ;;  %v1428_v30 = vmul.f32 0.7978846, %v1420_v59 }
 0x224   : > { %1864 = vtanh.f32 %v1425_v60  ;;  %v1426_v61 = vmul.f32 0.7978846, %v1418_v25 }
 0x225   : > { %1866 = vtanh.f32 %v1428_v30 }
 0x226   : > { %1868 = vtanh.f32 %v1426_v61 }
 0x22c   : > { %v1725_v20 = vpop.f32.mrb[0].mxu1 }
 0x22d   : > { %v1863_v63 = vpop.eup %1862  ;;  %v1363_v34 = vadd.f32 %v1725_v20, %v2934_v11  ;;  %v1354_v23 = vpop.f32.mrb[1].mxu1 }
 0x22e   : > { %v1865_v0 = vpop.eup %1864  ;;  %v1443_v9 = vadd.f32 1.0, %v1863_v63  ;;  %v1355_v22 = vadd.f32 %v2934_v11, %v1354_v23  ;;  %v1726_v26 = vpop.f32.mrb[2].mxu1 }
 0x22f   : > { %v1867_v36 = vpop.eup %1866  ;;  %v1441_v39 = vadd.f32 1.0, %v1865_v0  ;;  %v1375_v10 = vmul.f32 %v2602_v40, %v1363_v34  ;;  %v1366_v14 = vadd.f32 %v1726_v26, %v2934_v11  ;;  %v1357_v27 = vpop.f32.mrb[3].mxu1 }
 0x230   : > { %v1869_v31 = vpop.eup %1868  ;;  %v2950_v42 = vmul.f32 %v1443_v9, %v1387_v2  ;;  %v1444_v43 = vadd.f32 1.0, %v1867_v36  ;;  %v1373_v7 = vmul.f32 %v2602_v40, %v1355_v22  ;;  %v1358_v32 = vadd.f32 %v2934_v11, %v1357_v27 }
 0x231   : > { %v1449_v12 = vmul.f32 %v1441_v39, %v1385_v19  ;;  %v1442_v17 = vadd.f32 1.0, %v1869_v31  ;;  %v1383_v45 = vadd.f32 %v2610_v52, %v1375_v10  ;;  %v1376_v16 = vmul.f32 %v2602_v40, %v1366_v14 }
 0x232   : > { %1460 = vst [vmem:[#allocation2 + $0x31] sm:$0xff] %v2950_v42  ;;  %v1452_v56 = vmul.f32 %v1444_v43, %v1388_v44  ;;  %v1381_v6 = vadd.f32 %v2610_v52, %v1373_v7  ;;  %v1374_v18 = vmul.f32 %v2602_v40, %v1358_v32  ;;  %1472 = vst [vmem:[%s2423_s16 + $0x10] sm:$0xff] (!%p1685_p6), %v2950_v42 }
 0x233   : > { %1458 = vst [vmem:[#allocation2 + $0x11] sm:$0xff] %v1449_v12  ;;  %v1450_v62 = vmul.f32 %v1442_v17, %v1386_v21  ;;  %v1399_v28 = vmul.f32 0.044715, %v1383_v45  ;;  %v1384_v35 = vadd.f32 %v2610_v52, %v1376_v16  ;;  %v1391_v5 = vmul.f32 0.5, %v1383_v45  ;;  %1470 = vst [vmem:[%s2423_s16] sm:$0xff] (!%p1685_p6), %v1449_v12 }
 0x234   : > { %1461 = vst [vmem:[#allocation2 + $0x41] sm:$0xff] %v1452_v56  ;;  %v1397_v33 = vmul.f32 0.044715, %v1381_v6  ;;  %v1382_v11 = vadd.f32 %v2610_v52, %v1374_v18  ;;  %v1389_v58 = vmul.f32 0.5, %v1381_v6  ;;  %1473 = vst [vmem:[%s2423_s16 + $0x18] sm:$0xff] (!%p1685_p6), %v1452_v56 }
 0x235   : > { %1459 = vst [vmem:[#allocation2 + $0x21] sm:$0xff] %v1450_v62  ;;  %v1407_v15 = vmul.f32 %v1399_v28, %v1383_v45  ;;  %v1400_v41 = vmul.f32 0.044715, %v1384_v35  ;;  %v1392_v25 = vmul.f32 0.5, %v1384_v35  ;;  %1471 = vst [vmem:[%s2423_s16 + $0x8] sm:$0xff] (!%p1685_p6), %v1450_v62 }
 0x236   : > { %v1405_v13 = vmul.f32 %v1397_v33, %v1381_v6  ;;  %v1398_v54 = vmul.f32 0.044715, %v1382_v11  ;;  %v1390_v63 = vmul.f32 0.5, %v1382_v11 }
 0x237   : > { %v1415_v38 = vmul.f32 %v1407_v15, %v1383_v45  ;;  %v1408_v37 = vmul.f32 %v1400_v41, %v1384_v35 }
 0x238   : > { %v1413_v55 = vmul.f32 %v1405_v13, %v1381_v6  ;;  %v1406_v47 = vmul.f32 %v1398_v54, %v1382_v11 }
 0x239   : > { %v1423_v48 = vadd.f32 %v1415_v38, %v1383_v45  ;;  %v1416_v50 = vmul.f32 %v1408_v37, %v1384_v35 }
 0x23a   : > { %v1421_v29 = vadd.f32 %v1413_v55, %v1381_v6  ;;  %v1414_v40 = vmul.f32 %v1406_v47, %v1382_v11 }
 0x23b   : > { %v1431_v49 = vmul.f32 0.7978846, %v1423_v48  ;;  %v1424_v46 = vadd.f32 %v1416_v50, %v1384_v35 }
 0x23c   : > { %v1429_v1 = vmul.f32 0.7978846, %v1421_v29  ;;  %v1422_v4 = vadd.f32 %v1414_v40, %v1382_v11 }
 0x23d   : > { %1870 = vtanh.f32 %v1431_v49  ;;  %v1432_v51 = vmul.f32 0.7978846, %v1424_v46 }
 0x23e   : > { %1872 = vtanh.f32 %v1429_v1  ;;  %v1430_v52 = vmul.f32 0.7978846, %v1422_v4 }
 0x23f   : > { %1874 = vtanh.f32 %v1432_v51 }
 0x240   : > { %1876 = vtanh.f32 %v1430_v52 }
 0x247   : > { %v1871_v24 = vpop.eup %1870 }
 0x248   : > { %v1873_v8 = vpop.eup %1872  ;;  %v1447_v53 = vadd.f32 1.0, %v1871_v24 }
 0x249   : > { %v1875_v57 = vpop.eup %1874  ;;  %v1445_v3 = vadd.f32 1.0, %v1873_v8  ;;  %1469 = sbr.rel (%p1685_p6) target bundleno = 592 (0x250), region = 76 }
 0x24a   : > { %v1877_v59 = vpop.eup %1876  ;;  %v1455_v60 = vmul.f32 %v1447_v53, %v1391_v5  ;;  %v1448_v30 = vadd.f32 1.0, %v1875_v57 }
 0x24b   : > { %v1453_v61 = vmul.f32 %v1445_v3, %v1389_v58  ;;  %v1446_v20 = vadd.f32 1.0, %v1877_v59 }
 0x24c   : > { %1464 = vst [vmem:[#allocation2 + $0x71] sm:$0xff] %v1455_v60  ;;  %v1456_v0 = vmul.f32 %v1448_v30, %v1392_v25  ;;  %1476 = vst [vmem:[%s2423_s16 + $0x30] sm:$0xff] (!%p1685_p6), %v1455_v60 }
 0x24d   : > { %1462 = vst [vmem:[#allocation2 + $0x51] sm:$0xff] %v1453_v61  ;;  %v1454_v2 = vmul.f32 %v1446_v20, %v1390_v63  ;;  %1474 = vst [vmem:[%s2423_s16 + $0x20] sm:$0xff] (!%p1685_p6), %v1453_v61 }
 0x24e   : > { %1465 = vst [vmem:[#allocation2 + $0x81] sm:$0xff] %v1456_v0  ;;  %1477 = vst [vmem:[%s2423_s16 + $0x38] sm:$0xff] (!%p1685_p6), %v1456_v0 }
 0x24f   : > { %1463 = vst [vmem:[#allocation2 + $0x61] sm:$0xff] %v1454_v2  ;;  %1475 = vst [vmem:[%s2423_s16 + $0x28] sm:$0xff] (!%p1685_p6), %v1454_v2 }
 0x250 PF: > { %s26_s8 = sadd.s32 1, %s2102_s8   ;;  %s3034_s27 = sld [smem:[#allocation18_spill]] }
 0x251   : > { %p23_p0 = scmp.ge.s32.totalorder %s26_s8, 6   ;;  %s3035_s28 = sld [smem:[#allocation14_spill]] }
 0x252   : > { %s3036_s9 = sld [smem:[#allocation15_spill]]  ;;  %s3037_s29 = sld [smem:[#allocation16_spill]] }
 0x253   : > { %s3038_s30 = sld [smem:[#allocation17_spill]]  ;;  %s3039_s24 = smov %s2078_s25 }
 0x254   : > { %s3040_s25 = smov %s2082_s26  ;;  %25 = sbr.rel (!%p23_p0) target bundleno = 12 (0xc), region = 152 }
 0x256   : > { %s3041_s26 = smov %s3034_s27 }
 0x257   : > { %s3042_s27 = smov %s3035_s28 }
 0x258   : > { %s3043_s28 = smov %s3036_s9 }
 0x25b   :  { %1499 = vsyncpa [#allocation4], 1 }
 0x25c   :  { %1501 = vsyncpa [#allocation4 + $0x1], 1 }
 0x25d   :  { %1502 = vsyncpa [#allocation6], 1 }
 0x25e   :  { %1504 = vsyncpa [#allocation6 + $0x1], 1 }
 0x25f   :  { %1505 = vsyncpa [#allocation9], 1 }
 0x260   :  { %1507 = vsyncpa [#allocation9 + $0x1], 1 }

// kernel: convmixer_backbone_forward.7
= control target key start
LH: loop header
LB: loop body
LE: loop exit
PB: predicated region body
PF: predicated region fallthrough
CT: control target
= control target key end

     0   :  { %8 = vsyncpa [#allocation4], 0  ;;  %s2219_s0 = inlined_call_operand.vmem [shape: f32[2,8192], index: 0, kind: input, shape index: {}]   ;;  %s2220_s1 = inlined_call_operand.hbm [shape: bf16[8192,512], index: 1, kind: input, shape index: {}]   ;;  %s2221_s2 = inlined_call_operand.hbm [shape: f32[1,512], index: 2, kind: input, shape index: {}]   ;;  %s2222_s3 = inlined_call_operand.hbm [shape: f32[2,512], index: 3, kind: output, shape index: {}]  }
   0x1   :  { %10 = vsyncpa [#allocation4 + $0x1], 0 }
   0x2   :  { %11 = vsyncpa [#allocation7], 0 }
   0x3   :  { %12 = vsyncpa [#allocation5], 0  ;;  %s1891_s12 = smov 0   ;;  %s1893_s13 = smov 0  }
   0x4   :  { %s1895_s14 = smov 0   ;;  %s1897_s15 = smov 0  }
   0x5 LB: > { %s1910_s16 = sadd.s32 4294967295, %s1862_s15   ;;  %s1913_s17 = sadd.s32 1, %s1862_s15   ;;  %s1862_s15 = sphi %s1897_s15, %s2241_s15   ;;  %s1858_s14 = sphi %s1895_s14, %s2240_s14   ;;  %s1854_s13 = sphi %s1893_s13, %s2239_s13   ;;  %s1850_s12 = sphi %s1891_s12, %s2238_s12  }
   0x6   : > { %s48_s18 = ssub.s32 %s1862_s15, %s1913_s17  ;;  %s51_s19 = sadd.s32 1, %s1858_s14 }
   0x7   : > { %p49_p0 = scmp.eq.s32.totalorder %s48_s18, 0  ;;  %p58_p1 = scmp.ne.s32.totalorder %s1858_s14, %s1854_s13 }
   0x8   : > { %p59_p2 = scmp.eq.s32.totalorder %s1862_s15, 0  ;;  %p64_p3 = scmp.ne.s32.totalorder %s1854_s13, %s1850_s12 }
   0x9   : > { %s1923_s20 = scalar_select %p49_p0, %s1858_s14, %s51_s19  }
   0xa   : > { %p1925_p4 = por %p59_p2, %p58_p1  ;;  %p2223_p5 = scmp.eq.s32.totalorder %s1910_s16, 0 }
   0xb   : > { %p1326_p6 = scmp.ge.s32.totalorder %s1862_s15, 1  ;;  %p117_p7 = scmp.lt.s32.totalorder %s1862_s15, 17 }
   0xc   : > { %p1934_p8 = por %p2223_p5, %p64_p3  ;;  %s1864_s24 = smov [#allocation6]  }
   0xd   : > { %p1939_p10 = pnand %p1326_p6, %p117_p7  ;;  %s130_s25 = sshll.u32 %s1864_s24, 4  ;;  %s131_s25 = int_to_ptr.vmem [resolvable:$true] %s130_s25 }
   0xe   : > { %s2228_s22 = scalar_select %p1934_p8, 1, 0 }
   0xf   : > { %s2229_s23 = scalar_select %p1939_p10, 1, 0 }
  0x10   : > { %p1492_p11 = pneg %p1939_p10  ;;  %p1501_p12 = scmp.lt.s32.totalorder %s1862_s15, 16 }
  0x11   : > { %s150_s26 = sand.u32 1, %s1858_s14   ;;  %s1736_s5 = scalar_lea.hbm %s2221_s2, 64 }
  0x12   : > { %p1949_p13 = pnand %p1492_p11, %p2223_p5  ;;  %p1955_p0 = pnand %p1501_p12, %p1925_p4 }
  0x13   : > { %s1329_s29 = sshll.u32 %s150_s26, 10  ;;  %p1737_p1 = scmp.ne.s32.totalorder %s2221_s2, %s1736_s5 }
  0x14   : > { %s2231_s28 = scalar_select %p1955_p0, 1, 0 }
  0x15   : > { %p1738_p2 = pneg %p1949_p13  ;;  %p1743_p4 = scmp.lt.u32.totalorder %s1736_s5, %s2221_s2 }
  0x17   : > { %p1739_p3 = pnand %p1738_p2, %p1737_p1 }
  0x19   : > { %p1740_p6 = pneg %p1739_p3 }
  0x1b   : > { %p1745_p7 = pnand %p1743_p4, %p1740_p6 }
  0x1d   : > { %1748 = shalt.err (!%p1745_p7)
}
  0x1e   : > { %s1749_s10 = scalar_lea.vmem %s131_s25, 64  ;;  %p1757_p5 = scmp.lt.s32.totalorder %s131_s25, %s131_s25 }
  0x1f   : > { %p1750_p11 = scmp.ne.s32.totalorder %s131_s25, %s1749_s10  ;;  %p1758_p8 = scmp.lt.s32.totalorder %s1749_s10, %s1749_s10 }
  0x21   : > { %p1752_p12 = pnand %p1750_p11, %p1738_p2  ;;  %p1759_p10 = por %p1758_p8, %p1757_p5 }
  0x23   : > { %p1753_p9 = pneg %p1752_p12 }
  0x25   : > { %p1760_p0 = pnand %p1759_p10, %p1753_p9 }
  0x27   : > { %1763 = shalt.err (!%p1760_p0)
}
  0x28   : > { %1495 = dma.hbm_to_vmem [thread:$0]  (!%p1949_p13), %s2221_s2, 64, %s131_s25, [#allocation7]  }
  0x29   : > { %s1473_s18 = sshll.u32 %s1862_s15, 14  ;;  %s154_s30 = scalar_lea.vmem [#allocation3], %s1329_s29 }
  0x2a   : > { %s1979_s24 = scalar_lea.hbm %s2220_s1, %s1473_s18  ;;  %s162_s4 = sshll.u32 %s154_s30, 4  ;;  %s1981_s4 = int_to_ptr.vmem [resolvable:$true] %s162_s4 }
  0x2b   : > { %s1983_s27 = scalar_lea.sflag [#allocation4], %s150_s26  ;;  %s1764_s5 = scalar_lea.hbm %s1979_s24, 16384 }
  0x2c   : > { %p1765_p5 = scmp.ne.s32.totalorder %s1979_s24, %s1764_s5  ;;  %p2232_p8 = scmp.ne.s32.totalorder %s2231_s28, 0 }
  0x2d   : > { %s1769_s6 = scalar_lea.hbm %s2220_s1, 262144  ;;  %p1770_p0 = scmp.lt.u32.totalorder %s1979_s24, %s2220_s1 }
  0x2e   : > { %p1766_p9 = pneg %p2232_p8  ;;  %p1771_p1 = scmp.lt.u32.totalorder %s1769_s6, %s1764_s5 }
  0x2f   : > { %p1773_p3 = scmp.lt.u32.totalorder %s1764_s5, %s1979_s24 }
  0x30   : > { %p1767_p10 = pnand %p1766_p9, %p1765_p5  ;;  %p1772_p2 = por %p1771_p1, %p1770_p0 }
  0x32   : > { %p1768_p13 = pneg %p1767_p10  ;;  %p1774_p6 = por %p1773_p3, %p1772_p2 }
  0x34   : > { %p1775_p4 = pnand %p1774_p6, %p1768_p13 }
  0x36   : > { %1778 = shalt.err (!%p1775_p4)
}
  0x37   : > { %s1779_s26 = scalar_lea.vmem %s1981_s4, 16384  ;;  %s1865_s29 = smov [#allocation3]  }
  0x38   : > { %p1780_p7 = scmp.ne.s32.totalorder %s1981_s4, %s1779_s26  ;;  %s1784_s9 = sshll.u32 %s1865_s29, 4  ;;  %s1785_s9 = int_to_ptr.vmem [resolvable:$false] %s1784_s9 }
  0x39   : > { %s1786_s10 = scalar_lea.vmem %s1785_s9, 32768  ;;  %p1787_p5 = scmp.lt.s32.totalorder %s1981_s4, %s1785_s9 }
  0x3a   : > { %p1782_p11 = pnand %p1780_p7, %p1766_p9  ;;  %p1788_p10 = scmp.lt.s32.totalorder %s1786_s10, %s1779_s26 }
  0x3c   : > { %p1783_p12 = pneg %p1782_p11  ;;  %p1789_p0 = por %p1788_p10, %p1787_p5 }
  0x3e   : > { %p1790_p1 = pnand %p1789_p0, %p1783_p12 }
  0x40   : > { %1793 = shalt.err (!%p1790_p1)
}
  0x41   : > { %s1866_s11 = smov 256   ;;  %s1867_s12 = smov 16  }
  0x42   : > { %1499 = dma.hbm_to_vmem [thread:$0]  (!%p2232_p8), %s1979_s24, 16384, %s1981_s4, %s1983_s27, %s1866_s11, %s1866_s11, %s1867_s12  }
  0x43   : > { %p2233_p9 = scmp.ne.s32.totalorder %s2229_s23, 0 }
  0x44   : > { %s176_s18 = sand.u32 (!%p2233_p9), 1, %s1854_s13   ;;  %p2234_p13 = scmp.ne.s32.totalorder (!%p2233_p9), %s2228_s22, 0 }
  0x45   : > { %174 = sbr.rel (%p2233_p9) target bundleno = 475 (0x1db), region = 32  ;;  %s1334_s19 = sshll.u32 (!%p2233_p9), %s176_s18, 10 }
  0x46   : > { %s177_s21 = scalar_lea.sflag (!%p2233_p9), [#allocation4], %s176_s18  ;;  %s2014_s30 = scalar_lea.vmem (!%p2233_p9), [#allocation3], %s1334_s19 }
  0x4c   : > { %1837 = dma.done.wait (%p2234_p13), %s177_s21, 16384  }
  0x4d   : > { %1839 = vsyncadd (%p2234_p13), %s177_s21, 4294950912  ;;  %p2235_p2 = scmp.eq.s32.totalorder %s1910_s16, 0 }
  0x4f   : > { %1841 = dma.done.wait (%p2235_p2), [#allocation7], 64   ;;  %p2236_p8 = pmov %p2235_p2 }
  0x50   : > { %s1336_s23 = sshll.u32 %s1910_s16, 2  ;;  %p2237_p6 = scmp.ne.s32.totalorder %s1910_s16, 0 }
  0x51   : > { %1843 = vsyncadd (%p2236_p8), [#allocation7], 4294967232  ;;  %p208_p3 = scmp.lt.s32.totalorder %s1336_s23, 63  ;;  %v1868_v0 = vmov (!%p2237_p6), 0.0  }
  0x52   : > { %217 = sbr.rel (%p2237_p6) target bundleno = 89 (0x59), region = 44  ;;  %218 = vst [vmem:[#allocation2] sm:$0xff] (!%p2237_p6), %v1868_v0 }
  0x53   : > { %s2243_s23 = smov (!%p208_p3, %s1336_s23), 63 }
  0x54   : > { %s1337_s28 = sshll.u32 %s2243_s23, 1 }
  0x55   : > { %s2028_s27 = scalar_lea.vmem %s2219_s0, %s1337_s28 }
  0x59 PF: > { %v1543_v1 = vld [vmem:[%s2014_s30 + $0x4] ss:$16 sps:$4 sm:$0xff]   ;;  %v1545_v2 = vld [vmem:[%s2014_s30 + $0xc] ss:$16 sps:$4 sm:$0xff]   ;;  %v1547_v3 = vld [vmem:[%s2014_s30] ss:$16 sps:$4 sm:$0xff]   ;;  %v225_v39 = vlaneseq }
  0x5a   : > { %1015 = vmatprep.subr.bf16.mxu0 %v1543_v1  ;;  %v1548_v4 = vld [vmem:[%s2014_s30 + $0x8] ss:$16 sps:$4 sm:$0xff]   ;;  %1097 = vmatprep.subr.bf16.mxu1 %v1545_v2  ;;  %v1549_v5 = vld [vmem:[%s2014_s30 + $0x24] ss:$16 sps:$4 sm:$0xff]   ;;  %v1551_v6 = vld [vmem:[%s2014_s30 + $0x2c] ss:$16 sps:$4 sm:$0xff]  }
  0x5b   : > { %1016 = vmatpush1.bf16.msra.mxu0 %v1547_v3  ;;  %1098 = vmatpush1.bf16.msra.mxu1 %v1548_v4  ;;  %v1553_v7 = vld [vmem:[%s2014_s30 + $0x20] ss:$16 sps:$4 sm:$0xff]   ;;  %v1554_v8 = vld [vmem:[%s2014_s30 + $0x28] ss:$16 sps:$4 sm:$0xff]   ;;  %v1555_v9 = vld [vmem:[%s2014_s30 + $0x44] ss:$16 sps:$4 sm:$0xff]  }
  0x5c   : > { %1017 = vmatprep.subr.bf16.mxu0 %v1549_v5  ;;  %1099 = vmatprep.subr.bf16.mxu1 %v1551_v6  ;;  %v1557_v10 = vld [vmem:[%s2014_s30 + $0x4c] ss:$16 sps:$4 sm:$0xff]   ;;  %v1559_v11 = vld [vmem:[%s2014_s30 + $0x40] ss:$16 sps:$4 sm:$0xff]   ;;  %v1560_v12 = vld [vmem:[%s2014_s30 + $0x48] ss:$16 sps:$4 sm:$0xff]  }
  0x5d   : > { %v1561_v13 = vld [vmem:[%s2014_s30 + $0x64] ss:$16 sps:$4 sm:$0xff]   ;;  %v1563_v14 = vld [vmem:[%s2014_s30 + $0x6c] ss:$16 sps:$4 sm:$0xff]   ;;  %v1565_v15 = vld [vmem:[%s2014_s30 + $0x60] ss:$16 sps:$4 sm:$0xff]  }
  0x5e   : > { %v1566_v16 = vld [vmem:[%s2014_s30 + $0x68] ss:$16 sps:$4 sm:$0xff]   ;;  %v1567_v17 = vld [vmem:[%s2014_s30 + $0x84] ss:$16 sps:$4 sm:$0xff]   ;;  %v1569_v18 = vld [vmem:[%s2014_s30 + $0x8c] ss:$16 sps:$4 sm:$0xff]  }
  0x5f   : > { %1018 = vmatpush1.bf16.msra.mxu0 %v1553_v7  ;;  %1100 = vmatpush1.bf16.msra.mxu1 %v1554_v8  ;;  %v1571_v19 = vld [vmem:[%s2014_s30 + $0x80] ss:$16 sps:$4 sm:$0xff]   ;;  %v1572_v20 = vld [vmem:[%s2014_s30 + $0x88] ss:$16 sps:$4 sm:$0xff]   ;;  %v1573_v21 = vld [vmem:[%s2014_s30 + $0xa4] ss:$16 sps:$4 sm:$0xff]  }
  0x60   : > { %1019 = vmatprep.subr.bf16.mxu0 %v1555_v9  ;;  %1101 = vmatprep.subr.bf16.mxu1 %v1557_v10  ;;  %v1575_v22 = vld [vmem:[%s2014_s30 + $0xac] ss:$16 sps:$4 sm:$0xff]   ;;  %v1577_v23 = vld [vmem:[%s2014_s30 + $0xa0] ss:$16 sps:$4 sm:$0xff]   ;;  %v1578_v24 = vld [vmem:[%s2014_s30 + $0xa8] ss:$16 sps:$4 sm:$0xff]  }
  0x61   : > { %v1579_v25 = vld [vmem:[%s2014_s30 + $0xc4] ss:$16 sps:$4 sm:$0xff]   ;;  %v1581_v26 = vld [vmem:[%s2014_s30 + $0xcc] ss:$16 sps:$4 sm:$0xff]   ;;  %v1583_v27 = vld [vmem:[%s2014_s30 + $0xc0] ss:$16 sps:$4 sm:$0xff]  }
  0x62   : > { %v1584_v28 = vld [vmem:[%s2014_s30 + $0xc8] ss:$16 sps:$4 sm:$0xff]   ;;  %v1585_v29 = vld [vmem:[%s2014_s30 + $0xe4] ss:$16 sps:$4 sm:$0xff]   ;;  %v1587_v30 = vld [vmem:[%s2014_s30 + $0xec] ss:$16 sps:$4 sm:$0xff]  }
  0x63   : > { %1020 = vmatpush1.bf16.msra.mxu0 %v1559_v11  ;;  %1102 = vmatpush1.bf16.msra.mxu1 %v1560_v12  ;;  %v1589_v31 = vld [vmem:[%s2014_s30 + $0xe0] ss:$16 sps:$4 sm:$0xff]   ;;  %v1590_v32 = vld [vmem:[%s2014_s30 + $0xe8] ss:$16 sps:$4 sm:$0xff]   ;;  %v1591_v33 = vld [vmem:[%s2014_s30 + $0x104] ss:$16 sps:$4 sm:$0xff]  }
  0x64   : > { %1021 = vmatprep.subr.bf16.mxu0 %v1561_v13  ;;  %1103 = vmatprep.subr.bf16.mxu1 %v1563_v14  ;;  %v1593_v34 = vld [vmem:[%s2014_s30 + $0x10c] ss:$16 sps:$4 sm:$0xff]   ;;  %v1595_v35 = vld [vmem:[%s2014_s30 + $0x100] ss:$16 sps:$4 sm:$0xff]   ;;  %v1596_v36 = vld [vmem:[%s2014_s30 + $0x108] ss:$16 sps:$4 sm:$0xff]  }
  0x65   : > { %v1869_v37 = vmov 1983009808   ;;  %v1597_v40 = vld [vmem:[%s2014_s30 + $0x124] ss:$16 sps:$4 sm:$0xff]   ;;  %v1599_v41 = vld [vmem:[%s2014_s30 + $0x12c] ss:$16 sps:$4 sm:$0xff]  }
  0x66   : > { %v223_v38 = vunpack.c.l.s4 %v1869_v37  ;;  %v1601_v42 = vld [vmem:[%s2014_s30 + $0x120] ss:$16 sps:$4 sm:$0xff]   ;;  %v2071_v44 = vshrl.u32 %v225_v39, 7  ;;  %v1602_v45 = vld [vmem:[%s2014_s30 + $0x128] ss:$16 sps:$4 sm:$0xff]   ;;  %p1467_p4 = scmp.ne.s32.totalorder %s1910_s16, 15 }
  0x67   : > { %1022 = vmatpush1.bf16.msra.mxu0 %v1565_v15  ;;  %1104 = vmatpush1.bf16.msra.mxu1 %v1566_v16  ;;  %v1603_v46 = vld [vmem:[%s2014_s30 + $0x144] ss:$16 sps:$4 sm:$0xff]   ;;  %v1605_v47 = vld [vmem:[%s2014_s30 + $0x14c] ss:$16 sps:$4 sm:$0xff]   ;;  %v1607_v48 = vld [vmem:[%s2014_s30 + $0x140] ss:$16 sps:$4 sm:$0xff]  }
  0x68   : > { %1023 = vmatprep.subr.bf16.mxu0 %v1567_v17  ;;  %1105 = vmatprep.subr.bf16.mxu1 %v1569_v18  ;;  %v224_v43 = vunpack.c.0.s8 %v223_v38  ;;  %v1608_v49 = vld [vmem:[%s2014_s30 + $0x148] ss:$16 sps:$4 sm:$0xff]   ;;  %v1609_v51 = vld [vmem:[%s2014_s30 + $0x164] ss:$16 sps:$4 sm:$0xff]   ;;  %v1611_v52 = vld [vmem:[%s2014_s30 + $0x16c] ss:$16 sps:$4 sm:$0xff]  }
  0x69   : > { %v219_v53 = vld [vmem:[%s2028_s27] sm:$0xff]  ;;  %v1613_v54 = vld [vmem:[%s2014_s30 + $0x160] ss:$16 sps:$4 sm:$0xff]   ;;  %v1615_v57 = vld [vmem:[%s2014_s30 + $0x184] ss:$16 sps:$4 sm:$0xff]  }
  0x6a   : > { %v2079_v50 = vsub.s32 %v224_v43, %v2071_v44  ;;  %v1614_v56 = vld [vmem:[%s2014_s30 + $0x168] ss:$16 sps:$4 sm:$0xff]   ;;  %v1617_v58 = vld [vmem:[%s2014_s30 + $0x18c] ss:$16 sps:$4 sm:$0xff]   ;;  %v1619_v60 = vld [vmem:[%s2014_s30 + $0x180] ss:$16 sps:$4 sm:$0xff]   ;;  %v221_v5 = vcombine.high %v219_v53, %v219_v53 }
  0x6b   : > { %1024 = vmatpush1.bf16.msra.mxu0 %v1571_v19  ;;  %1106 = vmatpush1.bf16.msra.mxu1 %v1572_v20  ;;  %v1620_v62 = vld [vmem:[%s2014_s30 + $0x188] ss:$16 sps:$4 sm:$0xff]   ;;  %v1621_v63 = vld [vmem:[%s2014_s30 + $0x1a4] ss:$16 sps:$4 sm:$0xff]   ;;  %v1623_v0 = vld [vmem:[%s2014_s30 + $0x1ac] ss:$16 sps:$4 sm:$0xff]  }
  0x6c   : > { %1025 = vmatprep.subr.bf16.mxu0 %v1573_v21  ;;  %1107 = vmatprep.subr.bf16.mxu1 %v1575_v22  ;;  %v228_v55 = vrot.slane %v219_v53, %v2079_v50  ;;  %v1625_v1 = vld [vmem:[%s2014_s30 + $0x1a0] ss:$16 sps:$4 sm:$0xff]   ;;  %v1626_v2 = vld [vmem:[%s2014_s30 + $0x1a8] ss:$16 sps:$4 sm:$0xff]   ;;  %v1627_v3 = vld [vmem:[%s2014_s30 + $0x1c4] ss:$16 sps:$4 sm:$0xff]   ;;  %v2102_v10 = vrot.slane %v221_v5, %v2079_v50 }
  0x6d   : > { %v1629_v4 = vld [vmem:[%s2014_s30 + $0x1cc] ss:$16 sps:$4 sm:$0xff]   ;;  %v1631_v6 = vld [vmem:[%s2014_s30 + $0x1c0] ss:$16 sps:$4 sm:$0xff]   ;;  %v1632_v7 = vld [vmem:[%s2014_s30 + $0x1c8] ss:$16 sps:$4 sm:$0xff]  }
  0x6e   : > { %v236_v59 = vcombine.high %v228_v55, %v228_v55  ;;  %v1633_v8 = vld [vmem:[%s2014_s30 + $0x1e4] ss:$16 sps:$4 sm:$0xff]   ;;  %v1635_v9 = vld [vmem:[%s2014_s30 + $0x1ec] ss:$16 sps:$4 sm:$0xff]   ;;  %v1637_v11 = vld [vmem:[%s2014_s30 + $0x1e0] ss:$16 sps:$4 sm:$0xff]   ;;  %v237_v15 = vcombine.high %v2102_v10, %v2102_v10  ;;  %v242_v17 = vpack.c.bf16 %v228_v55, %v228_v55 }
  0x6f   : > { %1026 = vmatpush1.bf16.msra.mxu0 %v1577_v23  ;;  %1108 = vmatpush1.bf16.msra.mxu1 %v1578_v24  ;;  %v1638_v12 = vld [vmem:[%s2014_s30 + $0x1e8] ss:$16 sps:$4 sm:$0xff]   ;;  %v1642_v13 = vld [vmem:[%s2014_s30 + $0x204] ss:$16 sps:$4 sm:$0xff]   ;;  %v1645_v14 = vld [vmem:[%s2014_s30 + $0x20c] ss:$16 sps:$4 sm:$0xff]  }
  0x70   : > { %1027 = vmatprep.subr.bf16.mxu0 %v1579_v25  ;;  %1109 = vmatprep.subr.bf16.mxu1 %v1581_v26  ;;  %v243_v61 = vpack.c.bf16 %v236_v59, %v236_v59  ;;  %v1640_v16 = vld [vmem:[%s2014_s30 + $0x200] ss:$16 sps:$4 sm:$0xff]   ;;  %v1643_v18 = vld [vmem:[%s2014_s30 + $0x208] ss:$16 sps:$4 sm:$0xff]   ;;  %v1648_v19 = vld [vmem:[%s2014_s30 + $0x224] ss:$16 sps:$4 sm:$0xff]   ;;  %v245_v21 = vpack.c.bf16 %v237_v15, %v237_v15 }
  0x71   : > { %v1651_v20 = vld [vmem:[%s2014_s30 + $0x22c] ss:$16 sps:$4 sm:$0xff]   ;;  %v1646_v22 = vld [vmem:[%s2014_s30 + $0x220] ss:$16 sps:$4 sm:$0xff]   ;;  %v1649_v23 = vld [vmem:[%s2014_s30 + $0x228] ss:$16 sps:$4 sm:$0xff]  }
  0x72   : > { %1047 = vmatprep.mubr.bf16.mxu0 %v243_v61  ;;  %1129 = vmatprep.mubr.bf16.mxu1 %v243_v61  ;;  %v1654_v24 = vld [vmem:[%s2014_s30 + $0x244] ss:$16 sps:$4 sm:$0xff]   ;;  %v1657_v25 = vld [vmem:[%s2014_s30 + $0x24c] ss:$16 sps:$4 sm:$0xff]   ;;  %v1652_v26 = vld [vmem:[%s2014_s30 + $0x240] ss:$16 sps:$4 sm:$0xff]  }
  0x73   : > { %1028 = vmatpush1.bf16.msra.mxu0 %v1583_v27  ;;  %1110 = vmatpush1.bf16.msra.mxu1 %v1584_v28  ;;  %v1655_v27 = vld [vmem:[%s2014_s30 + $0x248] ss:$16 sps:$4 sm:$0xff]   ;;  %v1660_v28 = vld [vmem:[%s2014_s30 + $0x264] ss:$16 sps:$4 sm:$0xff]   ;;  %v1675_v37 = vld [vmem:[%s2014_s30 + $0x2ac] ss:$16 sps:$4 sm:$0xff]  }
  0x74   : > { %1029 = vmatprep.subr.bf16.mxu0 %v1585_v29  ;;  %1111 = vmatprep.subr.bf16.mxu1 %v1587_v30  ;;  %v1663_v29 = vld [vmem:[%s2014_s30 + $0x26c] ss:$16 sps:$4 sm:$0xff]   ;;  %v1658_v30 = vld [vmem:[%s2014_s30 + $0x260] ss:$16 sps:$4 sm:$0xff]   ;;  %v1673_v39 = vld [vmem:[%s2014_s30 + $0x2a8] ss:$16 sps:$4 sm:$0xff]  }
  0x75   : > { %v1670_v38 = vld [vmem:[%s2014_s30 + $0x2a0] ss:$16 sps:$4 sm:$0xff]   ;;  %v1679_v43 = vld [vmem:[%s2014_s30 + $0x2c8] ss:$16 sps:$4 sm:$0xff]   ;;  %v1699_v55 = vld [vmem:[%s2014_s30 + $0x32c] ss:$16 sps:$4 sm:$0xff]  }
  0x76   : > { %v1691_v53 = vld [vmem:[%s2014_s30 + $0x308] ss:$16 sps:$4 sm:$0xff]   ;;  %v1705_v59 = vld [vmem:[%s2014_s30 + $0x34c] ss:$16 sps:$4 sm:$0xff]   ;;  %v1732_v15 = vld [vmem:[%s2014_s30 + $0x3e4] ss:$16 sps:$4 sm:$0xff]  }
  0x77   : > { %1030 = vmatpush1.bf16.msra.mxu0 %v1589_v31  ;;  %1112 = vmatpush1.bf16.msra.mxu1 %v1590_v32  ;;  %v1661_v31 = vld [vmem:[%s2014_s30 + $0x268] ss:$16 sps:$4 sm:$0xff]   ;;  %v1666_v32 = vld [vmem:[%s2014_s30 + $0x284] ss:$16 sps:$4 sm:$0xff]  }
  0x78   : > { %1031 = vmatprep.subr.bf16.mxu0 %v1591_v33  ;;  %1113 = vmatprep.subr.bf16.mxu1 %v1593_v34  ;;  %v1669_v33 = vld [vmem:[%s2014_s30 + $0x28c] ss:$16 sps:$4 sm:$0xff]   ;;  %v1664_v34 = vld [vmem:[%s2014_s30 + $0x280] ss:$16 sps:$4 sm:$0xff]   ;;  %v1703_v61 = vld [vmem:[%s2014_s30 + $0x348] ss:$16 sps:$4 sm:$0xff]  }
  0x79   : > { %v1715_v5 = vld [vmem:[%s2014_s30 + $0x388] ss:$16 sps:$4 sm:$0xff]  }
  0x7b   : > { %1032 = vmatpush1.bf16.msra.mxu0 %v1595_v35  ;;  %1114 = vmatpush1.bf16.msra.mxu1 %v1596_v36  ;;  %v1667_v35 = vld [vmem:[%s2014_s30 + $0x288] ss:$16 sps:$4 sm:$0xff]   ;;  %v1672_v36 = vld [vmem:[%s2014_s30 + $0x2a4] ss:$16 sps:$4 sm:$0xff]  }
  0x7c   : > { %1033 = vmatprep.subr.bf16.mxu0 %v1597_v40  ;;  %1115 = vmatprep.subr.bf16.mxu1 %v1599_v41  ;;  %v1678_v40 = vld [vmem:[%s2014_s30 + $0x2c4] ss:$16 sps:$4 sm:$0xff]   ;;  %v1681_v41 = vld [vmem:[%s2014_s30 + $0x2cc] ss:$16 sps:$4 sm:$0xff]  }
  0x7f   : > { %1034 = vmatpush1.bf16.msra.mxu0 %v1601_v42  ;;  %1116 = vmatpush1.bf16.msra.mxu1 %v1602_v45  ;;  %v1676_v42 = vld [vmem:[%s2014_s30 + $0x2c0] ss:$16 sps:$4 sm:$0xff]   ;;  %v1684_v45 = vld [vmem:[%s2014_s30 + $0x2e4] ss:$16 sps:$4 sm:$0xff]  }
  0x80   : > { %1035 = vmatprep.subr.bf16.mxu0 %v1603_v46  ;;  %1117 = vmatprep.subr.bf16.mxu1 %v1605_v47  ;;  %v1687_v46 = vld [vmem:[%s2014_s30 + $0x2ec] ss:$16 sps:$4 sm:$0xff]   ;;  %v1682_v47 = vld [vmem:[%s2014_s30 + $0x2e0] ss:$16 sps:$4 sm:$0xff]  }
  0x83   : > { %1036 = vmatpush1.bf16.msra.mxu0 %v1607_v48  ;;  %1118 = vmatpush1.bf16.msra.mxu1 %v1608_v49  ;;  %v1685_v48 = vld [vmem:[%s2014_s30 + $0x2e8] ss:$16 sps:$4 sm:$0xff]   ;;  %v1690_v49 = vld [vmem:[%s2014_s30 + $0x304] ss:$16 sps:$4 sm:$0xff]  }
  0x84   : > { %1037 = vmatprep.subr.bf16.mxu0 %v1609_v51  ;;  %1119 = vmatprep.subr.bf16.mxu1 %v1611_v52  ;;  %v1693_v51 = vld [vmem:[%s2014_s30 + $0x30c] ss:$16 sps:$4 sm:$0xff]   ;;  %v1688_v52 = vld [vmem:[%s2014_s30 + $0x300] ss:$16 sps:$4 sm:$0xff]  }
  0x87   : > { %1038 = vmatpush1.bf16.msra.mxu0 %v1613_v54  ;;  %1120 = vmatpush1.bf16.msra.mxu1 %v1614_v56  ;;  %v1696_v54 = vld [vmem:[%s2014_s30 + $0x324] ss:$16 sps:$4 sm:$0xff]   ;;  %v1694_v56 = vld [vmem:[%s2014_s30 + $0x320] ss:$16 sps:$4 sm:$0xff]  }
  0x88   : > { %1039 = vmatprep.subr.bf16.mxu0 %v1615_v57  ;;  %1121 = vmatprep.subr.bf16.mxu1 %v1617_v58  ;;  %v1697_v57 = vld [vmem:[%s2014_s30 + $0x328] ss:$16 sps:$4 sm:$0xff]   ;;  %v1702_v58 = vld [vmem:[%s2014_s30 + $0x344] ss:$16 sps:$4 sm:$0xff]  }
  0x8b   : > { %1040 = vmatpush1.bf16.msra.mxu0 %v1619_v60  ;;  %1122 = vmatpush1.bf16.msra.mxu1 %v1620_v62  ;;  %v1700_v60 = vld [vmem:[%s2014_s30 + $0x340] ss:$16 sps:$4 sm:$0xff]   ;;  %v1708_v62 = vld [vmem:[%s2014_s30 + $0x364] ss:$16 sps:$4 sm:$0xff]  }
  0x8c   : > { %1041 = vmatprep.subr.bf16.mxu0 %v1621_v63  ;;  %1123 = vmatprep.subr.bf16.mxu1 %v1623_v0  ;;  %v1711_v63 = vld [vmem:[%s2014_s30 + $0x36c] ss:$16 sps:$4 sm:$0xff]   ;;  %v1706_v0 = vld [vmem:[%s2014_s30 + $0x360] ss:$16 sps:$4 sm:$0xff]  }
  0x8f   : > { %1042 = vmatpush1.bf16.msra.mxu0 %v1625_v1  ;;  %1124 = vmatpush1.bf16.msra.mxu1 %v1626_v2  ;;  %v1709_v1 = vld [vmem:[%s2014_s30 + $0x368] ss:$16 sps:$4 sm:$0xff]   ;;  %v1714_v2 = vld [vmem:[%s2014_s30 + $0x384] ss:$16 sps:$4 sm:$0xff]  }
  0x90   : > { %1043 = vmatprep.subr.bf16.mxu0 %v1627_v3  ;;  %1125 = vmatprep.subr.bf16.mxu1 %v1629_v4  ;;  %v1717_v3 = vld [vmem:[%s2014_s30 + $0x38c] ss:$16 sps:$4 sm:$0xff]   ;;  %v1712_v4 = vld [vmem:[%s2014_s30 + $0x380] ss:$16 sps:$4 sm:$0xff]  }
  0x93   : > { %1044 = vmatpush1.bf16.msra.mxu0 %v1631_v6  ;;  %1126 = vmatpush1.bf16.msra.mxu1 %v1632_v7  ;;  %v1720_v6 = vld [vmem:[%s2014_s30 + $0x3a4] ss:$16 sps:$4 sm:$0xff]   ;;  %v1723_v7 = vld [vmem:[%s2014_s30 + $0x3ac] ss:$16 sps:$4 sm:$0xff]  }
  0x94   : > { %1045 = vmatprep.subr.bf16.mxu0 %v1633_v8  ;;  %1127 = vmatprep.subr.bf16.mxu1 %v1635_v9  ;;  %v1718_v8 = vld [vmem:[%s2014_s30 + $0x3a0] ss:$16 sps:$4 sm:$0xff]   ;;  %v1721_v9 = vld [vmem:[%s2014_s30 + $0x3a8] ss:$16 sps:$4 sm:$0xff]  }
  0x97   : > { %1046 = vmatpush1.bf16.msra.mxu0 %v1637_v11  ;;  %1128 = vmatpush1.bf16.msra.mxu1 %v1638_v12  ;;  %v1726_v11 = vld [vmem:[%s2014_s30 + $0x3c4] ss:$16 sps:$4 sm:$0xff]   ;;  %v1729_v12 = vld [vmem:[%s2014_s30 + $0x3cc] ss:$16 sps:$4 sm:$0xff]  }
  0x98   : > { %1056 = vmatprep.subr.bf16.mxu0 %v1642_v13  ;;  %1138 = vmatprep.subr.bf16.mxu1 %v1645_v14  ;;  %v1724_v13 = vld [vmem:[%s2014_s30 + $0x3c0] ss:$16 sps:$4 sm:$0xff]   ;;  %v1727_v14 = vld [vmem:[%s2014_s30 + $0x3c8] ss:$16 sps:$4 sm:$0xff]  }
  0x9a   : > { %1048 = vmatmul.mubr.bf16.vlgmr.msra.gmra.mrb[0].mxu0 %v242_v17  ;;  %1130 = vmatmul.mubr.bf16.vlgmr.msra.gmra.mrb[0].mxu1 %v242_v17  ;;  %v1730_v17 = vld [vmem:[%s2014_s30 + $0x3e0] ss:$16 sps:$4 sm:$0xff]  }
  0x9b   : > { %1057 = vmatpush1.bf16.msra.mxu0 %v1640_v16  ;;  %1139 = vmatpush1.bf16.msra.mxu1 %v1643_v18  ;;  %v1735_v16 = vld [vmem:[%s2014_s30 + $0x3ec] ss:$16 sps:$4 sm:$0xff]   ;;  %v1733_v18 = vld [vmem:[%s2014_s30 + $0x3e8] ss:$16 sps:$4 sm:$0xff]  }
  0x9c   : > { %1058 = vmatprep.subr.bf16.mxu0 %v1648_v19  ;;  %1140 = vmatprep.subr.bf16.mxu1 %v1651_v20  ;;  %v244_v19 = vpack.c.bf16 %v2102_v10, %v2102_v10 }
  0x9d   : > { %1088 = vmatprep.mubr.bf16.mxu0 %v245_v21  ;;  %1170 = vmatprep.mubr.bf16.mxu1 %v245_v21 }
  0x9f   : > { %1059 = vmatpush1.bf16.msra.mxu0 %v1646_v22  ;;  %1141 = vmatpush1.bf16.msra.mxu1 %v1649_v23 }
  0xa0   : > { %1060 = vmatprep.subr.bf16.mxu0 %v1654_v24  ;;  %1142 = vmatprep.subr.bf16.mxu1 %v1657_v25 }
  0xa3   : > { %1061 = vmatpush1.bf16.msra.mxu0 %v1652_v26  ;;  %1143 = vmatpush1.bf16.msra.mxu1 %v1655_v27 }
  0xa4   : > { %1062 = vmatprep.subr.bf16.mxu0 %v1660_v28  ;;  %1144 = vmatprep.subr.bf16.mxu1 %v1663_v29 }
  0xa7   : > { %1063 = vmatpush1.bf16.msra.mxu0 %v1658_v30  ;;  %1145 = vmatpush1.bf16.msra.mxu1 %v1661_v31 }
  0xa8   : > { %1064 = vmatprep.subr.bf16.mxu0 %v1666_v32  ;;  %1146 = vmatprep.subr.bf16.mxu1 %v1669_v33  ;;  %v246_v32 = vld [vmem:[#allocation2] sm:$0xff] }
  0xab   : > { %1065 = vmatpush1.bf16.msra.mxu0 %v1664_v34  ;;  %1147 = vmatpush1.bf16.msra.mxu1 %v1667_v35  ;;  %v1208_v34 = vld [vmem:[#allocation6] sm:$0xf] (!%p1467_p4)  ;;  %v1212_v35 = vsub.s32 (!%p1467_p4), 0, %v2071_v44 }
  0xac   : > { %1066 = vmatprep.subr.bf16.mxu0 %v1672_v36  ;;  %1148 = vmatprep.subr.bf16.mxu1 %v1675_v37  ;;  %v1216_v36 = vsub.s32 (!%p1467_p4), 1, %v2071_v44  ;;  %v1220_v37 = vsub.s32 (!%p1467_p4), 2, %v2071_v44 }
  0xaf   : > { %1067 = vmatpush1.bf16.msra.mxu0 %v1670_v38  ;;  %1149 = vmatpush1.bf16.msra.mxu1 %v1673_v39  ;;  %v1224_v38 = vsub.s32 (!%p1467_p4), 3, %v2071_v44  ;;  %v1213_v39 = vrot.slane (!%p1467_p4), %v1208_v34, %v1212_v35 }
  0xb0   : > { %1068 = vmatprep.subr.bf16.mxu0 %v1678_v40  ;;  %1150 = vmatprep.subr.bf16.mxu1 %v1681_v41  ;;  %v1217_v40 = vrot.slane (!%p1467_p4), %v1208_v34, %v1216_v36  ;;  %v1221_v41 = vrot.slane (!%p1467_p4), %v1208_v34, %v1220_v37 }
  0xb3   : > { %1069 = vmatpush1.bf16.msra.mxu0 %v1676_v42  ;;  %1151 = vmatpush1.bf16.msra.mxu1 %v1679_v43  ;;  %v1225_v42 = vrot.slane (!%p1467_p4), %v1208_v34, %v1224_v38  ;;  %v1226_v43 = vcombine.low (!%p1467_p4), %v1213_v39, %v1217_v40 }
  0xb4   : > { %1070 = vmatprep.subr.bf16.mxu0 %v1684_v45  ;;  %1152 = vmatprep.subr.bf16.mxu1 %v1687_v46 }
  0xb5   : > { %v1227_v45 = vcombine.low (!%p1467_p4), %v1221_v41, %v1225_v42  ;;  %v1234_v46 = vrot.slane (!%p1467_p4), %v1226_v43, %v2079_v50 }
  0xb7   : > { %1071 = vmatpush1.bf16.msra.mxu0 %v1682_v47  ;;  %1153 = vmatpush1.bf16.msra.mxu1 %v1685_v48  ;;  %v1241_v47 = vrot.slane (!%p1467_p4), %v1227_v45, %v2079_v50 }
  0xb8   : > { %1072 = vmatprep.subr.bf16.mxu0 %v1690_v49  ;;  %1154 = vmatprep.subr.bf16.mxu1 %v1693_v51 }
  0xb9   : > { %v1242_v49 = vcombine.low (!%p1467_p4), %v1234_v46, %v1241_v47 }
  0xbb   : > { %1073 = vmatpush1.bf16.msra.mxu0 %v1688_v52  ;;  %1155 = vmatpush1.bf16.msra.mxu1 %v1691_v53 }
  0xbc   : > { %1074 = vmatprep.subr.bf16.mxu0 %v1696_v54  ;;  %1156 = vmatprep.subr.bf16.mxu1 %v1699_v55 }
  0xbf   : > { %1075 = vmatpush1.bf16.msra.mxu0 %v1694_v56  ;;  %1157 = vmatpush1.bf16.msra.mxu1 %v1697_v57 }
  0xc0   : > { %1076 = vmatprep.subr.bf16.mxu0 %v1702_v58  ;;  %1158 = vmatprep.subr.bf16.mxu1 %v1705_v59 }
  0xc3   : > { %1077 = vmatpush1.bf16.msra.mxu0 %v1700_v60  ;;  %1159 = vmatpush1.bf16.msra.mxu1 %v1703_v61 }
  0xc4   : > { %1078 = vmatprep.subr.bf16.mxu0 %v1708_v62  ;;  %1160 = vmatprep.subr.bf16.mxu1 %v1711_v63 }
  0xc7   : > { %1079 = vmatpush1.bf16.msra.mxu0 %v1706_v0  ;;  %1161 = vmatpush1.bf16.msra.mxu1 %v1709_v1 }
  0xc8   : > { %1080 = vmatprep.subr.bf16.mxu0 %v1714_v2  ;;  %1162 = vmatprep.subr.bf16.mxu1 %v1717_v3 }
  0xcb   : > { %1081 = vmatpush1.bf16.msra.mxu0 %v1712_v4  ;;  %1163 = vmatpush1.bf16.msra.mxu1 %v1715_v5 }
  0xcc   : > { %1082 = vmatprep.subr.bf16.mxu0 %v1720_v6  ;;  %1164 = vmatprep.subr.bf16.mxu1 %v1723_v7 }
  0xcf   : > { %1083 = vmatpush1.bf16.msra.mxu0 %v1718_v8  ;;  %1165 = vmatpush1.bf16.msra.mxu1 %v1721_v9 }
  0xd0   : > { %1084 = vmatprep.subr.bf16.mxu0 %v1726_v11  ;;  %1166 = vmatprep.subr.bf16.mxu1 %v1729_v12 }
  0xd3   : > { %1085 = vmatpush1.bf16.msra.mxu0 %v1724_v13  ;;  %1167 = vmatpush1.bf16.msra.mxu1 %v1727_v14 }
  0xd4   : > { %1086 = vmatprep.subr.bf16.mxu0 %v1732_v15  ;;  %1168 = vmatprep.subr.bf16.mxu1 %v1735_v16 }
  0xd7   : > { %1087 = vmatpush1.bf16.msra.mxu0 %v1730_v17  ;;  %1169 = vmatpush1.bf16.msra.mxu1 %v1733_v18 }
  0xda   : > { %1089 = vmatmul.mubr.bf16.vlgmr.msra.gmra.mrb[0].mxu0 %v244_v19  ;;  %1171 = vmatmul.mubr.bf16.vlgmr.msra.gmra.mrb[0].mxu1 %v244_v19 }
 0x1ad   : > { %v1090_v20 = vpop.f32.mrb[0].mxu0  ;;  %v1172_v21 = vpop.f32.mrb[0].mxu1 }
 0x1ae   : > { %v1092_v22 = vpop.f32.mrb[1].mxu0  ;;  %v1174_v23 = vpop.f32.mrb[1].mxu1 }
 0x1af   : > { %v1183_v24 = vcombine.low %v1090_v20, %v1092_v22  ;;  %v1184_v25 = vcombine.low %v1172_v21, %v1174_v23  ;;  %v1094_v26 = vpop.f32.mrb[2].mxu0  ;;  %v1176_v27 = vpop.f32.mrb[2].mxu1 }
 0x1b0   : > { %v1095_v28 = vpop.f32.mrb[3].mxu0  ;;  %v1177_v29 = vpop.f32.mrb[3].mxu1 }
 0x1b1   : > { %v1191_v30 = vrot.slane %v1183_v24, %v2079_v50  ;;  %v1198_v31 = vrot.slane %v1184_v25, %v2079_v50  ;;  %1206 = sbr.rel (%p1467_p4) target bundleno = 450 (0x1c2), region = 48 }
 0x1b3   : > { %v1199_v10 = vcombine.low %v1191_v30, %v1198_v31 }
 0x1b5   : > { %v1201_v33 = vadd.f32 %v1199_v10, %v246_v32 }
 0x1b7   : > { %1202 = vst [vmem:[#allocation2] sm:$0xff] %v1201_v33 }
 0x1be   : > { %v1207_v48 = vld [vmem:[#allocation2] sm:$0xff] }
 0x1bf   : > { %v1244_v51 = vadd.f32 %v1242_v49, %v1207_v48 }
 0x1c1   : > { %1245 = vst [vmem:[#allocation8] sm:$0xff] %v1244_v51 }
 0x1c2 PF: > { %p1503_p7 = scmp.eq.s32.totalorder %s1910_s16, 15  ;;  %s1870_s22 = smov [#allocation8]  }
 0x1c3   : > { %s1253_s5 = sshll.u32 %s1870_s22, 4  ;;  %s1254_s5 = int_to_ptr.vmem [resolvable:$true] %s1253_s5 }
 0x1c4   : > { %s1794_s15 = scalar_lea.vmem %s1254_s5, 128  ;;  %p1801_p10 = scmp.lt.s32.totalorder %s1254_s5, %s1254_s5 }
 0x1c5   : > { %p1795_p11 = scmp.ne.s32.totalorder %s1254_s5, %s1794_s15  ;;  %p1802_p0 = scmp.lt.s32.totalorder %s1794_s15, %s1794_s15 }
 0x1c7   : > { %p1796_p12 = pnand %p1795_p11, %p1503_p7  ;;  %p1803_p1 = por %p1802_p0, %p1801_p10 }
 0x1c9   : > { %p1797_p5 = pneg %p1796_p12 }
 0x1cb   : > { %p1804_p9 = pnand %p1803_p1, %p1797_p5 }
 0x1cd   : > { %1807 = shalt.err (!%p1804_p9)
}
 0x1ce   : > { %s1808_s7 = scalar_lea.hbm %s2222_s3, 128 }
 0x1cf   : > { %p1809_p13 = scmp.ne.s32.totalorder %s2222_s3, %s1808_s7  ;;  %p1814_p3 = scmp.lt.u32.totalorder %s1808_s7, %s2222_s3 }
 0x1d1   : > { %p1810_p2 = pnand %p1809_p13, %p1503_p7 }
 0x1d3   : > { %p1811_p8 = pneg %p1810_p2 }
 0x1d5   : > { %p1816_p6 = pnand %p1814_p3, %p1811_p8 }
 0x1d7   : > { %1819 = shalt.err (!%p1816_p6)
}
 0x1d8   : > { %1489 = dma.vmem_to_hbm [thread:$0]  (%p1503_p7), %s1254_s5, 128, %s2222_s3, [#allocation5]  }
 0x1d9   : > { %1845 = dma.done.wait (%p1503_p7), [#allocation5], 128  }
 0x1da   : > { %1847 = vsyncadd (%p1503_p7), [#allocation5], 4294967168 }
 0x1db PF: > { %p15_p4 = scmp.ge.s32.totalorder %s1913_s17, 18   ;;  %s2238_s12 = smov %s1854_s13 }
 0x1dc   : > { %s2239_s13 = smov %s1858_s14  ;;  %s2240_s14 = smov %s1923_s20 }
 0x1dd   : > { %s2241_s15 = smov %s1913_s17  ;;  %17 = sbr.rel (!%p15_p4) target bundleno = 5 (0x5), region = 84 }
 0x1e4   :  { %1266 = vsyncpa [#allocation4], 1 }
 0x1e5   :  { %1268 = vsyncpa [#allocation4 + $0x1], 1 }
 0x1e6   :  { %1269 = vsyncpa [#allocation7], 1 }
 0x1e7   :  { %1270 = vsyncpa [#allocation5], 1 }
 0x1e8   :  { %1272 = vsyncpa [#allocation5 + $0x1], 1 }

</bundles_post_ra>
